<compile_context>
chip_gen: v5e
topology: v5e:2x2
jax: 0.10.0
libtpu: 0.0.40
codegen_flags: <defaults>
</compile_context>

<pallas_src>
import jax
import jax.numpy as jnp
from jax import lax
from jax.experimental import pallas as pl
from jax.experimental.pallas import tpu as pltpu


def _lstm_fc_kernel(x_ref,
                    wih0_ref, whh0f_ref, whh0b_ref, b0_ref,
                    wih1f_ref, wih1b_ref, whh1f_ref, whh1b_ref, b1_ref,
                    wfcf_ref, wfcb_ref, bfc_ref,
                    out_ref,
                    l0f, l0b, l1f, l1b, pre):
    """x_ref: (T, Bp, E)
    wih0: (E, 8H)   whh0f/whh0b: (H, 4H)   b0: (1, 8H)      (fwd gates | bwd gates)
    wih1f/wih1b: (H, 8H)  whh1f/whh1b: (H, 4H)  b1: (1, 8H)
    wfcf/wfcb: (H, Cp)    bfc: (1, Cp)
    out_ref: (T*Bp, Cp)
    scratch: l0f,l0b,l1f,l1b: (T, Bp, H) ; pre: (T, Bp, 8H)"""
    T, Bp, E = x_ref.shape
    H = whh0f_ref.shape[0]
    H4 = 4 * H

    # ---------------- layer 0: hoisted input projection (bias folded in) ----------------
    x2 = x_ref[...].reshape(T * Bp, E)
    pre[...] = (jnp.dot(x2, wih0_ref[...], preferred_element_type=jnp.float32)
                + b0_ref[...]).reshape(T, Bp, 2 * H4)

    def run_layer(out_f, out_b, whhf_ref, whhb_ref):
        whhf = whhf_ref[...]
        whhb = whhb_ref[...]

        def cell(pg, h, c, whh):
            # pg already contains x@W_ih + b_ih + b_hh for this direction/timestep.
            gates = pg + jnp.dot(h, whh, preferred_element_type=jnp.float32)
            # PyTorch LSTM gate order: i, f, g, o
            i = jax.nn.sigmoid(gates[:, 0 * H:1 * H])
            f = jax.nn.sigmoid(gates[:, 1 * H:2 * H])
            g = jnp.tanh(gates[:, 2 * H:3 * H])
            o = jax.nn.sigmoid(gates[:, 3 * H:4 * H])
            c_new = f * c + i * g
            h_new = o * jnp.tanh(c_new)
            return h_new, c_new

        def step(s, carry):
            hf, cf, hb, cb = carry
            tb = T - 1 - s
            pf = pre[s][:, :H4]          # fwd gates for time s
            pb = pre[tb][:, H4:]         # bwd gates for time T-1-s
            hf, cf = cell(pf, hf, cf, whhf)
            hb, cb = cell(pb, hb, cb, whhb)
            out_f[s] = hf
            out_b[tb] = hb
            return hf, cf, hb, cb

        z = jnp.zeros((Bp, H), jnp.float32)
        lax.fori_loop(0, T, step, (z, z, z, z), unroll=True)

    run_layer(l0f, l0b, whh0f_ref, whh0b_ref)

    # -------- layer 1: hoisted input projection from layer-0 outputs (no concat) --------
    f2 = l0f[...].reshape(T * Bp, H)
    b2 = l0b[...].reshape(T * Bp, H)
    pre[...] = (jnp.dot(f2, wih1f_ref[...], preferred_element_type=jnp.float32)
                + jnp.dot(b2, wih1b_ref[...], preferred_element_type=jnp.float32)
                + b1_ref[...]).reshape(T, Bp, 2 * H4)

    run_layer(l1f, l1b, whh1f_ref, whh1b_ref)

    # ---------------- final linear (dropout is identity in eval mode) ----------------
    logits = (jnp.dot(l1f[...].reshape(T * Bp, H), wfcf_ref[...],
                      preferred_element_type=jnp.float32)
              + jnp.dot(l1b[...].reshape(T * Bp, H), wfcb_ref[...],
                        preferred_element_type=jnp.float32)
              + bfc_ref[...])
    out_ref[...] = logits


def init_params(key, vocab=64, E=32, H=32, C=10):
    """PyTorch-layout parameters (w_ih: (4H,in), w_hh: (4H,H), fc: (C,2H))."""
    ks = jax.random.split(key, 20)

    def u(k, shape, scale):
        return jax.random.uniform(k, shape, jnp.float32, -scale, scale)

    s = 1.0 / float(jnp.sqrt(H))
    sfc = 1.0 / float(jnp.sqrt(2 * H))
    p = {}
    p['embed'] = jax.random.normal(ks[0], (vocab, E), jnp.float32) * 0.02
    idx = 1
    for layer, in_size in ((0, E), (1, 2 * H)):
        for d in ('f', 'b'):
            p[f'w_ih_l{layer}{d}'] = u(ks[idx], (4 * H, in_size), s); idx += 1
            p[f'w_hh_l{layer}{d}'] = u(ks[idx], (4 * H, H), s); idx += 1
            p[f'b_ih_l{layer}{d}'] = u(ks[idx], (4 * H,), s); idx += 1
            p[f'b_hh_l{layer}{d}'] = u(ks[idx], (4 * H,), s); idx += 1
    p['w_fc'] = u(ks[17], (C, 2 * H), sfc)
    p['b_fc'] = u(ks[18], (C,), sfc)
    return p


def prepare_kernel_params(params, lane_pad=128):
    """One-time repack of PyTorch-layout weights into kernel layout
    (transposes, fwd/bwd concat on lanes, b_ih+b_hh folding, lane padding of fc)."""
    H = params['w_hh_l0f'].shape[1]
    C = params['w_fc'].shape[0]
    Cp = max(lane_pad, ((C + lane_pad - 1) // lane_pad) * lane_pad)

    def dir_w(layer, d):
        wih = params[f'w_ih_l{layer}{d}'].T                  # (in, 4H)
        whh = params[f'w_hh_l{layer}{d}'].T                  # (H, 4H)
        b = params[f'b_ih_l{layer}{d}'] + params[f'b_hh_l{layer}{d}']
        return wih, whh, b

    kp = {'embed': params['embed'], 'C': C}

    wih0f, whh0f, b0f = dir_w(0, 'f')
    wih0b, whh0b, b0b = dir_w(0, 'b')
    kp['wih0'] = jnp.concatenate([wih0f, wih0b], axis=1)     # (E, 8H)
    kp['b0'] = jnp.concatenate([b0f, b0b]).reshape(1, -1)    # (1, 8H)
    kp['whh0f'], kp['whh0b'] = whh0f, whh0b

    wih1f, whh1f, b1f = dir_w(1, 'f')
    wih1b, whh1b, b1b = dir_w(1, 'b')
    wih1 = jnp.concatenate([wih1f, wih1b], axis=1)           # (2H, 8H)
    kp['wih1_f'] = wih1[:H]                                  # multiplies layer-0 fwd out
    kp['wih1_b'] = wih1[H:]                                  # multiplies layer-0 bwd out
    kp['b1'] = jnp.concatenate([b1f, b1b]).reshape(1, -1)
    kp['whh1f'], kp['whh1b'] = whh1f, whh1b

    wfc = jnp.pad(params['w_fc'].T, ((0, 0), (0, Cp - C)))   # (2H, Cp), lane-padded
    kp['wfc_f'] = wfc[:H]
    kp['wfc_b'] = wfc[H:]
    kp['bfc'] = jnp.pad(params['b_fc'], (0, Cp - C)).reshape(1, -1)
    return kp


def diacritic_predictor_forward(kp, input_ids, input_values=None,
                                text_attention_mask=None,
                                speech_attention_mask=None):
    # TODO(synk): stand-in for the frozen SpeechT5 text encoder (see header).
    text_emb = jnp.take(kp['embed'], input_ids, axis=0)      # (B, T, E)
    B, T, E = text_emb.shape
    H = kp['whh0f'].shape[0]
    C = kp['C']
    Cp = kp['wfc_f'].shape[1]

    Bp = ((B + 7) // 8) * 8                                  # sublane-pad the batch
    x = jnp.transpose(text_emb, (1, 0, 2)).astype(jnp.float32)   # time-major (T, B, E)
    x = jnp.pad(x, ((0, 0), (0, Bp - B), (0, 0)))            # zero-padded rows, sliced off later

    args = [x,
            kp['wih0'], kp['whh0f'], kp['whh0b'], kp['b0'],
            kp['wih1_f'], kp['wih1_b'], kp['whh1f'], kp['whh1b'], kp['b1'],
            kp['wfc_f'], kp['wfc_b'], kp['bfc']]

    out = pl.pallas_call(
        _lstm_fc_kernel,
        out_shape=jax.ShapeDtypeStruct((T * Bp, Cp), jnp.float32),
        in_specs=[pl.BlockSpec(memory_space=pltpu.MemorySpace.VMEM)] * len(args),
        out_specs=pl.BlockSpec(memory_space=pltpu.MemorySpace.VMEM),
        scratch_shapes=[pltpu.VMEM((T, Bp, H), jnp.float32)] * 4
                      + [pltpu.VMEM((T, Bp, 8 * H), jnp.float32)],
    )(*args)

    # nn.Dropout(0.3) in eval mode is the identity.
    out = out.reshape(T, Bp, Cp)[:, :B, :C]                  # drop batch / class padding
    return jnp.transpose(out, (1, 0, 2))                     # (B, T, C) batch_first


# ---------------- pure-JAX reference (for correctness check) ----------------
def _ref_forward(params, input_ids):
    text_emb = jnp.take(params['embed'], input_ids, axis=0)  # (B, T, E)

    def dir_pass(xs, wih, whh, bih, bhh, reverse):
        H = whh.shape[1]
        B = xs.shape[0]
        xs_t = jnp.transpose(xs, (1, 0, 2))
        if reverse:
            xs_t = xs_t[::-1]

        def step(carry, x_t):
            h, c = carry
            gates = x_t @ wih.T + h @ whh.T + bih + bhh
            i = jax.nn.sigmoid(gates[:, :H])
            f = jax.nn.sigmoid(gates[:, H:2 * H])
            g = jnp.tanh(gates[:, 2 * H:3 * H])
            o = jax.nn.sigmoid(gates[:, 3 * H:])
            c = f * c + i * g
            h = o * jnp.tanh(c)
            return (h, c), h

        init = (jnp.zeros((B, H), jnp.float32), jnp.zeros((B, H), jnp.float32))
        _, hs = lax.scan(step, init, xs_t)
        if reverse:
            hs = hs[::-1]
        return jnp.transpose(hs, (1, 0, 2))

    def bi_layer(xs, layer):
        fwd = dir_pass(xs, params[f'w_ih_l{layer}f'], params[f'w_hh_l{layer}f'],
                       params[f'b_ih_l{layer}f'], params[f'b_hh_l{layer}f'], False)
        bwd = dir_pass(xs, params[f'w_ih_l{layer}b'], params[f'w_hh_l{layer}b'],
                       params[f'b_ih_l{layer}b'], params[f'b_hh_l{layer}b'], True)
        return jnp.concatenate([fwd, bwd], axis=-1)

    out = bi_layer(bi_layer(text_emb, 0), 1)
    return out @ params['w_fc'].T + params['b_fc']


if __name__ == "__main__":
    key = jax.random.PRNGKey(0)
    pkey, dkey = jax.random.split(key)

    B, T, vocab, E, H, C = 2, 8, 64, 32, 32, 10
    params = init_params(pkey, vocab=vocab, E=E, H=H, C=C)
    kparams = prepare_kernel_params(params)                  # one-time weight repack

    input_ids = jax.random.randint(dkey, (B, T), 0, vocab)
    input_values = jnp.zeros((B, 16), jnp.float32)           # unused (speech path not taken)
    text_attention_mask = jnp.ones((B, T), jnp.int32)        # consumed only by stand-in encoder
    speech_attention_mask = jnp.ones((B, 16), jnp.int32)     # unused

    logits = diacritic_predictor_forward(kparams, input_ids, input_values,
                                         text_attention_mask, speech_attention_mask)
    logits = jax.block_until_ready(logits)

    ref = _ref_forward(params, input_ids)
    assert logits.shape == (B, T, C), logits.shape
    assert jnp.allclose(logits, ref, atol=1e-4, rtol=1e-4), \
        float(jnp.max(jnp.abs(logits - ref)))

    print("KERNEL_OK")
</pallas_src>

<mosaic_0001>
module attributes {stable_mosaic.version = 11 : i64} {
  func.func @_lstm_fc_kernel(%arg0: memref<8x8x32xf32, #tpu.memory_space<vmem>>, %arg1: memref<32x256xf32, #tpu.memory_space<vmem>>, %arg2: memref<32x128xf32, #tpu.memory_space<vmem>>, %arg3: memref<32x128xf32, #tpu.memory_space<vmem>>, %arg4: memref<1x256xf32, #tpu.memory_space<vmem>>, %arg5: memref<32x256xf32, #tpu.memory_space<vmem>>, %arg6: memref<32x256xf32, #tpu.memory_space<vmem>>, %arg7: memref<32x128xf32, #tpu.memory_space<vmem>>, %arg8: memref<32x128xf32, #tpu.memory_space<vmem>>, %arg9: memref<1x256xf32, #tpu.memory_space<vmem>>, %arg10: memref<32x128xf32, #tpu.memory_space<vmem>>, %arg11: memref<32x128xf32, #tpu.memory_space<vmem>>, %arg12: memref<1x128xf32, #tpu.memory_space<vmem>>, %arg13: memref<64x128xf32, #tpu.memory_space<vmem>>, %arg14: memref<8x8x32xf32, #tpu.memory_space<vmem>>, %arg15: memref<8x8x32xf32, #tpu.memory_space<vmem>>, %arg16: memref<8x8x32xf32, #tpu.memory_space<vmem>>, %arg17: memref<8x8x32xf32, #tpu.memory_space<vmem>>, %arg18: memref<8x8x256xf32, #tpu.memory_space<vmem>>) attributes {dimension_semantics = [], scalar_prefetch = 0 : i64, scratch_operands = 5 : i64, tpu.core_type = #tpu.core_type<tc>} {
    %c0 = arith.constant 0 : index
    %c0_0 = arith.constant 0 : index
    %c0_1 = arith.constant 0 : index
    %0 = vector.load %arg0[%c0, %c0_0, %c0_1] : memref<8x8x32xf32, #tpu.memory_space<vmem>>, vector<8x8x32xf32>
    %1 = vector.shape_cast %0 : vector<8x8x32xf32> to vector<64x32xf32>
    %c0_2 = arith.constant 0 : index
    %c0_3 = arith.constant 0 : index
    %2 = vector.load %arg1[%c0_2, %c0_3] : memref<32x256xf32, #tpu.memory_space<vmem>>, vector<32x256xf32>
    %cst = arith.constant dense<0.000000e+00> : vector<64x256xf32>
    %3 = tpu.matmul %1, %2, %cst {dimension_numbers = #tpu.dot_dimension_numbers<[1], [0], [0], [1], [0, 0, 1, 1], [], []>} : vector<64x32xf32>, vector<32x256xf32>, vector<64x256xf32> -> vector<64x256xf32>
    %c0_4 = arith.constant 0 : index
    %c0_5 = arith.constant 0 : index
    %4 = vector.load %arg4[%c0_4, %c0_5] : memref<1x256xf32, #tpu.memory_space<vmem>>, vector<1x256xf32>
    %5 = vector.broadcast %4 : vector<1x256xf32> to vector<64x256xf32>
    %6 = arith.addf %3, %5 : vector<64x256xf32>
    %7 = vector.shape_cast %6 : vector<64x256xf32> to vector<8x8x256xf32>
    %c0_6 = arith.constant 0 : index
    %c0_7 = arith.constant 0 : index
    %c0_8 = arith.constant 0 : index
    %8 = vector.load %arg18[%c0_6, %c0_7, %c0_8] : memref<8x8x256xf32, #tpu.memory_space<vmem>>, vector<8x8x256xf32>
    tpu.vector_store %arg18[%c0_6, %c0_7, %c0_8], %7 {strides = array<i32>} : memref<8x8x256xf32, #tpu.memory_space<vmem>>, vector<8x8x256xf32>,
    %c0_9 = arith.constant 0 : index
    %c0_10 = arith.constant 0 : index
    %9 = vector.load %arg2[%c0_9, %c0_10] : memref<32x128xf32, #tpu.memory_space<vmem>>, vector<32x128xf32>
    %c0_11 = arith.constant 0 : index
    %c0_12 = arith.constant 0 : index
    %10 = vector.load %arg3[%c0_11, %c0_12] : memref<32x128xf32, #tpu.memory_space<vmem>>, vector<32x128xf32>
    %cst_13 = arith.constant 0.000000e+00 : f32
    %11 = vector.broadcast %cst_13 : f32 to vector<8x32xf32>
    %c0_i32 = arith.constant 0 : i32
    %c7_i32 = arith.constant 7 : i32
    %12 = arith.subi %c7_i32, %c0_i32 : i32
    %13 = arith.index_cast %c0_i32 : i32 to index
    %c0_14 = arith.constant 0 : index
    %c0_15 = arith.constant 0 : index
    %14 = vector.load %arg18[%13, %c0_14, %c0_15] : memref<8x8x256xf32, #tpu.memory_space<vmem>>, vector<1x8x256xf32>
    %15 = vector.shape_cast %14 : vector<1x8x256xf32> to vector<8x256xf32>
    %16 = vector.extract_strided_slice %15 {offsets = [0, 0], sizes = [8, 128], strides = [1, 1]} : vector<8x256xf32> to vector<8x128xf32>
    %17 = arith.index_cast %12 : i32 to index
    %c0_16 = arith.constant 0 : index
    %c0_17 = arith.constant 0 : index
    %18 = vector.load %arg18[%17, %c0_16, %c0_17] : memref<8x8x256xf32, #tpu.memory_space<vmem>>, vector<1x8x256xf32>
    %19 = vector.shape_cast %18 : vector<1x8x256xf32> to vector<8x256xf32>
    %20 = vector.extract_strided_slice %19 {offsets = [0, 128], sizes = [8, 128], strides = [1, 1]} : vector<8x256xf32> to vector<8x128xf32>
    %cst_18 = arith.constant dense<0.000000e+00> : vector<8x128xf32>
    %21 = tpu.matmul %11, %9, %cst_18 {dimension_numbers = #tpu.dot_dimension_numbers<[1], [0], [0], [1], [0, 0, 1, 1], [], []>} : vector<8x32xf32>, vector<32x128xf32>, vector<8x128xf32> -> vector<8x128xf32>
    %22 = arith.addf %16, %21 : vector<8x128xf32>
    %23 = vector.extract_strided_slice %22 {offsets = [0, 0], sizes = [8, 32], strides = [1, 1]} : vector<8x128xf32> to vector<8x32xf32>
    %24 = arith.negf %23 : vector<8x32xf32>
    %25 = math.exp %24 : vector<8x32xf32>
    %cst_19 = arith.constant 1.000000e+00 : f32
    %26 = vector.broadcast %cst_19 : f32 to vector<8x32xf32>
    %27 = arith.addf %26, %25 : vector<8x32xf32>
    %28 = arith.divf %26, %27 : vector<8x32xf32>
    %29 = vector.extract_strided_slice %22 {offsets = [0, 32], sizes = [8, 32], strides = [1, 1]} : vector<8x128xf32> to vector<8x32xf32>
    %30 = arith.negf %29 : vector<8x32xf32>
    %31 = math.exp %30 : vector<8x32xf32>
    %cst_20 = arith.constant 1.000000e+00 : f32
    %32 = vector.broadcast %cst_20 : f32 to vector<8x32xf32>
    %33 = arith.addf %32, %31 : vector<8x32xf32>
    %34 = arith.divf %32, %33 : vector<8x32xf32>
    %35 = vector.extract_strided_slice %22 {offsets = [0, 64], sizes = [8, 32], strides = [1, 1]} : vector<8x128xf32> to vector<8x32xf32>
    %36 = math.tanh %35 : vector<8x32xf32>
    %37 = vector.extract_strided_slice %22 {offsets = [0, 96], sizes = [8, 32], strides = [1, 1]} : vector<8x128xf32> to vector<8x32xf32>
    %38 = arith.negf %37 : vector<8x32xf32>
    %39 = math.exp %38 : vector<8x32xf32>
    %cst_21 = arith.constant 1.000000e+00 : f32
    %40 = vector.broadcast %cst_21 : f32 to vector<8x32xf32>
    %41 = arith.addf %40, %39 : vector<8x32xf32>
    %42 = arith.divf %40, %41 : vector<8x32xf32>
    %43 = arith.mulf %34, %11 : vector<8x32xf32>
    %44 = arith.mulf %28, %36 : vector<8x32xf32>
    %45 = arith.addf %43, %44 : vector<8x32xf32>
    %46 = math.tanh %45 : vector<8x32xf32>
    %47 = arith.mulf %42, %46 : vector<8x32xf32>
    %cst_22 = arith.constant dense<0.000000e+00> : vector<8x128xf32>
    %48 = tpu.matmul %11, %10, %cst_22 {dimension_numbers = #tpu.dot_dimension_numbers<[1], [0], [0], [1], [0, 0, 1, 1], [], []>} : vector<8x32xf32>, vector<32x128xf32>, vector<8x128xf32> -> vector<8x128xf32>
    %49 = arith.addf %20, %48 : vector<8x128xf32>
    %50 = vector.extract_strided_slice %49 {offsets = [0, 0], sizes = [8, 32], strides = [1, 1]} : vector<8x128xf32> to vector<8x32xf32>
    %51 = arith.negf %50 : vector<8x32xf32>
    %52 = math.exp %51 : vector<8x32xf32>
    %cst_23 = arith.constant 1.000000e+00 : f32
    %53 = vector.broadcast %cst_23 : f32 to vector<8x32xf32>
    %54 = arith.addf %53, %52 : vector<8x32xf32>
    %55 = arith.divf %53, %54 : vector<8x32xf32>
    %56 = vector.extract_strided_slice %49 {offsets = [0, 32], sizes = [8, 32], strides = [1, 1]} : vector<8x128xf32> to vector<8x32xf32>
    %57 = arith.negf %56 : vector<8x32xf32>
    %58 = math.exp %57 : vector<8x32xf32>
    %cst_24 = arith.constant 1.000000e+00 : f32
    %59 = vector.broadcast %cst_24 : f32 to vector<8x32xf32>
    %60 = arith.addf %59, %58 : vector<8x32xf32>
    %61 = arith.divf %59, %60 : vector<8x32xf32>
    %62 = vector.extract_strided_slice %49 {offsets = [0, 64], sizes = [8, 32], strides = [1, 1]} : vector<8x128xf32> to vector<8x32xf32>
    %63 = math.tanh %62 : vector<8x32xf32>
    %64 = vector.extract_strided_slice %49 {offsets = [0, 96], sizes = [8, 32], strides = [1, 1]} : vector<8x128xf32> to vector<8x32xf32>
    %65 = arith.negf %64 : vector<8x32xf32>
    %66 = math.exp %65 : vector<8x32xf32>
    %cst_25 = arith.constant 1.000000e+00 : f32
    %67 = vector.broadcast %cst_25 : f32 to vector<8x32xf32>
    %68 = arith.addf %67, %66 : vector<8x32xf32>
    %69 = arith.divf %67, %68 : vector<8x32xf32>
    %70 = arith.mulf %61, %11 : vector<8x32xf32>
    %71 = arith.mulf %55, %63 : vector<8x32xf32>
    %72 = arith.addf %70, %71 : vector<8x32xf32>
    %73 = math.tanh %72 : vector<8x32xf32>
    %74 = arith.mulf %69, %73 : vector<8x32xf32>
    %75 = arith.index_cast %c0_i32 : i32 to index
    %c0_26 = arith.constant 0 : index
    %c0_27 = arith.constant 0 : index
    %76 = vector.load %arg14[%75, %c0_26, %c0_27] : memref<8x8x32xf32, #tpu.memory_space<vmem>>, vector<1x8x32xf32>
    %77 = vector.shape_cast %76 : vector<1x8x32xf32> to vector<8x32xf32>
    %78 = vector.shape_cast %47 : vector<8x32xf32> to vector<1x8x32xf32>
    tpu.vector_store %arg14[%75, %c0_26, %c0_27], %78 {strides = array<i32>} : memref<8x8x32xf32, #tpu.memory_space<vmem>>, vector<1x8x32xf32>,
    %79 = arith.index_cast %12 : i32 to index
    %c0_28 = arith.constant 0 : index
    %c0_29 = arith.constant 0 : index
    %80 = vector.load %arg15[%79, %c0_28, %c0_29] : memref<8x8x32xf32, #tpu.memory_space<vmem>>, vector<1x8x32xf32>
    %81 = vector.shape_cast %80 : vector<1x8x32xf32> to vector<8x32xf32>
    %82 = vector.shape_cast %74 : vector<8x32xf32> to vector<1x8x32xf32>
    tpu.vector_store %arg15[%79, %c0_28, %c0_29], %82 {strides = array<i32>} : memref<8x8x32xf32, #tpu.memory_space<vmem>>, vector<1x8x32xf32>,
    %c1_i32 = arith.constant 1 : i32
    %c7_i32_30 = arith.constant 7 : i32
    %83 = arith.subi %c7_i32_30, %c1_i32 : i32
    %84 = arith.index_cast %c1_i32 : i32 to index
    %c0_31 = arith.constant 0 : index
    %c0_32 = arith.constant 0 : index
    %85 = vector.load %arg18[%84, %c0_31, %c0_32] : memref<8x8x256xf32, #tpu.memory_space<vmem>>, vector<1x8x256xf32>
    %86 = vector.shape_cast %85 : vector<1x8x256xf32> to vector<8x256xf32>
    %87 = vector.extract_strided_slice %86 {offsets = [0, 0], sizes = [8, 128], strides = [1, 1]} : vector<8x256xf32> to vector<8x128xf32>
    %88 = arith.index_cast %83 : i32 to index
    %c0_33 = arith.constant 0 : index
    %c0_34 = arith.constant 0 : index
    %89 = vector.load %arg18[%88, %c0_33, %c0_34] : memref<8x8x256xf32, #tpu.memory_space<vmem>>, vector<1x8x256xf32>
    %90 = vector.shape_cast %89 : vector<1x8x256xf32> to vector<8x256xf32>
    %91 = vector.extract_strided_slice %90 {offsets = [0, 128], sizes = [8, 128], strides = [1, 1]} : vector<8x256xf32> to vector<8x128xf32>
    %cst_35 = arith.constant dense<0.000000e+00> : vector<8x128xf32>
    %92 = tpu.matmul %47, %9, %cst_35 {dimension_numbers = #tpu.dot_dimension_numbers<[1], [0], [0], [1], [0, 0, 1, 1], [], []>} : vector<8x32xf32>, vector<32x128xf32>, vector<8x128xf32> -> vector<8x128xf32>
    %93 = arith.addf %87, %92 : vector<8x128xf32>
    %94 = vector.extract_strided_slice %93 {offsets = [0, 0], sizes = [8, 32], strides = [1, 1]} : vector<8x128xf32> to vector<8x32xf32>
    %95 = arith.negf %94 : vector<8x32xf32>
    %96 = math.exp %95 : vector<8x32xf32>
    %cst_36 = arith.constant 1.000000e+00 : f32
    %97 = vector.broadcast %cst_36 : f32 to vector<8x32xf32>
    %98 = arith.addf %97, %96 : vector<8x32xf32>
    %99 = arith.divf %97, %98 : vector<8x32xf32>
    %100 = vector.extract_strided_slice %93 {offsets = [0, 32], sizes = [8, 32], strides = [1, 1]} : vector<8x128xf32> to vector<8x32xf32>
    %101 = arith.negf %100 : vector<8x32xf32>
    %102 = math.exp %101 : vector<8x32xf32>
    %cst_37 = arith.constant 1.000000e+00 : f32
    %103 = vector.broadcast %cst_37 : f32 to vector<8x32xf32>
    %104 = arith.addf %103, %102 : vector<8x32xf32>
    %105 = arith.divf %103, %104 : vector<8x32xf32>
    %106 = vector.extract_strided_slice %93 {offsets = [0, 64], sizes = [8, 32], strides = [1, 1]} : vector<8x128xf32> to vector<8x32xf32>
    %107 = math.tanh %106 : vector<8x32xf32>
    %108 = vector.extract_strided_slice %93 {offsets = [0, 96], sizes = [8, 32], strides = [1, 1]} : vector<8x128xf32> to vector<8x32xf32>
    %109 = arith.negf %108 : vector<8x32xf32>
    %110 = math.exp %109 : vector<8x32xf32>
    %cst_38 = arith.constant 1.000000e+00 : f32
    %111 = vector.broadcast %cst_38 : f32 to vector<8x32xf32>
    %112 = arith.addf %111, %110 : vector<8x32xf32>
    %113 = arith.divf %111, %112 : vector<8x32xf32>
    %114 = arith.mulf %105, %45 : vector<8x32xf32>
    %115 = arith.mulf %99, %107 : vector<8x32xf32>
    %116 = arith.addf %114, %115 : vector<8x32xf32>
    %117 = math.tanh %116 : vector<8x32xf32>
    %118 = arith.mulf %113, %117 : vector<8x32xf32>
    %cst_39 = arith.constant dense<0.000000e+00> : vector<8x128xf32>
    %119 = tpu.matmul %74, %10, %cst_39 {dimension_numbers = #tpu.dot_dimension_numbers<[1], [0], [0], [1], [0, 0, 1, 1], [], []>} : vector<8x32xf32>, vector<32x128xf32>, vector<8x128xf32> -> vector<8x128xf32>
    %120 = arith.addf %91, %119 : vector<8x128xf32>
    %121 = vector.extract_strided_slice %120 {offsets = [0, 0], sizes = [8, 32], strides = [1, 1]} : vector<8x128xf32> to vector<8x32xf32>
    %122 = arith.negf %121 : vector<8x32xf32>
    %123 = math.exp %122 : vector<8x32xf32>
    %cst_40 = arith.constant 1.000000e+00 : f32
    %124 = vector.broadcast %cst_40 : f32 to vector<8x32xf32>
    %125 = arith.addf %124, %123 : vector<8x32xf32>
    %126 = arith.divf %124, %125 : vector<8x32xf32>
    %127 = vector.extract_strided_slice %120 {offsets = [0, 32], sizes = [8, 32], strides = [1, 1]} : vector<8x128xf32> to vector<8x32xf32>
    %128 = arith.negf %127 : vector<8x32xf32>
    %129 = math.exp %128 : vector<8x32xf32>
    %cst_41 = arith.constant 1.000000e+00 : f32
    %130 = vector.broadcast %cst_41 : f32 to vector<8x32xf32>
    %131 = arith.addf %130, %129 : vector<8x32xf32>
    %132 = arith.divf %130, %131 : vector<8x32xf32>
    %133 = vector.extract_strided_slice %120 {offsets = [0, 64], sizes = [8, 32], strides = [1, 1]} : vector<8x128xf32> to vector<8x32xf32>
    %134 = math.tanh %133 : vector<8x32xf32>
    %135 = vector.extract_strided_slice %120 {offsets = [0, 96], sizes = [8, 32], strides = [1, 1]} : vector<8x128xf32> to vector<8x32xf32>
    %136 = arith.negf %135 : vector<8x32xf32>
    %137 = math.exp %136 : vector<8x32xf32>
    %cst_42 = arith.constant 1.000000e+00 : f32
    %138 = vector.broadcast %cst_42 : f32 to vector<8x32xf32>
    %139 = arith.addf %138, %137 : vector<8x32xf32>
    %140 = arith.divf %138, %139 : vector<8x32xf32>
    %141 = arith.mulf %132, %72 : vector<8x32xf32>
    %142 = arith.mulf %126, %134 : vector<8x32xf32>
    %143 = arith.addf %141, %142 : vector<8x32xf32>
    %144 = math.tanh %143 : vector<8x32xf32>
    %145 = arith.mulf %140, %144 : vector<8x32xf32>
    %146 = arith.index_cast %c1_i32 : i32 to index
    %c0_43 = arith.constant 0 : index
    %c0_44 = arith.constant 0 : index
    %147 = vector.load %arg14[%146, %c0_43, %c0_44] : memref<8x8x32xf32, #tpu.memory_space<vmem>>, vector<1x8x32xf32>
    %148 = vector.shape_cast %147 : vector<1x8x32xf32> to vector<8x32xf32>
    %149 = vector.shape_cast %118 : vector<8x32xf32> to vector<1x8x32xf32>
    tpu.vector_store %arg14[%146, %c0_43, %c0_44], %149 {strides = array<i32>} : memref<8x8x32xf32, #tpu.memory_space<vmem>>, vector<1x8x32xf32>,
    %150 = arith.index_cast %83 : i32 to index
    %c0_45 = arith.constant 0 : index
    %c0_46 = arith.constant 0 : index
    %151 = vector.load %arg15[%150, %c0_45, %c0_46] : memref<8x8x32xf32, #tpu.memory_space<vmem>>, vector<1x8x32xf32>
    %152 = vector.shape_cast %151 : vector<1x8x32xf32> to vector<8x32xf32>
    %153 = vector.shape_cast %145 : vector<8x32xf32> to vector<1x8x32xf32>
    tpu.vector_store %arg15[%150, %c0_45, %c0_46], %153 {strides = array<i32>} : memref<8x8x32xf32, #tpu.memory_space<vmem>>, vector<1x8x32xf32>,
    %c2_i32 = arith.constant 2 : i32
    %c7_i32_47 = arith.constant 7 : i32
    %154 = arith.subi %c7_i32_47, %c2_i32 : i32
    %155 = arith.index_cast %c2_i32 : i32 to index
    %c0_48 = arith.constant 0 : index
    %c0_49 = arith.constant 0 : index
    %156 = vector.load %arg18[%155, %c0_48, %c0_49] : memref<8x8x256xf32, #tpu.memory_space<vmem>>, vector<1x8x256xf32>
    %157 = vector.shape_cast %156 : vector<1x8x256xf32> to vector<8x256xf32>
    %158 = vector.extract_strided_slice %157 {offsets = [0, 0], sizes = [8, 128], strides = [1, 1]} : vector<8x256xf32> to vector<8x128xf32>
    %159 = arith.index_cast %154 : i32 to index
    %c0_50 = arith.constant 0 : index
    %c0_51 = arith.constant 0 : index
    %160 = vector.load %arg18[%159, %c0_50, %c0_51] : memref<8x8x256xf32, #tpu.memory_space<vmem>>, vector<1x8x256xf32>
    %161 = vector.shape_cast %160 : vector<1x8x256xf32> to vector<8x256xf32>
    %162 = vector.extract_strided_slice %161 {offsets = [0, 128], sizes = [8, 128], strides = [1, 1]} : vector<8x256xf32> to vector<8x128xf32>
    %cst_52 = arith.constant dense<0.000000e+00> : vector<8x128xf32>
    %163 = tpu.matmul %118, %9, %cst_52 {dimension_numbers = #tpu.dot_dimension_numbers<[1], [0], [0], [1], [0, 0, 1, 1], [], []>} : vector<8x32xf32>, vector<32x128xf32>, vector<8x128xf32> -> vector<8x128xf32>
    %164 = arith.addf %158, %163 : vector<8x128xf32>
    %165 = vector.extract_strided_slice %164 {offsets = [0, 0], sizes = [8, 32], strides = [1, 1]} : vector<8x128xf32> to vector<8x32xf32>
    %166 = arith.negf %165 : vector<8x32xf32>
    %167 = math.exp %166 : vector<8x32xf32>
    %cst_53 = arith.constant 1.000000e+00 : f32
    %168 = vector.broadcast %cst_53 : f32 to vector<8x32xf32>
    %169 = arith.addf %168, %167 : vector<8x32xf32>
    %170 = arith.divf %168, %169 : vector<8x32xf32>
    %171 = vector.extract_strided_slice %164 {offsets = [0, 32], sizes = [8, 32], strides = [1, 1]} : vector<8x128xf32> to vector<8x32xf32>
    %172 = arith.negf %171 : vector<8x32xf32>
    %173 = math.exp %172 : vector<8x32xf32>
    %cst_54 = arith.constant 1.000000e+00 : f32
    %174 = vector.broadcast %cst_54 : f32 to vector<8x32xf32>
    %175 = arith.addf %174, %173 : vector<8x32xf32>
    %176 = arith.divf %174, %175 : vector<8x32xf32>
    %177 = vector.extract_strided_slice %164 {offsets = [0, 64], sizes = [8, 32], strides = [1, 1]} : vector<8x128xf32> to vector<8x32xf32>
    %178 = math.tanh %177 : vector<8x32xf32>
    %179 = vector.extract_strided_slice %164 {offsets = [0, 96], sizes = [8, 32], strides = [1, 1]} : vector<8x128xf32> to vector<8x32xf32>
    %180 = arith.negf %179 : vector<8x32xf32>
    %181 = math.exp %180 : vector<8x32xf32>
    %cst_55 = arith.constant 1.000000e+00 : f32
    %182 = vector.broadcast %cst_55 : f32 to vector<8x32xf32>
    %183 = arith.addf %182, %181 : vector<8x32xf32>
    %184 = arith.divf %182, %183 : vector<8x32xf32>
    %185 = arith.mulf %176, %116 : vector<8x32xf32>
    %186 = arith.mulf %170, %178 : vector<8x32xf32>
    %187 = arith.addf %185, %186 : vector<8x32xf32>
    %188 = math.tanh %187 : vector<8x32xf32>
    %189 = arith.mulf %184, %188 : vector<8x32xf32>
    %cst_56 = arith.constant dense<0.000000e+00> : vector<8x128xf32>
    %190 = tpu.matmul %145, %10, %cst_56 {dimension_numbers = #tpu.dot_dimension_numbers<[1], [0], [0], [1], [0, 0, 1, 1], [], []>} : vector<8x32xf32>, vector<32x128xf32>, vector<8x128xf32> -> vector<8x128xf32>
    %191 = arith.addf %162, %190 : vector<8x128xf32>
    %192 = vector.extract_strided_slice %191 {offsets = [0, 0], sizes = [8, 32], strides = [1, 1]} : vector<8x128xf32> to vector<8x32xf32>
    %193 = arith.negf %192 : vector<8x32xf32>
    %194 = math.exp %193 : vector<8x32xf32>
    %cst_57 = arith.constant 1.000000e+00 : f32
    %195 = vector.broadcast %cst_57 : f32 to vector<8x32xf32>
    %196 = arith.addf %195, %194 : vector<8x32xf32>
    %197 = arith.divf %195, %196 : vector<8x32xf32>
    %198 = vector.extract_strided_slice %191 {offsets = [0, 32], sizes = [8, 32], strides = [1, 1]} : vector<8x128xf32> to vector<8x32xf32>
    %199 = arith.negf %198 : vector<8x32xf32>
    %200 = math.exp %199 : vector<8x32xf32>
    %cst_58 = arith.constant 1.000000e+00 : f32
    %201 = vector.broadcast %cst_58 : f32 to vector<8x32xf32>
    %202 = arith.addf %201, %200 : vector<8x32xf32>
    %203 = arith.divf %201, %202 : vector<8x32xf32>
    %204 = vector.extract_strided_slice %191 {offsets = [0, 64], sizes = [8, 32], strides = [1, 1]} : vector<8x128xf32> to vector<8x32xf32>
    %205 = math.tanh %204 : vector<8x32xf32>
    %206 = vector.extract_strided_slice %191 {offsets = [0, 96], sizes = [8, 32], strides = [1, 1]} : vector<8x128xf32> to vector<8x32xf32>
    %207 = arith.negf %206 : vector<8x32xf32>
    %208 = math.exp %207 : vector<8x32xf32>
    %cst_59 = arith.constant 1.000000e+00 : f32
    %209 = vector.broadcast %cst_59 : f32 to vector<8x32xf32>
    %210 = arith.addf %209, %208 : vector<8x32xf32>
    %211 = arith.divf %209, %210 : vector<8x32xf32>
    %212 = arith.mulf %203, %143 : vector<8x32xf32>
    %213 = arith.mulf %197, %205 : vector<8x32xf32>
    %214 = arith.addf %212, %213 : vector<8x32xf32>
    %215 = math.tanh %214 : vector<8x32xf32>
    %216 = arith.mulf %211, %215 : vector<8x32xf32>
    %217 = arith.index_cast %c2_i32 : i32 to index
    %c0_60 = arith.constant 0 : index
    %c0_61 = arith.constant 0 : index
    %218 = vector.load %arg14[%217, %c0_60, %c0_61] : memref<8x8x32xf32, #tpu.memory_space<vmem>>, vector<1x8x32xf32>
    %219 = vector.shape_cast %218 : vector<1x8x32xf32> to vector<8x32xf32>
    %220 = vector.shape_cast %189 : vector<8x32xf32> to vector<1x8x32xf32>
    tpu.vector_store %arg14[%217, %c0_60, %c0_61], %220 {strides = array<i32>} : memref<8x8x32xf32, #tpu.memory_space<vmem>>, vector<1x8x32xf32>,
    %221 = arith.index_cast %154 : i32 to index
    %c0_62 = arith.constant 0 : index
    %c0_63 = arith.constant 0 : index
    %222 = vector.load %arg15[%221, %c0_62, %c0_63] : memref<8x8x32xf32, #tpu.memory_space<vmem>>, vector<1x8x32xf32>
    %223 = vector.shape_cast %222 : vector<1x8x32xf32> to vector<8x32xf32>
    %224 = vector.shape_cast %216 : vector<8x32xf32> to vector<1x8x32xf32>
    tpu.vector_store %arg15[%221, %c0_62, %c0_63], %224 {strides = array<i32>} : memref<8x8x32xf32, #tpu.memory_space<vmem>>, vector<1x8x32xf32>,
    %c3_i32 = arith.constant 3 : i32
    %c7_i32_64 = arith.constant 7 : i32
    %225 = arith.subi %c7_i32_64, %c3_i32 : i32
    %226 = arith.index_cast %c3_i32 : i32 to index
    %c0_65 = arith.constant 0 : index
    %c0_66 = arith.constant 0 : index
    %227 = vector.load %arg18[%226, %c0_65, %c0_66] : memref<8x8x256xf32, #tpu.memory_space<vmem>>, vector<1x8x256xf32>
    %228 = vector.shape_cast %227 : vector<1x8x256xf32> to vector<8x256xf32>
    %229 = vector.extract_strided_slice %228 {offsets = [0, 0], sizes = [8, 128], strides = [1, 1]} : vector<8x256xf32> to vector<8x128xf32>
    %230 = arith.index_cast %225 : i32 to index
    %c0_67 = arith.constant 0 : index
    %c0_68 = arith.constant 0 : index
    %231 = vector.load %arg18[%230, %c0_67, %c0_68] : memref<8x8x256xf32, #tpu.memory_space<vmem>>, vector<1x8x256xf32>
    %232 = vector.shape_cast %231 : vector<1x8x256xf32> to vector<8x256xf32>
    %233 = vector.extract_strided_slice %232 {offsets = [0, 128], sizes = [8, 128], strides = [1, 1]} : vector<8x256xf32> to vector<8x128xf32>
    %cst_69 = arith.constant dense<0.000000e+00> : vector<8x128xf32>
    %234 = tpu.matmul %189, %9, %cst_69 {dimension_numbers = #tpu.dot_dimension_numbers<[1], [0], [0], [1], [0, 0, 1, 1], [], []>} : vector<8x32xf32>, vector<32x128xf32>, vector<8x128xf32> -> vector<8x128xf32>
    %235 = arith.addf %229, %234 : vector<8x128xf32>
    %236 = vector.extract_strided_slice %235 {offsets = [0, 0], sizes = [8, 32], strides = [1, 1]} : vector<8x128xf32> to vector<8x32xf32>
    %237 = arith.negf %236 : vector<8x32xf32>
    %238 = math.exp %237 : vector<8x32xf32>
    %cst_70 = arith.constant 1.000000e+00 : f32
    %239 = vector.broadcast %cst_70 : f32 to vector<8x32xf32>
    %240 = arith.addf %239, %238 : vector<8x32xf32>
    %241 = arith.divf %239, %240 : vector<8x32xf32>
    %242 = vector.extract_strided_slice %235 {offsets = [0, 32], sizes = [8, 32], strides = [1, 1]} : vector<8x128xf32> to vector<8x32xf32>
    %243 = arith.negf %242 : vector<8x32xf32>
    %244 = math.exp %243 : vector<8x32xf32>
    %cst_71 = arith.constant 1.000000e+00 : f32
    %245 = vector.broadcast %cst_71 : f32 to vector<8x32xf32>
    %246 = arith.addf %245, %244 : vector<8x32xf32>
    %247 = arith.divf %245, %246 : vector<8x32xf32>
    %248 = vector.extract_strided_slice %235 {offsets = [0, 64], sizes = [8, 32], strides = [1, 1]} : vector<8x128xf32> to vector<8x32xf32>
    %249 = math.tanh %248 : vector<8x32xf32>
    %250 = vector.extract_strided_slice %235 {offsets = [0, 96], sizes = [8, 32], strides = [1, 1]} : vector<8x128xf32> to vector<8x32xf32>
    %251 = arith.negf %250 : vector<8x32xf32>
    %252 = math.exp %251 : vector<8x32xf32>
    %cst_72 = arith.constant 1.000000e+00 : f32
    %253 = vector.broadcast %cst_72 : f32 to vector<8x32xf32>
    %254 = arith.addf %253, %252 : vector<8x32xf32>
    %255 = arith.divf %253, %254 : vector<8x32xf32>
    %256 = arith.mulf %247, %187 : vector<8x32xf32>
    %257 = arith.mulf %241, %249 : vector<8x32xf32>
    %258 = arith.addf %256, %257 : vector<8x32xf32>
    %259 = math.tanh %258 : vector<8x32xf32>
    %260 = arith.mulf %255, %259 : vector<8x32xf32>
    %cst_73 = arith.constant dense<0.000000e+00> : vector<8x128xf32>
    %261 = tpu.matmul %216, %10, %cst_73 {dimension_numbers = #tpu.dot_dimension_numbers<[1], [0], [0], [1], [0, 0, 1, 1], [], []>} : vector<8x32xf32>, vector<32x128xf32>, vector<8x128xf32> -> vector<8x128xf32>
    %262 = arith.addf %233, %261 : vector<8x128xf32>
    %263 = vector.extract_strided_slice %262 {offsets = [0, 0], sizes = [8, 32], strides = [1, 1]} : vector<8x128xf32> to vector<8x32xf32>
    %264 = arith.negf %263 : vector<8x32xf32>
    %265 = math.exp %264 : vector<8x32xf32>
    %cst_74 = arith.constant 1.000000e+00 : f32
    %266 = vector.broadcast %cst_74 : f32 to vector<8x32xf32>
    %267 = arith.addf %266, %265 : vector<8x32xf32>
    %268 = arith.divf %266, %267 : vector<8x32xf32>
    %269 = vector.extract_strided_slice %262 {offsets = [0, 32], sizes = [8, 32], strides = [1, 1]} : vector<8x128xf32> to vector<8x32xf32>
    %270 = arith.negf %269 : vector<8x32xf32>
    %271 = math.exp %270 : vector<8x32xf32>
    %cst_75 = arith.constant 1.000000e+00 : f32
    %272 = vector.broadcast %cst_75 : f32 to vector<8x32xf32>
    %273 = arith.addf %272, %271 : vector<8x32xf32>
    %274 = arith.divf %272, %273 : vector<8x32xf32>
    %275 = vector.extract_strided_slice %262 {offsets = [0, 64], sizes = [8, 32], strides = [1, 1]} : vector<8x128xf32> to vector<8x32xf32>
    %276 = math.tanh %275 : vector<8x32xf32>
    %277 = vector.extract_strided_slice %262 {offsets = [0, 96], sizes = [8, 32], strides = [1, 1]} : vector<8x128xf32> to vector<8x32xf32>
    %278 = arith.negf %277 : vector<8x32xf32>
    %279 = math.exp %278 : vector<8x32xf32>
    %cst_76 = arith.constant 1.000000e+00 : f32
    %280 = vector.broadcast %cst_76 : f32 to vector<8x32xf32>
    %281 = arith.addf %280, %279 : vector<8x32xf32>
    %282 = arith.divf %280, %281 : vector<8x32xf32>
    %283 = arith.mulf %274, %214 : vector<8x32xf32>
    %284 = arith.mulf %268, %276 : vector<8x32xf32>
    %285 = arith.addf %283, %284 : vector<8x32xf32>
    %286 = math.tanh %285 : vector<8x32xf32>
    %287 = arith.mulf %282, %286 : vector<8x32xf32>
    %288 = arith.index_cast %c3_i32 : i32 to index
    %c0_77 = arith.constant 0 : index
    %c0_78 = arith.constant 0 : index
    %289 = vector.load %arg14[%288, %c0_77, %c0_78] : memref<8x8x32xf32, #tpu.memory_space<vmem>>, vector<1x8x32xf32>
    %290 = vector.shape_cast %289 : vector<1x8x32xf32> to vector<8x32xf32>
    %291 = vector.shape_cast %260 : vector<8x32xf32> to vector<1x8x32xf32>
    tpu.vector_store %arg14[%288, %c0_77, %c0_78], %291 {strides = array<i32>} : memref<8x8x32xf32, #tpu.memory_space<vmem>>, vector<1x8x32xf32>,
    %292 = arith.index_cast %225 : i32 to index
    %c0_79 = arith.constant 0 : index
    %c0_80 = arith.constant 0 : index
    %293 = vector.load %arg15[%292, %c0_79, %c0_80] : memref<8x8x32xf32, #tpu.memory_space<vmem>>, vector<1x8x32xf32>
    %294 = vector.shape_cast %293 : vector<1x8x32xf32> to vector<8x32xf32>
    %295 = vector.shape_cast %287 : vector<8x32xf32> to vector<1x8x32xf32>
    tpu.vector_store %arg15[%292, %c0_79, %c0_80], %295 {strides = array<i32>} : memref<8x8x32xf32, #tpu.memory_space<vmem>>, vector<1x8x32xf32>,
    %c4_i32 = arith.constant 4 : i32
    %c7_i32_81 = arith.constant 7 : i32
    %296 = arith.subi %c7_i32_81, %c4_i32 : i32
    %297 = arith.index_cast %c4_i32 : i32 to index
    %c0_82 = arith.constant 0 : index
    %c0_83 = arith.constant 0 : index
    %298 = vector.load %arg18[%297, %c0_82, %c0_83] : memref<8x8x256xf32, #tpu.memory_space<vmem>>, vector<1x8x256xf32>
    %299 = vector.shape_cast %298 : vector<1x8x256xf32> to vector<8x256xf32>
    %300 = vector.extract_strided_slice %299 {offsets = [0, 0], sizes = [8, 128], strides = [1, 1]} : vector<8x256xf32> to vector<8x128xf32>
    %301 = arith.index_cast %296 : i32 to index
    %c0_84 = arith.constant 0 : index
    %c0_85 = arith.constant 0 : index
    %302 = vector.load %arg18[%301, %c0_84, %c0_85] : memref<8x8x256xf32, #tpu.memory_space<vmem>>, vector<1x8x256xf32>
    %303 = vector.shape_cast %302 : vector<1x8x256xf32> to vector<8x256xf32>
    %304 = vector.extract_strided_slice %303 {offsets = [0, 128], sizes = [8, 128], strides = [1, 1]} : vector<8x256xf32> to vector<8x128xf32>
    %cst_86 = arith.constant dense<0.000000e+00> : vector<8x128xf32>
    %305 = tpu.matmul %260, %9, %cst_86 {dimension_numbers = #tpu.dot_dimension_numbers<[1], [0], [0], [1], [0, 0, 1, 1], [], []>} : vector<8x32xf32>, vector<32x128xf32>, vector<8x128xf32> -> vector<8x128xf32>
    %306 = arith.addf %300, %305 : vector<8x128xf32>
    %307 = vector.extract_strided_slice %306 {offsets = [0, 0], sizes = [8, 32], strides = [1, 1]} : vector<8x128xf32> to vector<8x32xf32>
    %308 = arith.negf %307 : vector<8x32xf32>
    %309 = math.exp %308 : vector<8x32xf32>
    %cst_87 = arith.constant 1.000000e+00 : f32
    %310 = vector.broadcast %cst_87 : f32 to vector<8x32xf32>
    %311 = arith.addf %310, %309 : vector<8x32xf32>
    %312 = arith.divf %310, %311 : vector<8x32xf32>
    %313 = vector.extract_strided_slice %306 {offsets = [0, 32], sizes = [8, 32], strides = [1, 1]} : vector<8x128xf32> to vector<8x32xf32>
    %314 = arith.negf %313 : vector<8x32xf32>
    %315 = math.exp %314 : vector<8x32xf32>
    %cst_88 = arith.constant 1.000000e+00 : f32
    %316 = vector.broadcast %cst_88 : f32 to vector<8x32xf32>
    %317 = arith.addf %316, %315 : vector<8x32xf32>
    %318 = arith.divf %316, %317 : vector<8x32xf32>
    %319 = vector.extract_strided_slice %306 {offsets = [0, 64], sizes = [8, 32], strides = [1, 1]} : vector<8x128xf32> to vector<8x32xf32>
    %320 = math.tanh %319 : vector<8x32xf32>
    %321 = vector.extract_strided_slice %306 {offsets = [0, 96], sizes = [8, 32], strides = [1, 1]} : vector<8x128xf32> to vector<8x32xf32>
    %322 = arith.negf %321 : vector<8x32xf32>
    %323 = math.exp %322 : vector<8x32xf32>
    %cst_89 = arith.constant 1.000000e+00 : f32
    %324 = vector.broadcast %cst_89 : f32 to vector<8x32xf32>
    %325 = arith.addf %324, %323 : vector<8x32xf32>
    %326 = arith.divf %324, %325 : vector<8x32xf32>
    %327 = arith.mulf %318, %258 : vector<8x32xf32>
    %328 = arith.mulf %312, %320 : vector<8x32xf32>
    %329 = arith.addf %327, %328 : vector<8x32xf32>
    %330 = math.tanh %329 : vector<8x32xf32>
    %331 = arith.mulf %326, %330 : vector<8x32xf32>
    %cst_90 = arith.constant dense<0.000000e+00> : vector<8x128xf32>
    %332 = tpu.matmul %287, %10, %cst_90 {dimension_numbers = #tpu.dot_dimension_numbers<[1], [0], [0], [1], [0, 0, 1, 1], [], []>} : vector<8x32xf32>, vector<32x128xf32>, vector<8x128xf32> -> vector<8x128xf32>
    %333 = arith.addf %304, %332 : vector<8x128xf32>
    %334 = vector.extract_strided_slice %333 {offsets = [0, 0], sizes = [8, 32], strides = [1, 1]} : vector<8x128xf32> to vector<8x32xf32>
    %335 = arith.negf %334 : vector<8x32xf32>
    %336 = math.exp %335 : vector<8x32xf32>
    %cst_91 = arith.constant 1.000000e+00 : f32
    %337 = vector.broadcast %cst_91 : f32 to vector<8x32xf32>
    %338 = arith.addf %337, %336 : vector<8x32xf32>
    %339 = arith.divf %337, %338 : vector<8x32xf32>
    %340 = vector.extract_strided_slice %333 {offsets = [0, 32], sizes = [8, 32], strides = [1, 1]} : vector<8x128xf32> to vector<8x32xf32>
    %341 = arith.negf %340 : vector<8x32xf32>
    %342 = math.exp %341 : vector<8x32xf32>
    %cst_92 = arith.constant 1.000000e+00 : f32
    %343 = vector.broadcast %cst_92 : f32 to vector<8x32xf32>
    %344 = arith.addf %343, %342 : vector<8x32xf32>
    %345 = arith.divf %343, %344 : vector<8x32xf32>
    %346 = vector.extract_strided_slice %333 {offsets = [0, 64], sizes = [8, 32], strides = [1, 1]} : vector<8x128xf32> to vector<8x32xf32>
    %347 = math.tanh %346 : vector<8x32xf32>
    %348 = vector.extract_strided_slice %333 {offsets = [0, 96], sizes = [8, 32], strides = [1, 1]} : vector<8x128xf32> to vector<8x32xf32>
    %349 = arith.negf %348 : vector<8x32xf32>
    %350 = math.exp %349 : vector<8x32xf32>
    %cst_93 = arith.constant 1.000000e+00 : f32
    %351 = vector.broadcast %cst_93 : f32 to vector<8x32xf32>
    %352 = arith.addf %351, %350 : vector<8x32xf32>
    %353 = arith.divf %351, %352 : vector<8x32xf32>
    %354 = arith.mulf %345, %285 : vector<8x32xf32>
    %355 = arith.mulf %339, %347 : vector<8x32xf32>
    %356 = arith.addf %354, %355 : vector<8x32xf32>
    %357 = math.tanh %356 : vector<8x32xf32>
    %358 = arith.mulf %353, %357 : vector<8x32xf32>
    %359 = arith.index_cast %c4_i32 : i32 to index
    %c0_94 = arith.constant 0 : index
    %c0_95 = arith.constant 0 : index
    %360 = vector.load %arg14[%359, %c0_94, %c0_95] : memref<8x8x32xf32, #tpu.memory_space<vmem>>, vector<1x8x32xf32>
    %361 = vector.shape_cast %360 : vector<1x8x32xf32> to vector<8x32xf32>
    %362 = vector.shape_cast %331 : vector<8x32xf32> to vector<1x8x32xf32>
    tpu.vector_store %arg14[%359, %c0_94, %c0_95], %362 {strides = array<i32>} : memref<8x8x32xf32, #tpu.memory_space<vmem>>, vector<1x8x32xf32>,
    %363 = arith.index_cast %296 : i32 to index
    %c0_96 = arith.constant 0 : index
    %c0_97 = arith.constant 0 : index
    %364 = vector.load %arg15[%363, %c0_96, %c0_97] : memref<8x8x32xf32, #tpu.memory_space<vmem>>, vector<1x8x32xf32>
    %365 = vector.shape_cast %364 : vector<1x8x32xf32> to vector<8x32xf32>
    %366 = vector.shape_cast %358 : vector<8x32xf32> to vector<1x8x32xf32>
    tpu.vector_store %arg15[%363, %c0_96, %c0_97], %366 {strides = array<i32>} : memref<8x8x32xf32, #tpu.memory_space<vmem>>, vector<1x8x32xf32>,
    %c5_i32 = arith.constant 5 : i32
    %c7_i32_98 = arith.constant 7 : i32
    %367 = arith.subi %c7_i32_98, %c5_i32 : i32
    %368 = arith.index_cast %c5_i32 : i32 to index
    %c0_99 = arith.constant 0 : index
    %c0_100 = arith.constant 0 : index
    %369 = vector.load %arg18[%368, %c0_99, %c0_100] : memref<8x8x256xf32, #tpu.memory_space<vmem>>, vector<1x8x256xf32>
    %370 = vector.shape_cast %369 : vector<1x8x256xf32> to vector<8x256xf32>
    %371 = vector.extract_strided_slice %370 {offsets = [0, 0], sizes = [8, 128], strides = [1, 1]} : vector<8x256xf32> to vector<8x128xf32>
    %372 = arith.index_cast %367 : i32 to index
    %c0_101 = arith.constant 0 : index
    %c0_102 = arith.constant 0 : index
    %373 = vector.load %arg18[%372, %c0_101, %c0_102] : memref<8x8x256xf32, #tpu.memory_space<vmem>>, vector<1x8x256xf32>
    %374 = vector.shape_cast %373 : vector<1x8x256xf32> to vector<8x256xf32>
    %375 = vector.extract_strided_slice %374 {offsets = [0, 128], sizes = [8, 128], strides = [1, 1]} : vector<8x256xf32> to vector<8x128xf32>
    %cst_103 = arith.constant dense<0.000000e+00> : vector<8x128xf32>
    %376 = tpu.matmul %331, %9, %cst_103 {dimension_numbers = #tpu.dot_dimension_numbers<[1], [0], [0], [1], [0, 0, 1, 1], [], []>} : vector<8x32xf32>, vector<32x128xf32>, vector<8x128xf32> -> vector<8x128xf32>
    %377 = arith.addf %371, %376 : vector<8x128xf32>
    %378 = vector.extract_strided_slice %377 {offsets = [0, 0], sizes = [8, 32], strides = [1, 1]} : vector<8x128xf32> to vector<8x32xf32>
    %379 = arith.negf %378 : vector<8x32xf32>
    %380 = math.exp %379 : vector<8x32xf32>
    %cst_104 = arith.constant 1.000000e+00 : f32
    %381 = vector.broadcast %cst_104 : f32 to vector<8x32xf32>
    %382 = arith.addf %381, %380 : vector<8x32xf32>
    %383 = arith.divf %381, %382 : vector<8x32xf32>
    %384 = vector.extract_strided_slice %377 {offsets = [0, 32], sizes = [8, 32], strides = [1, 1]} : vector<8x128xf32> to vector<8x32xf32>
    %385 = arith.negf %384 : vector<8x32xf32>
    %386 = math.exp %385 : vector<8x32xf32>
    %cst_105 = arith.constant 1.000000e+00 : f32
    %387 = vector.broadcast %cst_105 : f32 to vector<8x32xf32>
    %388 = arith.addf %387, %386 : vector<8x32xf32>
    %389 = arith.divf %387, %388 : vector<8x32xf32>
    %390 = vector.extract_strided_slice %377 {offsets = [0, 64], sizes = [8, 32], strides = [1, 1]} : vector<8x128xf32> to vector<8x32xf32>
    %391 = math.tanh %390 : vector<8x32xf32>
    %392 = vector.extract_strided_slice %377 {offsets = [0, 96], sizes = [8, 32], strides = [1, 1]} : vector<8x128xf32> to vector<8x32xf32>
    %393 = arith.negf %392 : vector<8x32xf32>
    %394 = math.exp %393 : vector<8x32xf32>
    %cst_106 = arith.constant 1.000000e+00 : f32
    %395 = vector.broadcast %cst_106 : f32 to vector<8x32xf32>
    %396 = arith.addf %395, %394 : vector<8x32xf32>
    %397 = arith.divf %395, %396 : vector<8x32xf32>
    %398 = arith.mulf %389, %329 : vector<8x32xf32>
    %399 = arith.mulf %383, %391 : vector<8x32xf32>
    %400 = arith.addf %398, %399 : vector<8x32xf32>
    %401 = math.tanh %400 : vector<8x32xf32>
    %402 = arith.mulf %397, %401 : vector<8x32xf32>
    %cst_107 = arith.constant dense<0.000000e+00> : vector<8x128xf32>
    %403 = tpu.matmul %358, %10, %cst_107 {dimension_numbers = #tpu.dot_dimension_numbers<[1], [0], [0], [1], [0, 0, 1, 1], [], []>} : vector<8x32xf32>, vector<32x128xf32>, vector<8x128xf32> -> vector<8x128xf32>
    %404 = arith.addf %375, %403 : vector<8x128xf32>
    %405 = vector.extract_strided_slice %404 {offsets = [0, 0], sizes = [8, 32], strides = [1, 1]} : vector<8x128xf32> to vector<8x32xf32>
    %406 = arith.negf %405 : vector<8x32xf32>
    %407 = math.exp %406 : vector<8x32xf32>
    %cst_108 = arith.constant 1.000000e+00 : f32
    %408 = vector.broadcast %cst_108 : f32 to vector<8x32xf32>
    %409 = arith.addf %408, %407 : vector<8x32xf32>
    %410 = arith.divf %408, %409 : vector<8x32xf32>
    %411 = vector.extract_strided_slice %404 {offsets = [0, 32], sizes = [8, 32], strides = [1, 1]} : vector<8x128xf32> to vector<8x32xf32>
    %412 = arith.negf %411 : vector<8x32xf32>
    %413 = math.exp %412 : vector<8x32xf32>
    %cst_109 = arith.constant 1.000000e+00 : f32
    %414 = vector.broadcast %cst_109 : f32 to vector<8x32xf32>
    %415 = arith.addf %414, %413 : vector<8x32xf32>
    %416 = arith.divf %414, %415 : vector<8x32xf32>
    %417 = vector.extract_strided_slice %404 {offsets = [0, 64], sizes = [8, 32], strides = [1, 1]} : vector<8x128xf32> to vector<8x32xf32>
    %418 = math.tanh %417 : vector<8x32xf32>
    %419 = vector.extract_strided_slice %404 {offsets = [0, 96], sizes = [8, 32], strides = [1, 1]} : vector<8x128xf32> to vector<8x32xf32>
    %420 = arith.negf %419 : vector<8x32xf32>
    %421 = math.exp %420 : vector<8x32xf32>
    %cst_110 = arith.constant 1.000000e+00 : f32
    %422 = vector.broadcast %cst_110 : f32 to vector<8x32xf32>
    %423 = arith.addf %422, %421 : vector<8x32xf32>
    %424 = arith.divf %422, %423 : vector<8x32xf32>
    %425 = arith.mulf %416, %356 : vector<8x32xf32>
    %426 = arith.mulf %410, %418 : vector<8x32xf32>
    %427 = arith.addf %425, %426 : vector<8x32xf32>
    %428 = math.tanh %427 : vector<8x32xf32>
    %429 = arith.mulf %424, %428 : vector<8x32xf32>
    %430 = arith.index_cast %c5_i32 : i32 to index
    %c0_111 = arith.constant 0 : index
    %c0_112 = arith.constant 0 : index
    %431 = vector.load %arg14[%430, %c0_111, %c0_112] : memref<8x8x32xf32, #tpu.memory_space<vmem>>, vector<1x8x32xf32>
    %432 = vector.shape_cast %431 : vector<1x8x32xf32> to vector<8x32xf32>
    %433 = vector.shape_cast %402 : vector<8x32xf32> to vector<1x8x32xf32>
    tpu.vector_store %arg14[%430, %c0_111, %c0_112], %433 {strides = array<i32>} : memref<8x8x32xf32, #tpu.memory_space<vmem>>, vector<1x8x32xf32>,
    %434 = arith.index_cast %367 : i32 to index
    %c0_113 = arith.constant 0 : index
    %c0_114 = arith.constant 0 : index
    %435 = vector.load %arg15[%434, %c0_113, %c0_114] : memref<8x8x32xf32, #tpu.memory_space<vmem>>, vector<1x8x32xf32>
    %436 = vector.shape_cast %435 : vector<1x8x32xf32> to vector<8x32xf32>
    %437 = vector.shape_cast %429 : vector<8x32xf32> to vector<1x8x32xf32>
    tpu.vector_store %arg15[%434, %c0_113, %c0_114], %437 {strides = array<i32>} : memref<8x8x32xf32, #tpu.memory_space<vmem>>, vector<1x8x32xf32>,
    %c6_i32 = arith.constant 6 : i32
    %c7_i32_115 = arith.constant 7 : i32
    %438 = arith.subi %c7_i32_115, %c6_i32 : i32
    %439 = arith.index_cast %c6_i32 : i32 to index
    %c0_116 = arith.constant 0 : index
    %c0_117 = arith.constant 0 : index
    %440 = vector.load %arg18[%439, %c0_116, %c0_117] : memref<8x8x256xf32, #tpu.memory_space<vmem>>, vector<1x8x256xf32>
    %441 = vector.shape_cast %440 : vector<1x8x256xf32> to vector<8x256xf32>
    %442 = vector.extract_strided_slice %441 {offsets = [0, 0], sizes = [8, 128], strides = [1, 1]} : vector<8x256xf32> to vector<8x128xf32>
    %443 = arith.index_cast %438 : i32 to index
    %c0_118 = arith.constant 0 : index
    %c0_119 = arith.constant 0 : index
    %444 = vector.load %arg18[%443, %c0_118, %c0_119] : memref<8x8x256xf32, #tpu.memory_space<vmem>>, vector<1x8x256xf32>
    %445 = vector.shape_cast %444 : vector<1x8x256xf32> to vector<8x256xf32>
    %446 = vector.extract_strided_slice %445 {offsets = [0, 128], sizes = [8, 128], strides = [1, 1]} : vector<8x256xf32> to vector<8x128xf32>
    %cst_120 = arith.constant dense<0.000000e+00> : vector<8x128xf32>
    %447 = tpu.matmul %402, %9, %cst_120 {dimension_numbers = #tpu.dot_dimension_numbers<[1], [0], [0], [1], [0, 0, 1, 1], [], []>} : vector<8x32xf32>, vector<32x128xf32>, vector<8x128xf32> -> vector<8x128xf32>
    %448 = arith.addf %442, %447 : vector<8x128xf32>
    %449 = vector.extract_strided_slice %448 {offsets = [0, 0], sizes = [8, 32], strides = [1, 1]} : vector<8x128xf32> to vector<8x32xf32>
    %450 = arith.negf %449 : vector<8x32xf32>
    %451 = math.exp %450 : vector<8x32xf32>
    %cst_121 = arith.constant 1.000000e+00 : f32
    %452 = vector.broadcast %cst_121 : f32 to vector<8x32xf32>
    %453 = arith.addf %452, %451 : vector<8x32xf32>
    %454 = arith.divf %452, %453 : vector<8x32xf32>
    %455 = vector.extract_strided_slice %448 {offsets = [0, 32], sizes = [8, 32], strides = [1, 1]} : vector<8x128xf32> to vector<8x32xf32>
    %456 = arith.negf %455 : vector<8x32xf32>
    %457 = math.exp %456 : vector<8x32xf32>
    %cst_122 = arith.constant 1.000000e+00 : f32
    %458 = vector.broadcast %cst_122 : f32 to vector<8x32xf32>
    %459 = arith.addf %458, %457 : vector<8x32xf32>
    %460 = arith.divf %458, %459 : vector<8x32xf32>
    %461 = vector.extract_strided_slice %448 {offsets = [0, 64], sizes = [8, 32], strides = [1, 1]} : vector<8x128xf32> to vector<8x32xf32>
    %462 = math.tanh %461 : vector<8x32xf32>
    %463 = vector.extract_strided_slice %448 {offsets = [0, 96], sizes = [8, 32], strides = [1, 1]} : vector<8x128xf32> to vector<8x32xf32>
    %464 = arith.negf %463 : vector<8x32xf32>
    %465 = math.exp %464 : vector<8x32xf32>
    %cst_123 = arith.constant 1.000000e+00 : f32
    %466 = vector.broadcast %cst_123 : f32 to vector<8x32xf32>
    %467 = arith.addf %466, %465 : vector<8x32xf32>
    %468 = arith.divf %466, %467 : vector<8x32xf32>
    %469 = arith.mulf %460, %400 : vector<8x32xf32>
    %470 = arith.mulf %454, %462 : vector<8x32xf32>
    %471 = arith.addf %469, %470 : vector<8x32xf32>
    %472 = math.tanh %471 : vector<8x32xf32>
    %473 = arith.mulf %468, %472 : vector<8x32xf32>
    %cst_124 = arith.constant dense<0.000000e+00> : vector<8x128xf32>
    %474 = tpu.matmul %429, %10, %cst_124 {dimension_numbers = #tpu.dot_dimension_numbers<[1], [0], [0], [1], [0, 0, 1, 1], [], []>} : vector<8x32xf32>, vector<32x128xf32>, vector<8x128xf32> -> vector<8x128xf32>
    %475 = arith.addf %446, %474 : vector<8x128xf32>
    %476 = vector.extract_strided_slice %475 {offsets = [0, 0], sizes = [8, 32], strides = [1, 1]} : vector<8x128xf32> to vector<8x32xf32>
    %477 = arith.negf %476 : vector<8x32xf32>
    %478 = math.exp %477 : vector<8x32xf32>
    %cst_125 = arith.constant 1.000000e+00 : f32
    %479 = vector.broadcast %cst_125 : f32 to vector<8x32xf32>
    %480 = arith.addf %479, %478 : vector<8x32xf32>
    %481 = arith.divf %479, %480 : vector<8x32xf32>
    %482 = vector.extract_strided_slice %475 {offsets = [0, 32], sizes = [8, 32], strides = [1, 1]} : vector<8x128xf32> to vector<8x32xf32>
    %483 = arith.negf %482 : vector<8x32xf32>
    %484 = math.exp %483 : vector<8x32xf32>
    %cst_126 = arith.constant 1.000000e+00 : f32
    %485 = vector.broadcast %cst_126 : f32 to vector<8x32xf32>
    %486 = arith.addf %485, %484 : vector<8x32xf32>
    %487 = arith.divf %485, %486 : vector<8x32xf32>
    %488 = vector.extract_strided_slice %475 {offsets = [0, 64], sizes = [8, 32], strides = [1, 1]} : vector<8x128xf32> to vector<8x32xf32>
    %489 = math.tanh %488 : vector<8x32xf32>
    %490 = vector.extract_strided_slice %475 {offsets = [0, 96], sizes = [8, 32], strides = [1, 1]} : vector<8x128xf32> to vector<8x32xf32>
    %491 = arith.negf %490 : vector<8x32xf32>
    %492 = math.exp %491 : vector<8x32xf32>
    %cst_127 = arith.constant 1.000000e+00 : f32
    %493 = vector.broadcast %cst_127 : f32 to vector<8x32xf32>
    %494 = arith.addf %493, %492 : vector<8x32xf32>
    %495 = arith.divf %493, %494 : vector<8x32xf32>
    %496 = arith.mulf %487, %427 : vector<8x32xf32>
    %497 = arith.mulf %481, %489 : vector<8x32xf32>
    %498 = arith.addf %496, %497 : vector<8x32xf32>
    %499 = math.tanh %498 : vector<8x32xf32>
    %500 = arith.mulf %495, %499 : vector<8x32xf32>
    %501 = arith.index_cast %c6_i32 : i32 to index
    %c0_128 = arith.constant 0 : index
    %c0_129 = arith.constant 0 : index
    %502 = vector.load %arg14[%501, %c0_128, %c0_129] : memref<8x8x32xf32, #tpu.memory_space<vmem>>, vector<1x8x32xf32>
    %503 = vector.shape_cast %502 : vector<1x8x32xf32> to vector<8x32xf32>
    %504 = vector.shape_cast %473 : vector<8x32xf32> to vector<1x8x32xf32>
    tpu.vector_store %arg14[%501, %c0_128, %c0_129], %504 {strides = array<i32>} : memref<8x8x32xf32, #tpu.memory_space<vmem>>, vector<1x8x32xf32>,
    %505 = arith.index_cast %438 : i32 to index
    %c0_130 = arith.constant 0 : index
    %c0_131 = arith.constant 0 : index
    %506 = vector.load %arg15[%505, %c0_130, %c0_131] : memref<8x8x32xf32, #tpu.memory_space<vmem>>, vector<1x8x32xf32>
    %507 = vector.shape_cast %506 : vector<1x8x32xf32> to vector<8x32xf32>
    %508 = vector.shape_cast %500 : vector<8x32xf32> to vector<1x8x32xf32>
    tpu.vector_store %arg15[%505, %c0_130, %c0_131], %508 {strides = array<i32>} : memref<8x8x32xf32, #tpu.memory_space<vmem>>, vector<1x8x32xf32>,
    %c7_i32_132 = arith.constant 7 : i32
    %c7_i32_133 = arith.constant 7 : i32
    %509 = arith.subi %c7_i32_133, %c7_i32_132 : i32
    %510 = arith.index_cast %c7_i32_132 : i32 to index
    %c0_134 = arith.constant 0 : index
    %c0_135 = arith.constant 0 : index
    %511 = vector.load %arg18[%510, %c0_134, %c0_135] : memref<8x8x256xf32, #tpu.memory_space<vmem>>, vector<1x8x256xf32>
    %512 = vector.shape_cast %511 : vector<1x8x256xf32> to vector<8x256xf32>
    %513 = vector.extract_strided_slice %512 {offsets = [0, 0], sizes = [8, 128], strides = [1, 1]} : vector<8x256xf32> to vector<8x128xf32>
    %514 = arith.index_cast %509 : i32 to index
    %c0_136 = arith.constant 0 : index
    %c0_137 = arith.constant 0 : index
    %515 = vector.load %arg18[%514, %c0_136, %c0_137] : memref<8x8x256xf32, #tpu.memory_space<vmem>>, vector<1x8x256xf32>
    %516 = vector.shape_cast %515 : vector<1x8x256xf32> to vector<8x256xf32>
    %517 = vector.extract_strided_slice %516 {offsets = [0, 128], sizes = [8, 128], strides = [1, 1]} : vector<8x256xf32> to vector<8x128xf32>
    %cst_138 = arith.constant dense<0.000000e+00> : vector<8x128xf32>
    %518 = tpu.matmul %473, %9, %cst_138 {dimension_numbers = #tpu.dot_dimension_numbers<[1], [0], [0], [1], [0, 0, 1, 1], [], []>} : vector<8x32xf32>, vector<32x128xf32>, vector<8x128xf32> -> vector<8x128xf32>
    %519 = arith.addf %513, %518 : vector<8x128xf32>
    %520 = vector.extract_strided_slice %519 {offsets = [0, 0], sizes = [8, 32], strides = [1, 1]} : vector<8x128xf32> to vector<8x32xf32>
    %521 = arith.negf %520 : vector<8x32xf32>
    %522 = math.exp %521 : vector<8x32xf32>
    %cst_139 = arith.constant 1.000000e+00 : f32
    %523 = vector.broadcast %cst_139 : f32 to vector<8x32xf32>
    %524 = arith.addf %523, %522 : vector<8x32xf32>
    %525 = arith.divf %523, %524 : vector<8x32xf32>
    %526 = vector.extract_strided_slice %519 {offsets = [0, 32], sizes = [8, 32], strides = [1, 1]} : vector<8x128xf32> to vector<8x32xf32>
    %527 = arith.negf %526 : vector<8x32xf32>
    %528 = math.exp %527 : vector<8x32xf32>
    %cst_140 = arith.constant 1.000000e+00 : f32
    %529 = vector.broadcast %cst_140 : f32 to vector<8x32xf32>
    %530 = arith.addf %529, %528 : vector<8x32xf32>
    %531 = arith.divf %529, %530 : vector<8x32xf32>
    %532 = vector.extract_strided_slice %519 {offsets = [0, 64], sizes = [8, 32], strides = [1, 1]} : vector<8x128xf32> to vector<8x32xf32>
    %533 = math.tanh %532 : vector<8x32xf32>
    %534 = vector.extract_strided_slice %519 {offsets = [0, 96], sizes = [8, 32], strides = [1, 1]} : vector<8x128xf32> to vector<8x32xf32>
    %535 = arith.negf %534 : vector<8x32xf32>
    %536 = math.exp %535 : vector<8x32xf32>
    %cst_141 = arith.constant 1.000000e+00 : f32
    %537 = vector.broadcast %cst_141 : f32 to vector<8x32xf32>
    %538 = arith.addf %537, %536 : vector<8x32xf32>
    %539 = arith.divf %537, %538 : vector<8x32xf32>
    %540 = arith.mulf %531, %471 : vector<8x32xf32>
    %541 = arith.mulf %525, %533 : vector<8x32xf32>
    %542 = arith.addf %540, %541 : vector<8x32xf32>
    %543 = math.tanh %542 : vector<8x32xf32>
    %544 = arith.mulf %539, %543 : vector<8x32xf32>
    %cst_142 = arith.constant dense<0.000000e+00> : vector<8x128xf32>
    %545 = tpu.matmul %500, %10, %cst_142 {dimension_numbers = #tpu.dot_dimension_numbers<[1], [0], [0], [1], [0, 0, 1, 1], [], []>} : vector<8x32xf32>, vector<32x128xf32>, vector<8x128xf32> -> vector<8x128xf32>
    %546 = arith.addf %517, %545 : vector<8x128xf32>
    %547 = vector.extract_strided_slice %546 {offsets = [0, 0], sizes = [8, 32], strides = [1, 1]} : vector<8x128xf32> to vector<8x32xf32>
    %548 = arith.negf %547 : vector<8x32xf32>
    %549 = math.exp %548 : vector<8x32xf32>
    %cst_143 = arith.constant 1.000000e+00 : f32
    %550 = vector.broadcast %cst_143 : f32 to vector<8x32xf32>
    %551 = arith.addf %550, %549 : vector<8x32xf32>
    %552 = arith.divf %550, %551 : vector<8x32xf32>
    %553 = vector.extract_strided_slice %546 {offsets = [0, 32], sizes = [8, 32], strides = [1, 1]} : vector<8x128xf32> to vector<8x32xf32>
    %554 = arith.negf %553 : vector<8x32xf32>
    %555 = math.exp %554 : vector<8x32xf32>
    %cst_144 = arith.constant 1.000000e+00 : f32
    %556 = vector.broadcast %cst_144 : f32 to vector<8x32xf32>
    %557 = arith.addf %556, %555 : vector<8x32xf32>
    %558 = arith.divf %556, %557 : vector<8x32xf32>
    %559 = vector.extract_strided_slice %546 {offsets = [0, 64], sizes = [8, 32], strides = [1, 1]} : vector<8x128xf32> to vector<8x32xf32>
    %560 = math.tanh %559 : vector<8x32xf32>
    %561 = vector.extract_strided_slice %546 {offsets = [0, 96], sizes = [8, 32], strides = [1, 1]} : vector<8x128xf32> to vector<8x32xf32>
    %562 = arith.negf %561 : vector<8x32xf32>
    %563 = math.exp %562 : vector<8x32xf32>
    %cst_145 = arith.constant 1.000000e+00 : f32
    %564 = vector.broadcast %cst_145 : f32 to vector<8x32xf32>
    %565 = arith.addf %564, %563 : vector<8x32xf32>
    %566 = arith.divf %564, %565 : vector<8x32xf32>
    %567 = arith.mulf %558, %498 : vector<8x32xf32>
    %568 = arith.mulf %552, %560 : vector<8x32xf32>
    %569 = arith.addf %567, %568 : vector<8x32xf32>
    %570 = math.tanh %569 : vector<8x32xf32>
    %571 = arith.mulf %566, %570 : vector<8x32xf32>
    %572 = arith.index_cast %c7_i32_132 : i32 to index
    %c0_146 = arith.constant 0 : index
    %c0_147 = arith.constant 0 : index
    %573 = vector.load %arg14[%572, %c0_146, %c0_147] : memref<8x8x32xf32, #tpu.memory_space<vmem>>, vector<1x8x32xf32>
    %574 = vector.shape_cast %573 : vector<1x8x32xf32> to vector<8x32xf32>
    %575 = vector.shape_cast %544 : vector<8x32xf32> to vector<1x8x32xf32>
    tpu.vector_store %arg14[%572, %c0_146, %c0_147], %575 {strides = array<i32>} : memref<8x8x32xf32, #tpu.memory_space<vmem>>, vector<1x8x32xf32>,
    %576 = arith.index_cast %509 : i32 to index
    %c0_148 = arith.constant 0 : index
    %c0_149 = arith.constant 0 : index
    %577 = vector.load %arg15[%576, %c0_148, %c0_149] : memref<8x8x32xf32, #tpu.memory_space<vmem>>, vector<1x8x32xf32>
    %578 = vector.shape_cast %577 : vector<1x8x32xf32> to vector<8x32xf32>
    %579 = vector.shape_cast %571 : vector<8x32xf32> to vector<1x8x32xf32>
    tpu.vector_store %arg15[%576, %c0_148, %c0_149], %579 {strides = array<i32>} : memref<8x8x32xf32, #tpu.memory_space<vmem>>, vector<1x8x32xf32>,
    %c8_i32 = arith.constant 8 : i32
    %c0_150 = arith.constant 0 : index
    %c0_151 = arith.constant 0 : index
    %c0_152 = arith.constant 0 : index
    %580 = vector.load %arg14[%c0_150, %c0_151, %c0_152] : memref<8x8x32xf32, #tpu.memory_space<vmem>>, vector<8x8x32xf32>
    %581 = vector.shape_cast %580 : vector<8x8x32xf32> to vector<64x32xf32>
    %c0_153 = arith.constant 0 : index
    %c0_154 = arith.constant 0 : index
    %c0_155 = arith.constant 0 : index
    %582 = vector.load %arg15[%c0_153, %c0_154, %c0_155] : memref<8x8x32xf32, #tpu.memory_space<vmem>>, vector<8x8x32xf32>
    %583 = vector.shape_cast %582 : vector<8x8x32xf32> to vector<64x32xf32>
    %c0_156 = arith.constant 0 : index
    %c0_157 = arith.constant 0 : index
    %584 = vector.load %arg5[%c0_156, %c0_157] : memref<32x256xf32, #tpu.memory_space<vmem>>, vector<32x256xf32>
    %cst_158 = arith.constant dense<0.000000e+00> : vector<64x256xf32>
    %585 = tpu.matmul %581, %584, %cst_158 {dimension_numbers = #tpu.dot_dimension_numbers<[1], [0], [0], [1], [0, 0, 1, 1], [], []>} : vector<64x32xf32>, vector<32x256xf32>, vector<64x256xf32> -> vector<64x256xf32>
    %c0_159 = arith.constant 0 : index
    %c0_160 = arith.constant 0 : index
    %586 = vector.load %arg6[%c0_159, %c0_160] : memref<32x256xf32, #tpu.memory_space<vmem>>, vector<32x256xf32>
    %cst_161 = arith.constant dense<0.000000e+00> : vector<64x256xf32>
    %587 = tpu.matmul %583, %586, %cst_161 {dimension_numbers = #tpu.dot_dimension_numbers<[1], [0], [0], [1], [0, 0, 1, 1], [], []>} : vector<64x32xf32>, vector<32x256xf32>, vector<64x256xf32> -> vector<64x256xf32>
    %588 = arith.addf %585, %587 : vector<64x256xf32>
    %c0_162 = arith.constant 0 : index
    %c0_163 = arith.constant 0 : index
    %589 = vector.load %arg9[%c0_162, %c0_163] : memref<1x256xf32, #tpu.memory_space<vmem>>, vector<1x256xf32>
    %590 = vector.broadcast %589 : vector<1x256xf32> to vector<64x256xf32>
    %591 = arith.addf %588, %590 : vector<64x256xf32>
    %592 = vector.shape_cast %591 : vector<64x256xf32> to vector<8x8x256xf32>
    %c0_164 = arith.constant 0 : index
    %c0_165 = arith.constant 0 : index
    %c0_166 = arith.constant 0 : index
    %593 = vector.load %arg18[%c0_164, %c0_165, %c0_166] : memref<8x8x256xf32, #tpu.memory_space<vmem>>, vector<8x8x256xf32>
    tpu.vector_store %arg18[%c0_164, %c0_165, %c0_166], %592 {strides = array<i32>} : memref<8x8x256xf32, #tpu.memory_space<vmem>>, vector<8x8x256xf32>,
    %c0_167 = arith.constant 0 : index
    %c0_168 = arith.constant 0 : index
    %594 = vector.load %arg7[%c0_167, %c0_168] : memref<32x128xf32, #tpu.memory_space<vmem>>, vector<32x128xf32>
    %c0_169 = arith.constant 0 : index
    %c0_170 = arith.constant 0 : index
    %595 = vector.load %arg8[%c0_169, %c0_170] : memref<32x128xf32, #tpu.memory_space<vmem>>, vector<32x128xf32>
    %cst_171 = arith.constant 0.000000e+00 : f32
    %596 = vector.broadcast %cst_171 : f32 to vector<8x32xf32>
    %c0_i32_172 = arith.constant 0 : i32
    %c7_i32_173 = arith.constant 7 : i32
    %597 = arith.subi %c7_i32_173, %c0_i32_172 : i32
    %598 = arith.index_cast %c0_i32_172 : i32 to index
    %c0_174 = arith.constant 0 : index
    %c0_175 = arith.constant 0 : index
    %599 = vector.load %arg18[%598, %c0_174, %c0_175] : memref<8x8x256xf32, #tpu.memory_space<vmem>>, vector<1x8x256xf32>
    %600 = vector.shape_cast %599 : vector<1x8x256xf32> to vector<8x256xf32>
    %601 = vector.extract_strided_slice %600 {offsets = [0, 0], sizes = [8, 128], strides = [1, 1]} : vector<8x256xf32> to vector<8x128xf32>
    %602 = arith.index_cast %597 : i32 to index
    %c0_176 = arith.constant 0 : index
    %c0_177 = arith.constant 0 : index
    %603 = vector.load %arg18[%602, %c0_176, %c0_177] : memref<8x8x256xf32, #tpu.memory_space<vmem>>, vector<1x8x256xf32>
    %604 = vector.shape_cast %603 : vector<1x8x256xf32> to vector<8x256xf32>
    %605 = vector.extract_strided_slice %604 {offsets = [0, 128], sizes = [8, 128], strides = [1, 1]} : vector<8x256xf32> to vector<8x128xf32>
    %cst_178 = arith.constant dense<0.000000e+00> : vector<8x128xf32>
    %606 = tpu.matmul %596, %594, %cst_178 {dimension_numbers = #tpu.dot_dimension_numbers<[1], [0], [0], [1], [0, 0, 1, 1], [], []>} : vector<8x32xf32>, vector<32x128xf32>, vector<8x128xf32> -> vector<8x128xf32>
    %607 = arith.addf %601, %606 : vector<8x128xf32>
    %608 = vector.extract_strided_slice %607 {offsets = [0, 0], sizes = [8, 32], strides = [1, 1]} : vector<8x128xf32> to vector<8x32xf32>
    %609 = arith.negf %608 : vector<8x32xf32>
    %610 = math.exp %609 : vector<8x32xf32>
    %cst_179 = arith.constant 1.000000e+00 : f32
    %611 = vector.broadcast %cst_179 : f32 to vector<8x32xf32>
    %612 = arith.addf %611, %610 : vector<8x32xf32>
    %613 = arith.divf %611, %612 : vector<8x32xf32>
    %614 = vector.extract_strided_slice %607 {offsets = [0, 32], sizes = [8, 32], strides = [1, 1]} : vector<8x128xf32> to vector<8x32xf32>
    %615 = arith.negf %614 : vector<8x32xf32>
    %616 = math.exp %615 : vector<8x32xf32>
    %cst_180 = arith.constant 1.000000e+00 : f32
    %617 = vector.broadcast %cst_180 : f32 to vector<8x32xf32>
    %618 = arith.addf %617, %616 : vector<8x32xf32>
    %619 = arith.divf %617, %618 : vector<8x32xf32>
    %620 = vector.extract_strided_slice %607 {offsets = [0, 64], sizes = [8, 32], strides = [1, 1]} : vector<8x128xf32> to vector<8x32xf32>
    %621 = math.tanh %620 : vector<8x32xf32>
    %622 = vector.extract_strided_slice %607 {offsets = [0, 96], sizes = [8, 32], strides = [1, 1]} : vector<8x128xf32> to vector<8x32xf32>
    %623 = arith.negf %622 : vector<8x32xf32>
    %624 = math.exp %623 : vector<8x32xf32>
    %cst_181 = arith.constant 1.000000e+00 : f32
    %625 = vector.broadcast %cst_181 : f32 to vector<8x32xf32>
    %626 = arith.addf %625, %624 : vector<8x32xf32>
    %627 = arith.divf %625, %626 : vector<8x32xf32>
    %628 = arith.mulf %619, %596 : vector<8x32xf32>
    %629 = arith.mulf %613, %621 : vector<8x32xf32>
    %630 = arith.addf %628, %629 : vector<8x32xf32>
    %631 = math.tanh %630 : vector<8x32xf32>
    %632 = arith.mulf %627, %631 : vector<8x32xf32>
    %cst_182 = arith.constant dense<0.000000e+00> : vector<8x128xf32>
    %633 = tpu.matmul %596, %595, %cst_182 {dimension_numbers = #tpu.dot_dimension_numbers<[1], [0], [0], [1], [0, 0, 1, 1], [], []>} : vector<8x32xf32>, vector<32x128xf32>, vector<8x128xf32> -> vector<8x128xf32>
    %634 = arith.addf %605, %633 : vector<8x128xf32>
    %635 = vector.extract_strided_slice %634 {offsets = [0, 0], sizes = [8, 32], strides = [1, 1]} : vector<8x128xf32> to vector<8x32xf32>
    %636 = arith.negf %635 : vector<8x32xf32>
    %637 = math.exp %636 : vector<8x32xf32>
    %cst_183 = arith.constant 1.000000e+00 : f32
    %638 = vector.broadcast %cst_183 : f32 to vector<8x32xf32>
    %639 = arith.addf %638, %637 : vector<8x32xf32>
    %640 = arith.divf %638, %639 : vector<8x32xf32>
    %641 = vector.extract_strided_slice %634 {offsets = [0, 32], sizes = [8, 32], strides = [1, 1]} : vector<8x128xf32> to vector<8x32xf32>
    %642 = arith.negf %641 : vector<8x32xf32>
    %643 = math.exp %642 : vector<8x32xf32>
    %cst_184 = arith.constant 1.000000e+00 : f32
    %644 = vector.broadcast %cst_184 : f32 to vector<8x32xf32>
    %645 = arith.addf %644, %643 : vector<8x32xf32>
    %646 = arith.divf %644, %645 : vector<8x32xf32>
    %647 = vector.extract_strided_slice %634 {offsets = [0, 64], sizes = [8, 32], strides = [1, 1]} : vector<8x128xf32> to vector<8x32xf32>
    %648 = math.tanh %647 : vector<8x32xf32>
    %649 = vector.extract_strided_slice %634 {offsets = [0, 96], sizes = [8, 32], strides = [1, 1]} : vector<8x128xf32> to vector<8x32xf32>
    %650 = arith.negf %649 : vector<8x32xf32>
    %651 = math.exp %650 : vector<8x32xf32>
    %cst_185 = arith.constant 1.000000e+00 : f32
    %652 = vector.broadcast %cst_185 : f32 to vector<8x32xf32>
    %653 = arith.addf %652, %651 : vector<8x32xf32>
    %654 = arith.divf %652, %653 : vector<8x32xf32>
    %655 = arith.mulf %646, %596 : vector<8x32xf32>
    %656 = arith.mulf %640, %648 : vector<8x32xf32>
    %657 = arith.addf %655, %656 : vector<8x32xf32>
    %658 = math.tanh %657 : vector<8x32xf32>
    %659 = arith.mulf %654, %658 : vector<8x32xf32>
    %660 = arith.index_cast %c0_i32_172 : i32 to index
    %c0_186 = arith.constant 0 : index
    %c0_187 = arith.constant 0 : index
    %661 = vector.load %arg16[%660, %c0_186, %c0_187] : memref<8x8x32xf32, #tpu.memory_space<vmem>>, vector<1x8x32xf32>
    %662 = vector.shape_cast %661 : vector<1x8x32xf32> to vector<8x32xf32>
    %663 = vector.shape_cast %632 : vector<8x32xf32> to vector<1x8x32xf32>
    tpu.vector_store %arg16[%660, %c0_186, %c0_187], %663 {strides = array<i32>} : memref<8x8x32xf32, #tpu.memory_space<vmem>>, vector<1x8x32xf32>,
    %664 = arith.index_cast %597 : i32 to index
    %c0_188 = arith.constant 0 : index
    %c0_189 = arith.constant 0 : index
    %665 = vector.load %arg17[%664, %c0_188, %c0_189] : memref<8x8x32xf32, #tpu.memory_space<vmem>>, vector<1x8x32xf32>
    %666 = vector.shape_cast %665 : vector<1x8x32xf32> to vector<8x32xf32>
    %667 = vector.shape_cast %659 : vector<8x32xf32> to vector<1x8x32xf32>
    tpu.vector_store %arg17[%664, %c0_188, %c0_189], %667 {strides = array<i32>} : memref<8x8x32xf32, #tpu.memory_space<vmem>>, vector<1x8x32xf32>,
    %c1_i32_190 = arith.constant 1 : i32
    %c7_i32_191 = arith.constant 7 : i32
    %668 = arith.subi %c7_i32_191, %c1_i32_190 : i32
    %669 = arith.index_cast %c1_i32_190 : i32 to index
    %c0_192 = arith.constant 0 : index
    %c0_193 = arith.constant 0 : index
    %670 = vector.load %arg18[%669, %c0_192, %c0_193] : memref<8x8x256xf32, #tpu.memory_space<vmem>>, vector<1x8x256xf32>
    %671 = vector.shape_cast %670 : vector<1x8x256xf32> to vector<8x256xf32>
    %672 = vector.extract_strided_slice %671 {offsets = [0, 0], sizes = [8, 128], strides = [1, 1]} : vector<8x256xf32> to vector<8x128xf32>
    %673 = arith.index_cast %668 : i32 to index
    %c0_194 = arith.constant 0 : index
    %c0_195 = arith.constant 0 : index
    %674 = vector.load %arg18[%673, %c0_194, %c0_195] : memref<8x8x256xf32, #tpu.memory_space<vmem>>, vector<1x8x256xf32>
    %675 = vector.shape_cast %674 : vector<1x8x256xf32> to vector<8x256xf32>
    %676 = vector.extract_strided_slice %675 {offsets = [0, 128], sizes = [8, 128], strides = [1, 1]} : vector<8x256xf32> to vector<8x128xf32>
    %cst_196 = arith.constant dense<0.000000e+00> : vector<8x128xf32>
    %677 = tpu.matmul %632, %594, %cst_196 {dimension_numbers = #tpu.dot_dimension_numbers<[1], [0], [0], [1], [0, 0, 1, 1], [], []>} : vector<8x32xf32>, vector<32x128xf32>, vector<8x128xf32> -> vector<8x128xf32>
    %678 = arith.addf %672, %677 : vector<8x128xf32>
    %679 = vector.extract_strided_slice %678 {offsets = [0, 0], sizes = [8, 32], strides = [1, 1]} : vector<8x128xf32> to vector<8x32xf32>
    %680 = arith.negf %679 : vector<8x32xf32>
    %681 = math.exp %680 : vector<8x32xf32>
    %cst_197 = arith.constant 1.000000e+00 : f32
    %682 = vector.broadcast %cst_197 : f32 to vector<8x32xf32>
    %683 = arith.addf %682, %681 : vector<8x32xf32>
    %684 = arith.divf %682, %683 : vector<8x32xf32>
    %685 = vector.extract_strided_slice %678 {offsets = [0, 32], sizes = [8, 32], strides = [1, 1]} : vector<8x128xf32> to vector<8x32xf32>
    %686 = arith.negf %685 : vector<8x32xf32>
    %687 = math.exp %686 : vector<8x32xf32>
    %cst_198 = arith.constant 1.000000e+00 : f32
    %688 = vector.broadcast %cst_198 : f32 to vector<8x32xf32>
    %689 = arith.addf %688, %687 : vector<8x32xf32>
    %690 = arith.divf %688, %689 : vector<8x32xf32>
    %691 = vector.extract_strided_slice %678 {offsets = [0, 64], sizes = [8, 32], strides = [1, 1]} : vector<8x128xf32> to vector<8x32xf32>
    %692 = math.tanh %691 : vector<8x32xf32>
    %693 = vector.extract_strided_slice %678 {offsets = [0, 96], sizes = [8, 32], strides = [1, 1]} : vector<8x128xf32> to vector<8x32xf32>
    %694 = arith.negf %693 : vector<8x32xf32>
    %695 = math.exp %694 : vector<8x32xf32>
    %cst_199 = arith.constant 1.000000e+00 : f32
    %696 = vector.broadcast %cst_199 : f32 to vector<8x32xf32>
    %697 = arith.addf %696, %695 : vector<8x32xf32>
    %698 = arith.divf %696, %697 : vector<8x32xf32>
    %699 = arith.mulf %690, %630 : vector<8x32xf32>
    %700 = arith.mulf %684, %692 : vector<8x32xf32>
    %701 = arith.addf %699, %700 : vector<8x32xf32>
    %702 = math.tanh %701 : vector<8x32xf32>
    %703 = arith.mulf %698, %702 : vector<8x32xf32>
    %cst_200 = arith.constant dense<0.000000e+00> : vector<8x128xf32>
    %704 = tpu.matmul %659, %595, %cst_200 {dimension_numbers = #tpu.dot_dimension_numbers<[1], [0], [0], [1], [0, 0, 1, 1], [], []>} : vector<8x32xf32>, vector<32x128xf32>, vector<8x128xf32> -> vector<8x128xf32>
    %705 = arith.addf %676, %704 : vector<8x128xf32>
    %706 = vector.extract_strided_slice %705 {offsets = [0, 0], sizes = [8, 32], strides = [1, 1]} : vector<8x128xf32> to vector<8x32xf32>
    %707 = arith.negf %706 : vector<8x32xf32>
    %708 = math.exp %707 : vector<8x32xf32>
    %cst_201 = arith.constant 1.000000e+00 : f32
    %709 = vector.broadcast %cst_201 : f32 to vector<8x32xf32>
    %710 = arith.addf %709, %708 : vector<8x32xf32>
    %711 = arith.divf %709, %710 : vector<8x32xf32>
    %712 = vector.extract_strided_slice %705 {offsets = [0, 32], sizes = [8, 32], strides = [1, 1]} : vector<8x128xf32> to vector<8x32xf32>
    %713 = arith.negf %712 : vector<8x32xf32>
    %714 = math.exp %713 : vector<8x32xf32>
    %cst_202 = arith.constant 1.000000e+00 : f32
    %715 = vector.broadcast %cst_202 : f32 to vector<8x32xf32>
    %716 = arith.addf %715, %714 : vector<8x32xf32>
    %717 = arith.divf %715, %716 : vector<8x32xf32>
    %718 = vector.extract_strided_slice %705 {offsets = [0, 64], sizes = [8, 32], strides = [1, 1]} : vector<8x128xf32> to vector<8x32xf32>
    %719 = math.tanh %718 : vector<8x32xf32>
    %720 = vector.extract_strided_slice %705 {offsets = [0, 96], sizes = [8, 32], strides = [1, 1]} : vector<8x128xf32> to vector<8x32xf32>
    %721 = arith.negf %720 : vector<8x32xf32>
    %722 = math.exp %721 : vector<8x32xf32>
    %cst_203 = arith.constant 1.000000e+00 : f32
    %723 = vector.broadcast %cst_203 : f32 to vector<8x32xf32>
    %724 = arith.addf %723, %722 : vector<8x32xf32>
    %725 = arith.divf %723, %724 : vector<8x32xf32>
    %726 = arith.mulf %717, %657 : vector<8x32xf32>
    %727 = arith.mulf %711, %719 : vector<8x32xf32>
    %728 = arith.addf %726, %727 : vector<8x32xf32>
    %729 = math.tanh %728 : vector<8x32xf32>
    %730 = arith.mulf %725, %729 : vector<8x32xf32>
    %731 = arith.index_cast %c1_i32_190 : i32 to index
    %c0_204 = arith.constant 0 : index
    %c0_205 = arith.constant 0 : index
    %732 = vector.load %arg16[%731, %c0_204, %c0_205] : memref<8x8x32xf32, #tpu.memory_space<vmem>>, vector<1x8x32xf32>
    %733 = vector.shape_cast %732 : vector<1x8x32xf32> to vector<8x32xf32>
    %734 = vector.shape_cast %703 : vector<8x32xf32> to vector<1x8x32xf32>
    tpu.vector_store %arg16[%731, %c0_204, %c0_205], %734 {strides = array<i32>} : memref<8x8x32xf32, #tpu.memory_space<vmem>>, vector<1x8x32xf32>,
    %735 = arith.index_cast %668 : i32 to index
    %c0_206 = arith.constant 0 : index
    %c0_207 = arith.constant 0 : index
    %736 = vector.load %arg17[%735, %c0_206, %c0_207] : memref<8x8x32xf32, #tpu.memory_space<vmem>>, vector<1x8x32xf32>
    %737 = vector.shape_cast %736 : vector<1x8x32xf32> to vector<8x32xf32>
    %738 = vector.shape_cast %730 : vector<8x32xf32> to vector<1x8x32xf32>
    tpu.vector_store %arg17[%735, %c0_206, %c0_207], %738 {strides = array<i32>} : memref<8x8x32xf32, #tpu.memory_space<vmem>>, vector<1x8x32xf32>,
    %c2_i32_208 = arith.constant 2 : i32
    %c7_i32_209 = arith.constant 7 : i32
    %739 = arith.subi %c7_i32_209, %c2_i32_208 : i32
    %740 = arith.index_cast %c2_i32_208 : i32 to index
    %c0_210 = arith.constant 0 : index
    %c0_211 = arith.constant 0 : index
    %741 = vector.load %arg18[%740, %c0_210, %c0_211] : memref<8x8x256xf32, #tpu.memory_space<vmem>>, vector<1x8x256xf32>
    %742 = vector.shape_cast %741 : vector<1x8x256xf32> to vector<8x256xf32>
    %743 = vector.extract_strided_slice %742 {offsets = [0, 0], sizes = [8, 128], strides = [1, 1]} : vector<8x256xf32> to vector<8x128xf32>
    %744 = arith.index_cast %739 : i32 to index
    %c0_212 = arith.constant 0 : index
    %c0_213 = arith.constant 0 : index
    %745 = vector.load %arg18[%744, %c0_212, %c0_213] : memref<8x8x256xf32, #tpu.memory_space<vmem>>, vector<1x8x256xf32>
    %746 = vector.shape_cast %745 : vector<1x8x256xf32> to vector<8x256xf32>
    %747 = vector.extract_strided_slice %746 {offsets = [0, 128], sizes = [8, 128], strides = [1, 1]} : vector<8x256xf32> to vector<8x128xf32>
    %cst_214 = arith.constant dense<0.000000e+00> : vector<8x128xf32>
    %748 = tpu.matmul %703, %594, %cst_214 {dimension_numbers = #tpu.dot_dimension_numbers<[1], [0], [0], [1], [0, 0, 1, 1], [], []>} : vector<8x32xf32>, vector<32x128xf32>, vector<8x128xf32> -> vector<8x128xf32>
    %749 = arith.addf %743, %748 : vector<8x128xf32>
    %750 = vector.extract_strided_slice %749 {offsets = [0, 0], sizes = [8, 32], strides = [1, 1]} : vector<8x128xf32> to vector<8x32xf32>
    %751 = arith.negf %750 : vector<8x32xf32>
    %752 = math.exp %751 : vector<8x32xf32>
    %cst_215 = arith.constant 1.000000e+00 : f32
    %753 = vector.broadcast %cst_215 : f32 to vector<8x32xf32>
    %754 = arith.addf %753, %752 : vector<8x32xf32>
    %755 = arith.divf %753, %754 : vector<8x32xf32>
    %756 = vector.extract_strided_slice %749 {offsets = [0, 32], sizes = [8, 32], strides = [1, 1]} : vector<8x128xf32> to vector<8x32xf32>
    %757 = arith.negf %756 : vector<8x32xf32>
    %758 = math.exp %757 : vector<8x32xf32>
    %cst_216 = arith.constant 1.000000e+00 : f32
    %759 = vector.broadcast %cst_216 : f32 to vector<8x32xf32>
    %760 = arith.addf %759, %758 : vector<8x32xf32>
    %761 = arith.divf %759, %760 : vector<8x32xf32>
    %762 = vector.extract_strided_slice %749 {offsets = [0, 64], sizes = [8, 32], strides = [1, 1]} : vector<8x128xf32> to vector<8x32xf32>
    %763 = math.tanh %762 : vector<8x32xf32>
    %764 = vector.extract_strided_slice %749 {offsets = [0, 96], sizes = [8, 32], strides = [1, 1]} : vector<8x128xf32> to vector<8x32xf32>
    %765 = arith.negf %764 : vector<8x32xf32>
    %766 = math.exp %765 : vector<8x32xf32>
    %cst_217 = arith.constant 1.000000e+00 : f32
    %767 = vector.broadcast %cst_217 : f32 to vector<8x32xf32>
    %768 = arith.addf %767, %766 : vector<8x32xf32>
    %769 = arith.divf %767, %768 : vector<8x32xf32>
    %770 = arith.mulf %761, %701 : vector<8x32xf32>
    %771 = arith.mulf %755, %763 : vector<8x32xf32>
    %772 = arith.addf %770, %771 : vector<8x32xf32>
    %773 = math.tanh %772 : vector<8x32xf32>
    %774 = arith.mulf %769, %773 : vector<8x32xf32>
    %cst_218 = arith.constant dense<0.000000e+00> : vector<8x128xf32>
    %775 = tpu.matmul %730, %595, %cst_218 {dimension_numbers = #tpu.dot_dimension_numbers<[1], [0], [0], [1], [0, 0, 1, 1], [], []>} : vector<8x32xf32>, vector<32x128xf32>, vector<8x128xf32> -> vector<8x128xf32>
    %776 = arith.addf %747, %775 : vector<8x128xf32>
    %777 = vector.extract_strided_slice %776 {offsets = [0, 0], sizes = [8, 32], strides = [1, 1]} : vector<8x128xf32> to vector<8x32xf32>
    %778 = arith.negf %777 : vector<8x32xf32>
    %779 = math.exp %778 : vector<8x32xf32>
    %cst_219 = arith.constant 1.000000e+00 : f32
    %780 = vector.broadcast %cst_219 : f32 to vector<8x32xf32>
    %781 = arith.addf %780, %779 : vector<8x32xf32>
    %782 = arith.divf %780, %781 : vector<8x32xf32>
    %783 = vector.extract_strided_slice %776 {offsets = [0, 32], sizes = [8, 32], strides = [1, 1]} : vector<8x128xf32> to vector<8x32xf32>
    %784 = arith.negf %783 : vector<8x32xf32>
    %785 = math.exp %784 : vector<8x32xf32>
    %cst_220 = arith.constant 1.000000e+00 : f32
    %786 = vector.broadcast %cst_220 : f32 to vector<8x32xf32>
    %787 = arith.addf %786, %785 : vector<8x32xf32>
    %788 = arith.divf %786, %787 : vector<8x32xf32>
    %789 = vector.extract_strided_slice %776 {offsets = [0, 64], sizes = [8, 32], strides = [1, 1]} : vector<8x128xf32> to vector<8x32xf32>
    %790 = math.tanh %789 : vector<8x32xf32>
    %791 = vector.extract_strided_slice %776 {offsets = [0, 96], sizes = [8, 32], strides = [1, 1]} : vector<8x128xf32> to vector<8x32xf32>
    %792 = arith.negf %791 : vector<8x32xf32>
    %793 = math.exp %792 : vector<8x32xf32>
    %cst_221 = arith.constant 1.000000e+00 : f32
    %794 = vector.broadcast %cst_221 : f32 to vector<8x32xf32>
    %795 = arith.addf %794, %793 : vector<8x32xf32>
    %796 = arith.divf %794, %795 : vector<8x32xf32>
    %797 = arith.mulf %788, %728 : vector<8x32xf32>
    %798 = arith.mulf %782, %790 : vector<8x32xf32>
    %799 = arith.addf %797, %798 : vector<8x32xf32>
    %800 = math.tanh %799 : vector<8x32xf32>
    %801 = arith.mulf %796, %800 : vector<8x32xf32>
    %802 = arith.index_cast %c2_i32_208 : i32 to index
    %c0_222 = arith.constant 0 : index
    %c0_223 = arith.constant 0 : index
    %803 = vector.load %arg16[%802, %c0_222, %c0_223] : memref<8x8x32xf32, #tpu.memory_space<vmem>>, vector<1x8x32xf32>
    %804 = vector.shape_cast %803 : vector<1x8x32xf32> to vector<8x32xf32>
    %805 = vector.shape_cast %774 : vector<8x32xf32> to vector<1x8x32xf32>
    tpu.vector_store %arg16[%802, %c0_222, %c0_223], %805 {strides = array<i32>} : memref<8x8x32xf32, #tpu.memory_space<vmem>>, vector<1x8x32xf32>,
    %806 = arith.index_cast %739 : i32 to index
    %c0_224 = arith.constant 0 : index
    %c0_225 = arith.constant 0 : index
    %807 = vector.load %arg17[%806, %c0_224, %c0_225] : memref<8x8x32xf32, #tpu.memory_space<vmem>>, vector<1x8x32xf32>
    %808 = vector.shape_cast %807 : vector<1x8x32xf32> to vector<8x32xf32>
    %809 = vector.shape_cast %801 : vector<8x32xf32> to vector<1x8x32xf32>
    tpu.vector_store %arg17[%806, %c0_224, %c0_225], %809 {strides = array<i32>} : memref<8x8x32xf32, #tpu.memory_space<vmem>>, vector<1x8x32xf32>,
    %c3_i32_226 = arith.constant 3 : i32
    %c7_i32_227 = arith.constant 7 : i32
    %810 = arith.subi %c7_i32_227, %c3_i32_226 : i32
    %811 = arith.index_cast %c3_i32_226 : i32 to index
    %c0_228 = arith.constant 0 : index
    %c0_229 = arith.constant 0 : index
    %812 = vector.load %arg18[%811, %c0_228, %c0_229] : memref<8x8x256xf32, #tpu.memory_space<vmem>>, vector<1x8x256xf32>
    %813 = vector.shape_cast %812 : vector<1x8x256xf32> to vector<8x256xf32>
    %814 = vector.extract_strided_slice %813 {offsets = [0, 0], sizes = [8, 128], strides = [1, 1]} : vector<8x256xf32> to vector<8x128xf32>
    %815 = arith.index_cast %810 : i32 to index
    %c0_230 = arith.constant 0 : index
    %c0_231 = arith.constant 0 : index
    %816 = vector.load %arg18[%815, %c0_230, %c0_231] : memref<8x8x256xf32, #tpu.memory_space<vmem>>, vector<1x8x256xf32>
    %817 = vector.shape_cast %816 : vector<1x8x256xf32> to vector<8x256xf32>
    %818 = vector.extract_strided_slice %817 {offsets = [0, 128], sizes = [8, 128], strides = [1, 1]} : vector<8x256xf32> to vector<8x128xf32>
    %cst_232 = arith.constant dense<0.000000e+00> : vector<8x128xf32>
    %819 = tpu.matmul %774, %594, %cst_232 {dimension_numbers = #tpu.dot_dimension_numbers<[1], [0], [0], [1], [0, 0, 1, 1], [], []>} : vector<8x32xf32>, vector<32x128xf32>, vector<8x128xf32> -> vector<8x128xf32>
    %820 = arith.addf %814, %819 : vector<8x128xf32>
    %821 = vector.extract_strided_slice %820 {offsets = [0, 0], sizes = [8, 32], strides = [1, 1]} : vector<8x128xf32> to vector<8x32xf32>
    %822 = arith.negf %821 : vector<8x32xf32>
    %823 = math.exp %822 : vector<8x32xf32>
    %cst_233 = arith.constant 1.000000e+00 : f32
    %824 = vector.broadcast %cst_233 : f32 to vector<8x32xf32>
    %825 = arith.addf %824, %823 : vector<8x32xf32>
    %826 = arith.divf %824, %825 : vector<8x32xf32>
    %827 = vector.extract_strided_slice %820 {offsets = [0, 32], sizes = [8, 32], strides = [1, 1]} : vector<8x128xf32> to vector<8x32xf32>
    %828 = arith.negf %827 : vector<8x32xf32>
    %829 = math.exp %828 : vector<8x32xf32>
    %cst_234 = arith.constant 1.000000e+00 : f32
    %830 = vector.broadcast %cst_234 : f32 to vector<8x32xf32>
    %831 = arith.addf %830, %829 : vector<8x32xf32>
    %832 = arith.divf %830, %831 : vector<8x32xf32>
    %833 = vector.extract_strided_slice %820 {offsets = [0, 64], sizes = [8, 32], strides = [1, 1]} : vector<8x128xf32> to vector<8x32xf32>
    %834 = math.tanh %833 : vector<8x32xf32>
    %835 = vector.extract_strided_slice %820 {offsets = [0, 96], sizes = [8, 32], strides = [1, 1]} : vector<8x128xf32> to vector<8x32xf32>
    %836 = arith.negf %835 : vector<8x32xf32>
    %837 = math.exp %836 : vector<8x32xf32>
    %cst_235 = arith.constant 1.000000e+00 : f32
    %838 = vector.broadcast %cst_235 : f32 to vector<8x32xf32>
    %839 = arith.addf %838, %837 : vector<8x32xf32>
    %840 = arith.divf %838, %839 : vector<8x32xf32>
    %841 = arith.mulf %832, %772 : vector<8x32xf32>
    %842 = arith.mulf %826, %834 : vector<8x32xf32>
    %843 = arith.addf %841, %842 : vector<8x32xf32>
    %844 = math.tanh %843 : vector<8x32xf32>
    %845 = arith.mulf %840, %844 : vector<8x32xf32>
    %cst_236 = arith.constant dense<0.000000e+00> : vector<8x128xf32>
    %846 = tpu.matmul %801, %595, %cst_236 {dimension_numbers = #tpu.dot_dimension_numbers<[1], [0], [0], [1], [0, 0, 1, 1], [], []>} : vector<8x32xf32>, vector<32x128xf32>, vector<8x128xf32> -> vector<8x128xf32>
    %847 = arith.addf %818, %846 : vector<8x128xf32>
    %848 = vector.extract_strided_slice %847 {offsets = [0, 0], sizes = [8, 32], strides = [1, 1]} : vector<8x128xf32> to vector<8x32xf32>
    %849 = arith.negf %848 : vector<8x32xf32>
    %850 = math.exp %849 : vector<8x32xf32>
    %cst_237 = arith.constant 1.000000e+00 : f32
    %851 = vector.broadcast %cst_237 : f32 to vector<8x32xf32>
    %852 = arith.addf %851, %850 : vector<8x32xf32>
    %853 = arith.divf %851, %852 : vector<8x32xf32>
    %854 = vector.extract_strided_slice %847 {offsets = [0, 32], sizes = [8, 32], strides = [1, 1]} : vector<8x128xf32> to vector<8x32xf32>
    %855 = arith.negf %854 : vector<8x32xf32>
    %856 = math.exp %855 : vector<8x32xf32>
    %cst_238 = arith.constant 1.000000e+00 : f32
    %857 = vector.broadcast %cst_238 : f32 to vector<8x32xf32>
    %858 = arith.addf %857, %856 : vector<8x32xf32>
    %859 = arith.divf %857, %858 : vector<8x32xf32>
    %860 = vector.extract_strided_slice %847 {offsets = [0, 64], sizes = [8, 32], strides = [1, 1]} : vector<8x128xf32> to vector<8x32xf32>
    %861 = math.tanh %860 : vector<8x32xf32>
    %862 = vector.extract_strided_slice %847 {offsets = [0, 96], sizes = [8, 32], strides = [1, 1]} : vector<8x128xf32> to vector<8x32xf32>
    %863 = arith.negf %862 : vector<8x32xf32>
    %864 = math.exp %863 : vector<8x32xf32>
    %cst_239 = arith.constant 1.000000e+00 : f32
    %865 = vector.broadcast %cst_239 : f32 to vector<8x32xf32>
    %866 = arith.addf %865, %864 : vector<8x32xf32>
    %867 = arith.divf %865, %866 : vector<8x32xf32>
    %868 = arith.mulf %859, %799 : vector<8x32xf32>
    %869 = arith.mulf %853, %861 : vector<8x32xf32>
    %870 = arith.addf %868, %869 : vector<8x32xf32>
    %871 = math.tanh %870 : vector<8x32xf32>
    %872 = arith.mulf %867, %871 : vector<8x32xf32>
    %873 = arith.index_cast %c3_i32_226 : i32 to index
    %c0_240 = arith.constant 0 : index
    %c0_241 = arith.constant 0 : index
    %874 = vector.load %arg16[%873, %c0_240, %c0_241] : memref<8x8x32xf32, #tpu.memory_space<vmem>>, vector<1x8x32xf32>
    %875 = vector.shape_cast %874 : vector<1x8x32xf32> to vector<8x32xf32>
    %876 = vector.shape_cast %845 : vector<8x32xf32> to vector<1x8x32xf32>
    tpu.vector_store %arg16[%873, %c0_240, %c0_241], %876 {strides = array<i32>} : memref<8x8x32xf32, #tpu.memory_space<vmem>>, vector<1x8x32xf32>,
    %877 = arith.index_cast %810 : i32 to index
    %c0_242 = arith.constant 0 : index
    %c0_243 = arith.constant 0 : index
    %878 = vector.load %arg17[%877, %c0_242, %c0_243] : memref<8x8x32xf32, #tpu.memory_space<vmem>>, vector<1x8x32xf32>
    %879 = vector.shape_cast %878 : vector<1x8x32xf32> to vector<8x32xf32>
    %880 = vector.shape_cast %872 : vector<8x32xf32> to vector<1x8x32xf32>
    tpu.vector_store %arg17[%877, %c0_242, %c0_243], %880 {strides = array<i32>} : memref<8x8x32xf32, #tpu.memory_space<vmem>>, vector<1x8x32xf32>,
    %c4_i32_244 = arith.constant 4 : i32
    %c7_i32_245 = arith.constant 7 : i32
    %881 = arith.subi %c7_i32_245, %c4_i32_244 : i32
    %882 = arith.index_cast %c4_i32_244 : i32 to index
    %c0_246 = arith.constant 0 : index
    %c0_247 = arith.constant 0 : index
    %883 = vector.load %arg18[%882, %c0_246, %c0_247] : memref<8x8x256xf32, #tpu.memory_space<vmem>>, vector<1x8x256xf32>
    %884 = vector.shape_cast %883 : vector<1x8x256xf32> to vector<8x256xf32>
    %885 = vector.extract_strided_slice %884 {offsets = [0, 0], sizes = [8, 128], strides = [1, 1]} : vector<8x256xf32> to vector<8x128xf32>
    %886 = arith.index_cast %881 : i32 to index
    %c0_248 = arith.constant 0 : index
    %c0_249 = arith.constant 0 : index
    %887 = vector.load %arg18[%886, %c0_248, %c0_249] : memref<8x8x256xf32, #tpu.memory_space<vmem>>, vector<1x8x256xf32>
    %888 = vector.shape_cast %887 : vector<1x8x256xf32> to vector<8x256xf32>
    %889 = vector.extract_strided_slice %888 {offsets = [0, 128], sizes = [8, 128], strides = [1, 1]} : vector<8x256xf32> to vector<8x128xf32>
    %cst_250 = arith.constant dense<0.000000e+00> : vector<8x128xf32>
    %890 = tpu.matmul %845, %594, %cst_250 {dimension_numbers = #tpu.dot_dimension_numbers<[1], [0], [0], [1], [0, 0, 1, 1], [], []>} : vector<8x32xf32>, vector<32x128xf32>, vector<8x128xf32> -> vector<8x128xf32>
    %891 = arith.addf %885, %890 : vector<8x128xf32>
    %892 = vector.extract_strided_slice %891 {offsets = [0, 0], sizes = [8, 32], strides = [1, 1]} : vector<8x128xf32> to vector<8x32xf32>
    %893 = arith.negf %892 : vector<8x32xf32>
    %894 = math.exp %893 : vector<8x32xf32>
    %cst_251 = arith.constant 1.000000e+00 : f32
    %895 = vector.broadcast %cst_251 : f32 to vector<8x32xf32>
    %896 = arith.addf %895, %894 : vector<8x32xf32>
    %897 = arith.divf %895, %896 : vector<8x32xf32>
    %898 = vector.extract_strided_slice %891 {offsets = [0, 32], sizes = [8, 32], strides = [1, 1]} : vector<8x128xf32> to vector<8x32xf32>
    %899 = arith.negf %898 : vector<8x32xf32>
    %900 = math.exp %899 : vector<8x32xf32>
    %cst_252 = arith.constant 1.000000e+00 : f32
    %901 = vector.broadcast %cst_252 : f32 to vector<8x32xf32>
    %902 = arith.addf %901, %900 : vector<8x32xf32>
    %903 = arith.divf %901, %902 : vector<8x32xf32>
    %904 = vector.extract_strided_slice %891 {offsets = [0, 64], sizes = [8, 32], strides = [1, 1]} : vector<8x128xf32> to vector<8x32xf32>
    %905 = math.tanh %904 : vector<8x32xf32>
    %906 = vector.extract_strided_slice %891 {offsets = [0, 96], sizes = [8, 32], strides = [1, 1]} : vector<8x128xf32> to vector<8x32xf32>
    %907 = arith.negf %906 : vector<8x32xf32>
    %908 = math.exp %907 : vector<8x32xf32>
    %cst_253 = arith.constant 1.000000e+00 : f32
    %909 = vector.broadcast %cst_253 : f32 to vector<8x32xf32>
    %910 = arith.addf %909, %908 : vector<8x32xf32>
    %911 = arith.divf %909, %910 : vector<8x32xf32>
    %912 = arith.mulf %903, %843 : vector<8x32xf32>
    %913 = arith.mulf %897, %905 : vector<8x32xf32>
    %914 = arith.addf %912, %913 : vector<8x32xf32>
    %915 = math.tanh %914 : vector<8x32xf32>
    %916 = arith.mulf %911, %915 : vector<8x32xf32>
    %cst_254 = arith.constant dense<0.000000e+00> : vector<8x128xf32>
    %917 = tpu.matmul %872, %595, %cst_254 {dimension_numbers = #tpu.dot_dimension_numbers<[1], [0], [0], [1], [0, 0, 1, 1], [], []>} : vector<8x32xf32>, vector<32x128xf32>, vector<8x128xf32> -> vector<8x128xf32>
    %918 = arith.addf %889, %917 : vector<8x128xf32>
    %919 = vector.extract_strided_slice %918 {offsets = [0, 0], sizes = [8, 32], strides = [1, 1]} : vector<8x128xf32> to vector<8x32xf32>
    %920 = arith.negf %919 : vector<8x32xf32>
    %921 = math.exp %920 : vector<8x32xf32>
    %cst_255 = arith.constant 1.000000e+00 : f32
    %922 = vector.broadcast %cst_255 : f32 to vector<8x32xf32>
    %923 = arith.addf %922, %921 : vector<8x32xf32>
    %924 = arith.divf %922, %923 : vector<8x32xf32>
    %925 = vector.extract_strided_slice %918 {offsets = [0, 32], sizes = [8, 32], strides = [1, 1]} : vector<8x128xf32> to vector<8x32xf32>
    %926 = arith.negf %925 : vector<8x32xf32>
    %927 = math.exp %926 : vector<8x32xf32>
    %cst_256 = arith.constant 1.000000e+00 : f32
    %928 = vector.broadcast %cst_256 : f32 to vector<8x32xf32>
    %929 = arith.addf %928, %927 : vector<8x32xf32>
    %930 = arith.divf %928, %929 : vector<8x32xf32>
    %931 = vector.extract_strided_slice %918 {offsets = [0, 64], sizes = [8, 32], strides = [1, 1]} : vector<8x128xf32> to vector<8x32xf32>
    %932 = math.tanh %931 : vector<8x32xf32>
    %933 = vector.extract_strided_slice %918 {offsets = [0, 96], sizes = [8, 32], strides = [1, 1]} : vector<8x128xf32> to vector<8x32xf32>
    %934 = arith.negf %933 : vector<8x32xf32>
    %935 = math.exp %934 : vector<8x32xf32>
    %cst_257 = arith.constant 1.000000e+00 : f32
    %936 = vector.broadcast %cst_257 : f32 to vector<8x32xf32>
    %937 = arith.addf %936, %935 : vector<8x32xf32>
    %938 = arith.divf %936, %937 : vector<8x32xf32>
    %939 = arith.mulf %930, %870 : vector<8x32xf32>
    %940 = arith.mulf %924, %932 : vector<8x32xf32>
    %941 = arith.addf %939, %940 : vector<8x32xf32>
    %942 = math.tanh %941 : vector<8x32xf32>
    %943 = arith.mulf %938, %942 : vector<8x32xf32>
    %944 = arith.index_cast %c4_i32_244 : i32 to index
    %c0_258 = arith.constant 0 : index
    %c0_259 = arith.constant 0 : index
    %945 = vector.load %arg16[%944, %c0_258, %c0_259] : memref<8x8x32xf32, #tpu.memory_space<vmem>>, vector<1x8x32xf32>
    %946 = vector.shape_cast %945 : vector<1x8x32xf32> to vector<8x32xf32>
    %947 = vector.shape_cast %916 : vector<8x32xf32> to vector<1x8x32xf32>
    tpu.vector_store %arg16[%944, %c0_258, %c0_259], %947 {strides = array<i32>} : memref<8x8x32xf32, #tpu.memory_space<vmem>>, vector<1x8x32xf32>,
    %948 = arith.index_cast %881 : i32 to index
    %c0_260 = arith.constant 0 : index
    %c0_261 = arith.constant 0 : index
    %949 = vector.load %arg17[%948, %c0_260, %c0_261] : memref<8x8x32xf32, #tpu.memory_space<vmem>>, vector<1x8x32xf32>
    %950 = vector.shape_cast %949 : vector<1x8x32xf32> to vector<8x32xf32>
    %951 = vector.shape_cast %943 : vector<8x32xf32> to vector<1x8x32xf32>
    tpu.vector_store %arg17[%948, %c0_260, %c0_261], %951 {strides = array<i32>} : memref<8x8x32xf32, #tpu.memory_space<vmem>>, vector<1x8x32xf32>,
    %c5_i32_262 = arith.constant 5 : i32
    %c7_i32_263 = arith.constant 7 : i32
    %952 = arith.subi %c7_i32_263, %c5_i32_262 : i32
    %953 = arith.index_cast %c5_i32_262 : i32 to index
    %c0_264 = arith.constant 0 : index
    %c0_265 = arith.constant 0 : index
    %954 = vector.load %arg18[%953, %c0_264, %c0_265] : memref<8x8x256xf32, #tpu.memory_space<vmem>>, vector<1x8x256xf32>
    %955 = vector.shape_cast %954 : vector<1x8x256xf32> to vector<8x256xf32>
    %956 = vector.extract_strided_slice %955 {offsets = [0, 0], sizes = [8, 128], strides = [1, 1]} : vector<8x256xf32> to vector<8x128xf32>
    %957 = arith.index_cast %952 : i32 to index
    %c0_266 = arith.constant 0 : index
    %c0_267 = arith.constant 0 : index
    %958 = vector.load %arg18[%957, %c0_266, %c0_267] : memref<8x8x256xf32, #tpu.memory_space<vmem>>, vector<1x8x256xf32>
    %959 = vector.shape_cast %958 : vector<1x8x256xf32> to vector<8x256xf32>
    %960 = vector.extract_strided_slice %959 {offsets = [0, 128], sizes = [8, 128], strides = [1, 1]} : vector<8x256xf32> to vector<8x128xf32>
    %cst_268 = arith.constant dense<0.000000e+00> : vector<8x128xf32>
    %961 = tpu.matmul %916, %594, %cst_268 {dimension_numbers = #tpu.dot_dimension_numbers<[1], [0], [0], [1], [0, 0, 1, 1], [], []>} : vector<8x32xf32>, vector<32x128xf32>, vector<8x128xf32> -> vector<8x128xf32>
    %962 = arith.addf %956, %961 : vector<8x128xf32>
    %963 = vector.extract_strided_slice %962 {offsets = [0, 0], sizes = [8, 32], strides = [1, 1]} : vector<8x128xf32> to vector<8x32xf32>
    %964 = arith.negf %963 : vector<8x32xf32>
    %965 = math.exp %964 : vector<8x32xf32>
    %cst_269 = arith.constant 1.000000e+00 : f32
    %966 = vector.broadcast %cst_269 : f32 to vector<8x32xf32>
    %967 = arith.addf %966, %965 : vector<8x32xf32>
    %968 = arith.divf %966, %967 : vector<8x32xf32>
    %969 = vector.extract_strided_slice %962 {offsets = [0, 32], sizes = [8, 32], strides = [1, 1]} : vector<8x128xf32> to vector<8x32xf32>
    %970 = arith.negf %969 : vector<8x32xf32>
    %971 = math.exp %970 : vector<8x32xf32>
    %cst_270 = arith.constant 1.000000e+00 : f32
    %972 = vector.broadcast %cst_270 : f32 to vector<8x32xf32>
    %973 = arith.addf %972, %971 : vector<8x32xf32>
    %974 = arith.divf %972, %973 : vector<8x32xf32>
    %975 = vector.extract_strided_slice %962 {offsets = [0, 64], sizes = [8, 32], strides = [1, 1]} : vector<8x128xf32> to vector<8x32xf32>
    %976 = math.tanh %975 : vector<8x32xf32>
    %977 = vector.extract_strided_slice %962 {offsets = [0, 96], sizes = [8, 32], strides = [1, 1]} : vector<8x128xf32> to vector<8x32xf32>
    %978 = arith.negf %977 : vector<8x32xf32>
    %979 = math.exp %978 : vector<8x32xf32>
    %cst_271 = arith.constant 1.000000e+00 : f32
    %980 = vector.broadcast %cst_271 : f32 to vector<8x32xf32>
    %981 = arith.addf %980, %979 : vector<8x32xf32>
    %982 = arith.divf %980, %981 : vector<8x32xf32>
    %983 = arith.mulf %974, %914 : vector<8x32xf32>
    %984 = arith.mulf %968, %976 : vector<8x32xf32>
    %985 = arith.addf %983, %984 : vector<8x32xf32>
    %986 = math.tanh %985 : vector<8x32xf32>
    %987 = arith.mulf %982, %986 : vector<8x32xf32>
    %cst_272 = arith.constant dense<0.000000e+00> : vector<8x128xf32>
    %988 = tpu.matmul %943, %595, %cst_272 {dimension_numbers = #tpu.dot_dimension_numbers<[1], [0], [0], [1], [0, 0, 1, 1], [], []>} : vector<8x32xf32>, vector<32x128xf32>, vector<8x128xf32> -> vector<8x128xf32>
    %989 = arith.addf %960, %988 : vector<8x128xf32>
    %990 = vector.extract_strided_slice %989 {offsets = [0, 0], sizes = [8, 32], strides = [1, 1]} : vector<8x128xf32> to vector<8x32xf32>
    %991 = arith.negf %990 : vector<8x32xf32>
    %992 = math.exp %991 : vector<8x32xf32>
    %cst_273 = arith.constant 1.000000e+00 : f32
    %993 = vector.broadcast %cst_273 : f32 to vector<8x32xf32>
    %994 = arith.addf %993, %992 : vector<8x32xf32>
    %995 = arith.divf %993, %994 : vector<8x32xf32>
    %996 = vector.extract_strided_slice %989 {offsets = [0, 32], sizes = [8, 32], strides = [1, 1]} : vector<8x128xf32> to vector<8x32xf32>
    %997 = arith.negf %996 : vector<8x32xf32>
    %998 = math.exp %997 : vector<8x32xf32>
    %cst_274 = arith.constant 1.000000e+00 : f32
    %999 = vector.broadcast %cst_274 : f32 to vector<8x32xf32>
    %1000 = arith.addf %999, %998 : vector<8x32xf32>
    %1001 = arith.divf %999, %1000 : vector<8x32xf32>
    %1002 = vector.extract_strided_slice %989 {offsets = [0, 64], sizes = [8, 32], strides = [1, 1]} : vector<8x128xf32> to vector<8x32xf32>
    %1003 = math.tanh %1002 : vector<8x32xf32>
    %1004 = vector.extract_strided_slice %989 {offsets = [0, 96], sizes = [8, 32], strides = [1, 1]} : vector<8x128xf32> to vector<8x32xf32>
    %1005 = arith.negf %1004 : vector<8x32xf32>
    %1006 = math.exp %1005 : vector<8x32xf32>
    %cst_275 = arith.constant 1.000000e+00 : f32
    %1007 = vector.broadcast %cst_275 : f32 to vector<8x32xf32>
    %1008 = arith.addf %1007, %1006 : vector<8x32xf32>
    %1009 = arith.divf %1007, %1008 : vector<8x32xf32>
    %1010 = arith.mulf %1001, %941 : vector<8x32xf32>
    %1011 = arith.mulf %995, %1003 : vector<8x32xf32>
    %1012 = arith.addf %1010, %1011 : vector<8x32xf32>
    %1013 = math.tanh %1012 : vector<8x32xf32>
    %1014 = arith.mulf %1009, %1013 : vector<8x32xf32>
    %1015 = arith.index_cast %c5_i32_262 : i32 to index
    %c0_276 = arith.constant 0 : index
    %c0_277 = arith.constant 0 : index
    %1016 = vector.load %arg16[%1015, %c0_276, %c0_277] : memref<8x8x32xf32, #tpu.memory_space<vmem>>, vector<1x8x32xf32>
    %1017 = vector.shape_cast %1016 : vector<1x8x32xf32> to vector<8x32xf32>
    %1018 = vector.shape_cast %987 : vector<8x32xf32> to vector<1x8x32xf32>
    tpu.vector_store %arg16[%1015, %c0_276, %c0_277], %1018 {strides = array<i32>} : memref<8x8x32xf32, #tpu.memory_space<vmem>>, vector<1x8x32xf32>,
    %1019 = arith.index_cast %952 : i32 to index
    %c0_278 = arith.constant 0 : index
    %c0_279 = arith.constant 0 : index
    %1020 = vector.load %arg17[%1019, %c0_278, %c0_279] : memref<8x8x32xf32, #tpu.memory_space<vmem>>, vector<1x8x32xf32>
    %1021 = vector.shape_cast %1020 : vector<1x8x32xf32> to vector<8x32xf32>
    %1022 = vector.shape_cast %1014 : vector<8x32xf32> to vector<1x8x32xf32>
    tpu.vector_store %arg17[%1019, %c0_278, %c0_279], %1022 {strides = array<i32>} : memref<8x8x32xf32, #tpu.memory_space<vmem>>, vector<1x8x32xf32>,
    %c6_i32_280 = arith.constant 6 : i32
    %c7_i32_281 = arith.constant 7 : i32
    %1023 = arith.subi %c7_i32_281, %c6_i32_280 : i32
    %1024 = arith.index_cast %c6_i32_280 : i32 to index
    %c0_282 = arith.constant 0 : index
    %c0_283 = arith.constant 0 : index
    %1025 = vector.load %arg18[%1024, %c0_282, %c0_283] : memref<8x8x256xf32, #tpu.memory_space<vmem>>, vector<1x8x256xf32>
    %1026 = vector.shape_cast %1025 : vector<1x8x256xf32> to vector<8x256xf32>
    %1027 = vector.extract_strided_slice %1026 {offsets = [0, 0], sizes = [8, 128], strides = [1, 1]} : vector<8x256xf32> to vector<8x128xf32>
    %1028 = arith.index_cast %1023 : i32 to index
    %c0_284 = arith.constant 0 : index
    %c0_285 = arith.constant 0 : index
    %1029 = vector.load %arg18[%1028, %c0_284, %c0_285] : memref<8x8x256xf32, #tpu.memory_space<vmem>>, vector<1x8x256xf32>
    %1030 = vector.shape_cast %1029 : vector<1x8x256xf32> to vector<8x256xf32>
    %1031 = vector.extract_strided_slice %1030 {offsets = [0, 128], sizes = [8, 128], strides = [1, 1]} : vector<8x256xf32> to vector<8x128xf32>
    %cst_286 = arith.constant dense<0.000000e+00> : vector<8x128xf32>
    %1032 = tpu.matmul %987, %594, %cst_286 {dimension_numbers = #tpu.dot_dimension_numbers<[1], [0], [0], [1], [0, 0, 1, 1], [], []>} : vector<8x32xf32>, vector<32x128xf32>, vector<8x128xf32> -> vector<8x128xf32>
    %1033 = arith.addf %1027, %1032 : vector<8x128xf32>
    %1034 = vector.extract_strided_slice %1033 {offsets = [0, 0], sizes = [8, 32], strides = [1, 1]} : vector<8x128xf32> to vector<8x32xf32>
    %1035 = arith.negf %1034 : vector<8x32xf32>
    %1036 = math.exp %1035 : vector<8x32xf32>
    %cst_287 = arith.constant 1.000000e+00 : f32
    %1037 = vector.broadcast %cst_287 : f32 to vector<8x32xf32>
    %1038 = arith.addf %1037, %1036 : vector<8x32xf32>
    %1039 = arith.divf %1037, %1038 : vector<8x32xf32>
    %1040 = vector.extract_strided_slice %1033 {offsets = [0, 32], sizes = [8, 32], strides = [1, 1]} : vector<8x128xf32> to vector<8x32xf32>
    %1041 = arith.negf %1040 : vector<8x32xf32>
    %1042 = math.exp %1041 : vector<8x32xf32>
    %cst_288 = arith.constant 1.000000e+00 : f32
    %1043 = vector.broadcast %cst_288 : f32 to vector<8x32xf32>
    %1044 = arith.addf %1043, %1042 : vector<8x32xf32>
    %1045 = arith.divf %1043, %1044 : vector<8x32xf32>
    %1046 = vector.extract_strided_slice %1033 {offsets = [0, 64], sizes = [8, 32], strides = [1, 1]} : vector<8x128xf32> to vector<8x32xf32>
    %1047 = math.tanh %1046 : vector<8x32xf32>
    %1048 = vector.extract_strided_slice %1033 {offsets = [0, 96], sizes = [8, 32], strides = [1, 1]} : vector<8x128xf32> to vector<8x32xf32>
    %1049 = arith.negf %1048 : vector<8x32xf32>
    %1050 = math.exp %1049 : vector<8x32xf32>
    %cst_289 = arith.constant 1.000000e+00 : f32
    %1051 = vector.broadcast %cst_289 : f32 to vector<8x32xf32>
    %1052 = arith.addf %1051, %1050 : vector<8x32xf32>
    %1053 = arith.divf %1051, %1052 : vector<8x32xf32>
    %1054 = arith.mulf %1045, %985 : vector<8x32xf32>
    %1055 = arith.mulf %1039, %1047 : vector<8x32xf32>
    %1056 = arith.addf %1054, %1055 : vector<8x32xf32>
    %1057 = math.tanh %1056 : vector<8x32xf32>
    %1058 = arith.mulf %1053, %1057 : vector<8x32xf32>
    %cst_290 = arith.constant dense<0.000000e+00> : vector<8x128xf32>
    %1059 = tpu.matmul %1014, %595, %cst_290 {dimension_numbers = #tpu.dot_dimension_numbers<[1], [0], [0], [1], [0, 0, 1, 1], [], []>} : vector<8x32xf32>, vector<32x128xf32>, vector<8x128xf32> -> vector<8x128xf32>
    %1060 = arith.addf %1031, %1059 : vector<8x128xf32>
    %1061 = vector.extract_strided_slice %1060 {offsets = [0, 0], sizes = [8, 32], strides = [1, 1]} : vector<8x128xf32> to vector<8x32xf32>
    %1062 = arith.negf %1061 : vector<8x32xf32>
    %1063 = math.exp %1062 : vector<8x32xf32>
    %cst_291 = arith.constant 1.000000e+00 : f32
    %1064 = vector.broadcast %cst_291 : f32 to vector<8x32xf32>
    %1065 = arith.addf %1064, %1063 : vector<8x32xf32>
    %1066 = arith.divf %1064, %1065 : vector<8x32xf32>
    %1067 = vector.extract_strided_slice %1060 {offsets = [0, 32], sizes = [8, 32], strides = [1, 1]} : vector<8x128xf32> to vector<8x32xf32>
    %1068 = arith.negf %1067 : vector<8x32xf32>
    %1069 = math.exp %1068 : vector<8x32xf32>
    %cst_292 = arith.constant 1.000000e+00 : f32
    %1070 = vector.broadcast %cst_292 : f32 to vector<8x32xf32>
    %1071 = arith.addf %1070, %1069 : vector<8x32xf32>
    %1072 = arith.divf %1070, %1071 : vector<8x32xf32>
    %1073 = vector.extract_strided_slice %1060 {offsets = [0, 64], sizes = [8, 32], strides = [1, 1]} : vector<8x128xf32> to vector<8x32xf32>
    %1074 = math.tanh %1073 : vector<8x32xf32>
    %1075 = vector.extract_strided_slice %1060 {offsets = [0, 96], sizes = [8, 32], strides = [1, 1]} : vector<8x128xf32> to vector<8x32xf32>
    %1076 = arith.negf %1075 : vector<8x32xf32>
    %1077 = math.exp %1076 : vector<8x32xf32>
    %cst_293 = arith.constant 1.000000e+00 : f32
    %1078 = vector.broadcast %cst_293 : f32 to vector<8x32xf32>
    %1079 = arith.addf %1078, %1077 : vector<8x32xf32>
    %1080 = arith.divf %1078, %1079 : vector<8x32xf32>
    %1081 = arith.mulf %1072, %1012 : vector<8x32xf32>
    %1082 = arith.mulf %1066, %1074 : vector<8x32xf32>
    %1083 = arith.addf %1081, %1082 : vector<8x32xf32>
    %1084 = math.tanh %1083 : vector<8x32xf32>
    %1085 = arith.mulf %1080, %1084 : vector<8x32xf32>
    %1086 = arith.index_cast %c6_i32_280 : i32 to index
    %c0_294 = arith.constant 0 : index
    %c0_295 = arith.constant 0 : index
    %1087 = vector.load %arg16[%1086, %c0_294, %c0_295] : memref<8x8x32xf32, #tpu.memory_space<vmem>>, vector<1x8x32xf32>
    %1088 = vector.shape_cast %1087 : vector<1x8x32xf32> to vector<8x32xf32>
    %1089 = vector.shape_cast %1058 : vector<8x32xf32> to vector<1x8x32xf32>
    tpu.vector_store %arg16[%1086, %c0_294, %c0_295], %1089 {strides = array<i32>} : memref<8x8x32xf32, #tpu.memory_space<vmem>>, vector<1x8x32xf32>,
    %1090 = arith.index_cast %1023 : i32 to index
    %c0_296 = arith.constant 0 : index
    %c0_297 = arith.constant 0 : index
    %1091 = vector.load %arg17[%1090, %c0_296, %c0_297] : memref<8x8x32xf32, #tpu.memory_space<vmem>>, vector<1x8x32xf32>
    %1092 = vector.shape_cast %1091 : vector<1x8x32xf32> to vector<8x32xf32>
    %1093 = vector.shape_cast %1085 : vector<8x32xf32> to vector<1x8x32xf32>
    tpu.vector_store %arg17[%1090, %c0_296, %c0_297], %1093 {strides = array<i32>} : memref<8x8x32xf32, #tpu.memory_space<vmem>>, vector<1x8x32xf32>,
    %c7_i32_298 = arith.constant 7 : i32
    %c7_i32_299 = arith.constant 7 : i32
    %1094 = arith.subi %c7_i32_299, %c7_i32_298 : i32
    %1095 = arith.index_cast %c7_i32_298 : i32 to index
    %c0_300 = arith.constant 0 : index
    %c0_301 = arith.constant 0 : index
    %1096 = vector.load %arg18[%1095, %c0_300, %c0_301] : memref<8x8x256xf32, #tpu.memory_space<vmem>>, vector<1x8x256xf32>
    %1097 = vector.shape_cast %1096 : vector<1x8x256xf32> to vector<8x256xf32>
    %1098 = vector.extract_strided_slice %1097 {offsets = [0, 0], sizes = [8, 128], strides = [1, 1]} : vector<8x256xf32> to vector<8x128xf32>
    %1099 = arith.index_cast %1094 : i32 to index
    %c0_302 = arith.constant 0 : index
    %c0_303 = arith.constant 0 : index
    %1100 = vector.load %arg18[%1099, %c0_302, %c0_303] : memref<8x8x256xf32, #tpu.memory_space<vmem>>, vector<1x8x256xf32>
    %1101 = vector.shape_cast %1100 : vector<1x8x256xf32> to vector<8x256xf32>
    %1102 = vector.extract_strided_slice %1101 {offsets = [0, 128], sizes = [8, 128], strides = [1, 1]} : vector<8x256xf32> to vector<8x128xf32>
    %cst_304 = arith.constant dense<0.000000e+00> : vector<8x128xf32>
    %1103 = tpu.matmul %1058, %594, %cst_304 {dimension_numbers = #tpu.dot_dimension_numbers<[1], [0], [0], [1], [0, 0, 1, 1], [], []>} : vector<8x32xf32>, vector<32x128xf32>, vector<8x128xf32> -> vector<8x128xf32>
    %1104 = arith.addf %1098, %1103 : vector<8x128xf32>
    %1105 = vector.extract_strided_slice %1104 {offsets = [0, 0], sizes = [8, 32], strides = [1, 1]} : vector<8x128xf32> to vector<8x32xf32>
    %1106 = arith.negf %1105 : vector<8x32xf32>
    %1107 = math.exp %1106 : vector<8x32xf32>
    %cst_305 = arith.constant 1.000000e+00 : f32
    %1108 = vector.broadcast %cst_305 : f32 to vector<8x32xf32>
    %1109 = arith.addf %1108, %1107 : vector<8x32xf32>
    %1110 = arith.divf %1108, %1109 : vector<8x32xf32>
    %1111 = vector.extract_strided_slice %1104 {offsets = [0, 32], sizes = [8, 32], strides = [1, 1]} : vector<8x128xf32> to vector<8x32xf32>
    %1112 = arith.negf %1111 : vector<8x32xf32>
    %1113 = math.exp %1112 : vector<8x32xf32>
    %cst_306 = arith.constant 1.000000e+00 : f32
    %1114 = vector.broadcast %cst_306 : f32 to vector<8x32xf32>
    %1115 = arith.addf %1114, %1113 : vector<8x32xf32>
    %1116 = arith.divf %1114, %1115 : vector<8x32xf32>
    %1117 = vector.extract_strided_slice %1104 {offsets = [0, 64], sizes = [8, 32], strides = [1, 1]} : vector<8x128xf32> to vector<8x32xf32>
    %1118 = math.tanh %1117 : vector<8x32xf32>
    %1119 = vector.extract_strided_slice %1104 {offsets = [0, 96], sizes = [8, 32], strides = [1, 1]} : vector<8x128xf32> to vector<8x32xf32>
    %1120 = arith.negf %1119 : vector<8x32xf32>
    %1121 = math.exp %1120 : vector<8x32xf32>
    %cst_307 = arith.constant 1.000000e+00 : f32
    %1122 = vector.broadcast %cst_307 : f32 to vector<8x32xf32>
    %1123 = arith.addf %1122, %1121 : vector<8x32xf32>
    %1124 = arith.divf %1122, %1123 : vector<8x32xf32>
    %1125 = arith.mulf %1116, %1056 : vector<8x32xf32>
    %1126 = arith.mulf %1110, %1118 : vector<8x32xf32>
    %1127 = arith.addf %1125, %1126 : vector<8x32xf32>
    %1128 = math.tanh %1127 : vector<8x32xf32>
    %1129 = arith.mulf %1124, %1128 : vector<8x32xf32>
    %cst_308 = arith.constant dense<0.000000e+00> : vector<8x128xf32>
    %1130 = tpu.matmul %1085, %595, %cst_308 {dimension_numbers = #tpu.dot_dimension_numbers<[1], [0], [0], [1], [0, 0, 1, 1], [], []>} : vector<8x32xf32>, vector<32x128xf32>, vector<8x128xf32> -> vector<8x128xf32>
    %1131 = arith.addf %1102, %1130 : vector<8x128xf32>
    %1132 = vector.extract_strided_slice %1131 {offsets = [0, 0], sizes = [8, 32], strides = [1, 1]} : vector<8x128xf32> to vector<8x32xf32>
    %1133 = arith.negf %1132 : vector<8x32xf32>
    %1134 = math.exp %1133 : vector<8x32xf32>
    %cst_309 = arith.constant 1.000000e+00 : f32
    %1135 = vector.broadcast %cst_309 : f32 to vector<8x32xf32>
    %1136 = arith.addf %1135, %1134 : vector<8x32xf32>
    %1137 = arith.divf %1135, %1136 : vector<8x32xf32>
    %1138 = vector.extract_strided_slice %1131 {offsets = [0, 32], sizes = [8, 32], strides = [1, 1]} : vector<8x128xf32> to vector<8x32xf32>
    %1139 = arith.negf %1138 : vector<8x32xf32>
    %1140 = math.exp %1139 : vector<8x32xf32>
    %cst_310 = arith.constant 1.000000e+00 : f32
    %1141 = vector.broadcast %cst_310 : f32 to vector<8x32xf32>
    %1142 = arith.addf %1141, %1140 : vector<8x32xf32>
    %1143 = arith.divf %1141, %1142 : vector<8x32xf32>
    %1144 = vector.extract_strided_slice %1131 {offsets = [0, 64], sizes = [8, 32], strides = [1, 1]} : vector<8x128xf32> to vector<8x32xf32>
    %1145 = math.tanh %1144 : vector<8x32xf32>
    %1146 = vector.extract_strided_slice %1131 {offsets = [0, 96], sizes = [8, 32], strides = [1, 1]} : vector<8x128xf32> to vector<8x32xf32>
    %1147 = arith.negf %1146 : vector<8x32xf32>
    %1148 = math.exp %1147 : vector<8x32xf32>
    %cst_311 = arith.constant 1.000000e+00 : f32
    %1149 = vector.broadcast %cst_311 : f32 to vector<8x32xf32>
    %1150 = arith.addf %1149, %1148 : vector<8x32xf32>
    %1151 = arith.divf %1149, %1150 : vector<8x32xf32>
    %1152 = arith.mulf %1143, %1083 : vector<8x32xf32>
    %1153 = arith.mulf %1137, %1145 : vector<8x32xf32>
    %1154 = arith.addf %1152, %1153 : vector<8x32xf32>
    %1155 = math.tanh %1154 : vector<8x32xf32>
    %1156 = arith.mulf %1151, %1155 : vector<8x32xf32>
    %1157 = arith.index_cast %c7_i32_298 : i32 to index
    %c0_312 = arith.constant 0 : index
    %c0_313 = arith.constant 0 : index
    %1158 = vector.load %arg16[%1157, %c0_312, %c0_313] : memref<8x8x32xf32, #tpu.memory_space<vmem>>, vector<1x8x32xf32>
    %1159 = vector.shape_cast %1158 : vector<1x8x32xf32> to vector<8x32xf32>
    %1160 = vector.shape_cast %1129 : vector<8x32xf32> to vector<1x8x32xf32>
    tpu.vector_store %arg16[%1157, %c0_312, %c0_313], %1160 {strides = array<i32>} : memref<8x8x32xf32, #tpu.memory_space<vmem>>, vector<1x8x32xf32>,
    %1161 = arith.index_cast %1094 : i32 to index
    %c0_314 = arith.constant 0 : index
    %c0_315 = arith.constant 0 : index
    %1162 = vector.load %arg17[%1161, %c0_314, %c0_315] : memref<8x8x32xf32, #tpu.memory_space<vmem>>, vector<1x8x32xf32>
    %1163 = vector.shape_cast %1162 : vector<1x8x32xf32> to vector<8x32xf32>
    %1164 = vector.shape_cast %1156 : vector<8x32xf32> to vector<1x8x32xf32>
    tpu.vector_store %arg17[%1161, %c0_314, %c0_315], %1164 {strides = array<i32>} : memref<8x8x32xf32, #tpu.memory_space<vmem>>, vector<1x8x32xf32>,
    %c8_i32_316 = arith.constant 8 : i32
    %c0_317 = arith.constant 0 : index
    %c0_318 = arith.constant 0 : index
    %c0_319 = arith.constant 0 : index
    %1165 = vector.load %arg16[%c0_317, %c0_318, %c0_319] : memref<8x8x32xf32, #tpu.memory_space<vmem>>, vector<8x8x32xf32>
    %1166 = vector.shape_cast %1165 : vector<8x8x32xf32> to vector<64x32xf32>
    %c0_320 = arith.constant 0 : index
    %c0_321 = arith.constant 0 : index
    %1167 = vector.load %arg10[%c0_320, %c0_321] : memref<32x128xf32, #tpu.memory_space<vmem>>, vector<32x128xf32>
    %cst_322 = arith.constant dense<0.000000e+00> : vector<64x128xf32>
    %1168 = tpu.matmul %1166, %1167, %cst_322 {dimension_numbers = #tpu.dot_dimension_numbers<[1], [0], [0], [1], [0, 0, 1, 1], [], []>} : vector<64x32xf32>, vector<32x128xf32>, vector<64x128xf32> -> vector<64x128xf32>
    %c0_323 = arith.constant 0 : index
    %c0_324 = arith.constant 0 : index
    %c0_325 = arith.constant 0 : index
    %1169 = vector.load %arg17[%c0_323, %c0_324, %c0_325] : memref<8x8x32xf32, #tpu.memory_space<vmem>>, vector<8x8x32xf32>
    %1170 = vector.shape_cast %1169 : vector<8x8x32xf32> to vector<64x32xf32>
    %c0_326 = arith.constant 0 : index
    %c0_327 = arith.constant 0 : index
    %1171 = vector.load %arg11[%c0_326, %c0_327] : memref<32x128xf32, #tpu.memory_space<vmem>>, vector<32x128xf32>
    %cst_328 = arith.constant dense<0.000000e+00> : vector<64x128xf32>
    %1172 = tpu.matmul %1170, %1171, %cst_328 {dimension_numbers = #tpu.dot_dimension_numbers<[1], [0], [0], [1], [0, 0, 1, 1], [], []>} : vector<64x32xf32>, vector<32x128xf32>, vector<64x128xf32> -> vector<64x128xf32>
    %1173 = arith.addf %1168, %1172 : vector<64x128xf32>
    %c0_329 = arith.constant 0 : index
    %c0_330 = arith.constant 0 : index
    %1174 = vector.load %arg12[%c0_329, %c0_330] : memref<1x128xf32, #tpu.memory_space<vmem>>, vector<1x128xf32>
    %1175 = vector.broadcast %1174 : vector<1x128xf32> to vector<64x128xf32>
    %1176 = arith.addf %1173, %1175 : vector<64x128xf32>
    %c0_331 = arith.constant 0 : index
    %c0_332 = arith.constant 0 : index
    %1177 = vector.load %arg13[%c0_331, %c0_332] : memref<64x128xf32, #tpu.memory_space<vmem>>, vector<64x128xf32>
    tpu.vector_store %arg13[%c0_331, %c0_332], %1176 {strides = array<i32>} : memref<64x128xf32, #tpu.memory_space<vmem>>, vector<64x128xf32>,
    return
  }
}

</mosaic_0001>

<bundles_post_ra>
// kernel: tpu_custom_call.1
= control target key start
LH: loop header
LB: loop body
LE: loop exit
PB: predicated region body
PF: predicated region fallthrough
CT: control target
= control target key end

     0   :  { %18 = vsyncpa [#allocation8], 0  ;;  %s4462_s0 = inlined_call_operand.hbm [shape: f32[8,8,32], index: 0, kind: input, shape index: {}]   ;;  %s4463_s1 = inlined_call_operand.hbm [shape: f32[32,256], index: 1, kind: input, shape index: {}]   ;;  %s4464_s2 = inlined_call_operand.hbm [shape: f32[32,128], index: 2, kind: input, shape index: {}]   ;;  %s4465_s3 = inlined_call_operand.hbm [shape: f32[32,128], index: 3, kind: input, shape index: {}]   ;;  %s4466_s4 = inlined_call_operand.vmem [shape: f32[1,256], index: 4, kind: input, shape index: {}]   ;;  %s4467_s5 = inlined_call_operand.hbm [shape: f32[32,256], index: 5, kind: input, shape index: {}]   ;;  %s4468_s6 = inlined_call_operand.hbm [shape: f32[32,256], index: 6, kind: input, shape index: {}]   ;;  %s4469_s7 = inlined_call_operand.hbm [shape: f32[32,128], index: 7, kind: input, shape index: {}]   ;;  %s4470_s8 = inlined_call_operand.hbm [shape: f32[32,128], index: 8, kind: input, shape index: {}]   ;;  %s4471_s9 = inlined_call_operand.vmem [shape: f32[1,256], index: 9, kind: input, shape index: {}]   ;;  %s4472_s10 = inlined_call_operand.hbm [shape: f32[32,128], index: 10, kind: input, shape index: {}]   ;;  %s4473_s11 = inlined_call_operand.hbm [shape: f32[32,128], index: 11, kind: input, shape index: {}]   ;;  %s4474_s12 = inlined_call_operand.vmem [shape: f32[1,128], index: 12, kind: input, shape index: {}]   ;;  %s4475_s13 = inlined_call_operand.hbm [shape: f32[64,128], index: 13, kind: output, shape index: {}]  }
   0x1   :  { %19 = vsyncpa [#allocation11], 0 }
   0x2   :  { %20 = vsyncpa [#allocation14], 0 }
   0x3   :  { %21 = vsyncpa [#allocation17], 0 }
   0x4   :  { %22 = vsyncpa [#allocation20], 0 }
   0x5   :  { %23 = vsyncpa [#allocation23], 0  ;;  %s42_s27 = sshll.u32 %s4463_s1, 4  ;;  %s43_s27 = int_to_ptr.hbm [resolvable:$true] %s42_s27 }
   0x6   :  { %24 = vsyncpa [#allocation9], 0  ;;  %s3672_s28 = smov [#allocation10]   ;;  %s3673_s30 = smov 256  }
   0x7   :  { %s44_s29 = sshll.u32 %s3672_s28, 4  ;;  %s3674_s14 = smov 16   ;;  %s45_s29 = int_to_ptr.vmem [resolvable:$true] %s44_s29 }
   0x8   :  { %50 = dma.hbm_to_vmem [thread:$0]  %s43_s27, 1024, %s45_s29, [#allocation11], %s3673_s30, %s3673_s30, %s3674_s14  }
   0x9   :  { %s68_s17 = sshll.u32 %s4465_s3, 4  ;;  %s3675_s18 = smov [#allocation13]   ;;  %s69_s17 = int_to_ptr.hbm [resolvable:$true] %s68_s17 }
   0xa   :  { %s70_s19 = sshll.u32 %s3675_s18, 4  ;;  %s96_s21 = sshll.u32 %s4468_s6, 4  ;;  %s71_s19 = int_to_ptr.vmem [resolvable:$true] %s70_s19  ;;  %s97_s21 = int_to_ptr.hbm [resolvable:$true] %s96_s21 }
   0xb   :  { %s3676_s22 = smov 128   ;;  %s3677_s23 = smov 8  }
   0xc   :  { %76 = dma.hbm_to_vmem [thread:$0]  %s69_s17, 512, %s71_s19, [#allocation14], %s3676_s22, %s3676_s22, %s3677_s23  }
   0xd   :  { %s122_s26 = sshll.u32 %s4470_s8, 4  ;;  %s3678_s3 = smov [#allocation16]   ;;  %s123_s26 = int_to_ptr.hbm [resolvable:$true] %s122_s26 }
   0xe   :  { %s98_s27 = sshll.u32 %s3678_s3, 4  ;;  %s3679_s6 = smov [#allocation19]   ;;  %s99_s27 = int_to_ptr.vmem [resolvable:$true] %s98_s27 }
   0xf   :  { %104 = dma.hbm_to_vmem [thread:$0]  %s97_s21, 1024, %s99_s27, [#allocation17], %s3673_s30, %s3673_s30, %s3674_s14  }
  0x10   :  { %s124_s28 = sshll.u32 %s3679_s6, 4  ;;  %s29_s16 = sshll.u32 %s4462_s0, 4  ;;  %s125_s28 = int_to_ptr.vmem [resolvable:$true] %s124_s28  ;;  %s30_s16 = int_to_ptr.hbm [resolvable:$true] %s29_s16 }
  0x11   :  { %130 = dma.hbm_to_vmem [thread:$0]  %s123_s26, 512, %s125_s28, [#allocation20], %s3676_s22, %s3676_s22, %s3677_s23  }
  0x12   :  { %s55_s18 = sshll.u32 %s4464_s2, 4  ;;  %s3680_s19 = smov [#allocation7]   ;;  %s56_s18 = int_to_ptr.hbm [resolvable:$true] %s55_s18 }
  0x13   :  { %s31_s20 = sshll.u32 %s3680_s19, 4  ;;  %s3681_s1 = smov [#allocation12]   ;;  %s32_s20 = int_to_ptr.vmem [resolvable:$true] %s31_s20 }
  0x14   :  { %37 = dma.hbm_to_vmem [thread:$0]  %s30_s16, 1024, %s32_s20, [#allocation8], %s3676_s22, %s3676_s22, %s3677_s23  }
  0x15   :  { %s57_s0 = sshll.u32 %s3681_s1, 4  ;;  %s83_s25 = sshll.u32 %s4467_s5, 4  ;;  %s58_s0 = int_to_ptr.vmem [resolvable:$true] %s57_s0  ;;  %s84_s25 = int_to_ptr.hbm [resolvable:$true] %s83_s25 }
  0x16   :  { %63 = dma.hbm_to_vmem [thread:$0]  %s56_s18, 512, %s58_s0, [#allocation11], %s3676_s22, %s3676_s22, %s3677_s23  }
  0x17   :  { %s109_s3 = sshll.u32 %s4469_s7, 4  ;;  %s3682_s27 = smov [#allocation15]   ;;  %s110_s3 = int_to_ptr.hbm [resolvable:$true] %s109_s3 }
  0x18   :  { %s85_s6 = sshll.u32 %s3682_s27, 4  ;;  %s3683_s28 = smov [#allocation18]   ;;  %s86_s6 = int_to_ptr.vmem [resolvable:$true] %s85_s6 }
  0x19   :  { %91 = dma.hbm_to_vmem [thread:$0]  %s84_s25, 1024, %s86_s6, [#allocation14], %s3673_s30, %s3673_s30, %s3674_s14  }
  0x1a   :  { %s111_s5 = sshll.u32 %s3683_s28, 4  ;;  %s137_s16 = sshll.u32 %s4472_s10, 4  ;;  %s112_s5 = int_to_ptr.vmem [resolvable:$true] %s111_s5  ;;  %s138_s16 = int_to_ptr.hbm [resolvable:$true] %s137_s16 }
  0x1b   :  { %117 = dma.hbm_to_vmem [thread:$0]  %s110_s3, 512, %s112_s5, [#allocation17], %s3676_s22, %s3676_s22, %s3677_s23  }
  0x1c   :  { %s150_s17 = sshll.u32 %s4473_s11, 4  ;;  %s3684_s18 = smov [#allocation21]   ;;  %s151_s17 = int_to_ptr.hbm [resolvable:$true] %s150_s17 }
  0x1d   :  { %s139_s19 = sshll.u32 %s3684_s18, 4  ;;  %s3685_s30 = smov [#allocation22]   ;;  %s140_s19 = int_to_ptr.vmem [resolvable:$true] %s139_s19 }
  0x1e   :  { %145 = dma.hbm_to_vmem [thread:$0]  %s138_s16, 512, %s140_s19, [#allocation20], %s3676_s22, %s3676_s22, %s3677_s23  }
  0x1f   :  { %s152_s10 = sshll.u32 %s3685_s30, 4  ;;  %s153_s10 = int_to_ptr.vmem [resolvable:$true] %s152_s10 }
  0x20   :  { %158 = dma.hbm_to_vmem [thread:$0]  %s151_s17, 512, %s153_s10, [#allocation23], %s3676_s22, %s3676_s22, %s3677_s23  }
  0x21   :  { %3658 = dma.done.wait [#allocation8], 1024  }
  0x22   :  { %3659 = vsyncadd [#allocation8], 4294966272 }
  0x23   :  { %3660 = dma.done.wait [#allocation11], 1536  }
  0x24   :  { %3661 = vsyncadd [#allocation11], 4294965760 }
  0x25   :  { %3662 = dma.done.wait [#allocation14], 1536  }
  0x26   :  { %3663 = vsyncadd [#allocation14], 4294965760 }
  0x27   :  { %3664 = dma.done.wait [#allocation17], 1536  }
  0x28   :  { %3665 = vsyncadd [#allocation17], 4294965760 }
  0x29   :  { %3666 = dma.done.wait [#allocation20], 1024  }
  0x2a   :  { %3667 = vsyncadd [#allocation20], 4294966272 }
  0x2b   :  { %3668 = dma.done.wait [#allocation23], 512  }
  0x2c   :  { %3669 = vsyncadd [#allocation23], 4294966784  ;;  %v215_v0 = vld [vmem:[#allocation10 + $0x30] sm:$0xff]  ;;  %v216_v1 = vld [vmem:[#allocation10 + $0x38] sm:$0xff]  ;;  %vm223_vm0 = vcmask 261120   ;;  %v3686_v21 = vmov 0.0  }
  0x2d   :  { %v213_v2 = vld [vmem:[#allocation10 + $0x20] sm:$0xff]  ;;  %3108 = vmatpush.msra.mxu2 %v215_v0  ;;  %3112 = vmatpush.msra.mxu3 %v216_v1  ;;  %v214_v3 = vld [vmem:[#allocation10 + $0x28] sm:$0xff]  ;;  %v211_v4 = vld [vmem:[#allocation10 + $0x10] sm:$0xff]  ;;  %s3688_s20 = smov 32   ;;  %s2966_s26 = sshll.u32 %s4475_s13, 4  ;;  %s2967_s26 = int_to_ptr.hbm [resolvable:$true] %s2966_s26 }
  0x2e   :  { %v212_v5 = vld [vmem:[#allocation10 + $0x18] sm:$0xff]  ;;  %260 = vmatpush.msra.mxu0 %v215_v0  ;;  %301 = vmatpush.msra.mxu1 %v216_v1  ;;  %v209_v6 = vld [vmem:[#allocation10] sm:$0xff]  ;;  %v210_v7 = vld [vmem:[#allocation10 + $0x8] sm:$0xff] }
  0x2f   :  { %3109 = vmatpush.msra.mxu2 %v213_v2  ;;  %3113 = vmatpush.msra.mxu3 %v214_v3  ;;  %v205_v8 = vld [vmem:[#allocation7 + $0x20] sm:$0xff]  ;;  %v3820_v9 = vld [vmem:[#allocation13 + $0x18] sm:$0xff]  ;;  %v3826_v11 = vld [vmem:[#allocation13 + $0x10] sm:$0xff] }
  0x30   :  { %261 = vmatpush.msra.mxu0 %v213_v2  ;;  %302 = vmatpush.msra.mxu1 %v214_v3  ;;  %v3822_v10 = vld [vmem:[#allocation12 + $0x18] sm:$0xff]  ;;  %v3828_v12 = vld [vmem:[#allocation12 + $0x10] sm:$0xff]  ;;  %v201_v13 = vld [vmem:[#allocation7] sm:$0xff] }
  0x31   :  { %3110 = vmatpush.msra.mxu2 %v211_v4  ;;  %3114 = vmatpush.msra.mxu3 %v212_v5  ;;  %v3832_v14 = vld [vmem:[#allocation13 + $0x8] sm:$0xff]  ;;  %v3838_v16 = vld [vmem:[#allocation13] sm:$0xff]  ;;  %v207_v19 = vld [vmem:[#allocation7 + $0x30] sm:$0xff] }
  0x32   :  { %262 = vmatpush.msra.mxu0 %v211_v4  ;;  %303 = vmatpush.msra.mxu1 %v212_v5  ;;  %v3834_v15 = vld [vmem:[#allocation12 + $0x8] sm:$0xff]  ;;  %v3840_v17 = vld [vmem:[#allocation12] sm:$0xff]  ;;  %v208_v20 = vld [vmem:[#allocation7 + $0x38] sm:$0xff] }
  0x33   :  { %3111 = vmatpush.msra.mxu2 %v209_v6  ;;  %3115 = vmatpush.msra.mxu3 %v210_v7  ;;  %v206_v18 = vld [vmem:[#allocation7 + $0x28] sm:$0xff]  ;;  %v217_v28 = vld [vmem:[%s4466_s4] sm:$0x3]  ;;  %s3687_s4 = smov 64  }
  0x34   :  { %2988 = vmatmul.msk.f32.vlgmr.msra.gmra.mxu2 %vm223_vm0, %v205_v8  ;;  %2996 = vmatmul.msk.f32.vlgmr.msra.gmra.mxu3 %vm223_vm0, %v205_v8  ;;  %v3889_v31 = vperm.slane %v217_v28, 0  ;;  %v3891_v33 = vperm.slane %v217_v28, 1 }
  0x35   :  { %430 = vmatpush.msrb.mxu3 %v3820_v9  ;;  %372 = vmatpush.msrb.mxu2 %v3822_v10 }
  0x36   :  { %263 = vmatpush.msra.mxu0 %v209_v6  ;;  %304 = vmatpush.msra.mxu1 %v210_v7 }
  0x37   :  { %431 = vmatpush.msrb.mxu3 %v3826_v11  ;;  %373 = vmatpush.msrb.mxu2 %v3828_v12 }
  0x38   :  { %2984 = vmatmul.msk.f32.vlgmr.msra.gmra.mxu0 %vm223_vm0, %v201_v13  ;;  %2992 = vmatmul.msk.f32.vlgmr.msra.gmra.mxu1 %vm223_vm0, %v201_v13 }
  0x39   :  { %432 = vmatpush.msrb.mxu3 %v3832_v14  ;;  %374 = vmatpush.msrb.mxu2 %v3834_v15 }
  0x3b   :  { %433 = vmatpush.msrb.mxu3 %v3838_v16  ;;  %375 = vmatpush.msrb.mxu2 %v3840_v17 }
  0x3c   :  { %2989 = vmatmul.msk.f32.gmra.mxu2 %vm223_vm0, %v206_v18  ;;  %2997 = vmatmul.msk.f32.gmra.mxu3 %vm223_vm0, %v206_v18 }
  0x3d   :  { %565 = vmatpush.msra.mxu3 %v3820_v9  ;;  %505 = vmatpush.msra.mxu2 %v3822_v10 }
  0x3f   :  { %566 = vmatpush.msra.mxu3 %v3826_v11  ;;  %506 = vmatpush.msra.mxu2 %v3828_v12 }
  0x41   :  { %567 = vmatpush.msra.mxu3 %v3832_v14  ;;  %507 = vmatpush.msra.mxu2 %v3834_v15 }
  0x43   :  { %568 = vmatpush.msra.mxu3 %v3838_v16  ;;  %508 = vmatpush.msra.mxu2 %v3840_v17 }
  0x44   :  { %2990 = vmatmul.msk.f32.gmra.mxu2 %vm223_vm0, %v207_v19  ;;  %2998 = vmatmul.msk.f32.gmra.mxu3 %vm223_vm0, %v207_v19 }
  0x4c   :  { %2991 = vmatmul.msk.f32.gmra.mxu2 %vm223_vm0, %v208_v20  ;;  %2999 = vmatmul.msk.f32.gmra.mxu3 %vm223_vm0, %v208_v20 }
  0x54   :  { %376 = vmatmul.f32.vlgmr.msrb.gmra.mxu2 %v3686_v21  ;;  %434 = vmatmul.f32.vlgmr.msrb.gmra.mxu3 %v3686_v21 }
  0x55   :  { %701 = vmatpush.msrb.mxu3 %v3820_v9  ;;  %641 = vmatpush.msrb.mxu2 %v3822_v10 }
  0x57   :  { %702 = vmatpush.msrb.mxu3 %v3826_v11  ;;  %642 = vmatpush.msrb.mxu2 %v3828_v12 }
  0x59   :  { %703 = vmatpush.msrb.mxu3 %v3832_v14  ;;  %643 = vmatpush.msrb.mxu2 %v3834_v15 }
  0x5b   :  { %704 = vmatpush.msrb.mxu3 %v3838_v16  ;;  %644 = vmatpush.msrb.mxu2 %v3840_v17 }
  0xb5   :  { %v265_v32 = vpop.f32.mrf.mxu0 }
  0xb6   :  { %v266_v34 = vadd.f32 %v265_v32, %v3889_v31 }
  0xb7   :  { %v3872_v22 = vpop.f32.mrf.mxu2  ;;  %v3874_v23 = vpop.f32.mrf.mxu3 }
  0xbf   :  { %v3876_v24 = vpop.f32.mrf.mxu2  ;;  %v3878_v25 = vpop.f32.mrf.mxu3 }
  0xc7   :  { %v3880_v26 = vpop.f32.mrf.mxu2  ;;  %v3882_v27 = vpop.f32.mrf.mxu3 }
  0xcf   :  { %v3887_v29 = vpop.f32.mrf.mxu2  ;;  %v327_v30 = vpop.f32.mrf.mxu3 }
  0xd0   :  { %v328_v35 = vadd.f32 %v327_v30, %v3891_v33 }
  0xd7   :  { %v377_v36 = vpop.f32.mrf.mxu2  ;;  %v435_v37 = vpop.f32.mrf.mxu3 }
  0xd8   :  { %v380_v38 = vadd.f32 %v377_v36, %v266_v34  ;;  %v438_v39 = vadd.f32 %v435_v37, %v328_v35 }
  0xda   :  { %3135 = vtanh.f32 %v380_v38  ;;  %v3000_v42 = vmul.f32 -1.442695, %v380_v38  ;;  %v3001_v43 = vmul.f32 -1.442695, %v438_v39  ;;  %v202_v38 = vld [vmem:[#allocation7 + $0x8] sm:$0xff] }
  0xdb   :  { %3137 = vtanh.f32 %v438_v39  ;;  %2985 = vmatmul.msk.f32.gmra.mxu0 %vm223_vm0, %v202_v38  ;;  %2993 = vmatmul.msk.f32.gmra.mxu1 %vm223_vm0, %v202_v38 }
  0xdc   :  { %3139 = vpow2.f32 %v3000_v42 }
  0xdd   :  { %3141 = vpow2.f32 %v3001_v43  ;;  %v325_v43 = vadd.f32 %v3882_v27, %v3891_v33 }
  0xe0   :  { %v3136_v40 = vpop.eup %3135 }
  0xe1   :  { %v3138_v41 = vpop.eup %3137  ;;  %403 = vrot.lane.b32.xlu1 %v3136_v40, %s3687_s4 }
  0xe2   :  { %461 = vrot.lane.b32.xlu0 %v3138_v41, %s3687_s4  ;;  %v3140_v44 = vpop.eup %3139 }
  0xe3   :  { %v3142_v45 = vpop.eup %3141  ;;  %v384_v46 = vadd.f32 1.0, %v3140_v44 }
  0xe4   :  { %v442_v47 = vadd.f32 1.0, %v3142_v45 }
  0xe5   :  { %3143 = vrcp.f32 %v384_v46  ;;  %vm390_vm1 = vweird.f32 %v384_v46  ;;  %v396_v56 = vand.u32 2147483648, %v384_v46  ;;  %v394_v58 = vand.u32 2147483647, %v384_v46 }
  0xe6   :  { %3145 = vrcp.f32 %v442_v47  ;;  %v454_v60 = vand.u32 2147483648, %v442_v47  ;;  %vm448_vm5 = vweird.f32 %v442_v47  ;;  %v452_v61 = vand.u32 2147483647, %v442_v47 }
  0xe7   :  { %v397_v62 = vor.u32 1.1754944e-38, %v396_v56  ;;  %vm395_vm7 = vcmp.eq.f32.partialorder %v394_v58, 8.507059e+37 }
  0xe8   :  { %v455_v1 = vor.u32 1.1754944e-38, %v454_v60  ;;  %vm453_vm8 = vcmp.eq.f32.partialorder %v452_v61, 8.507059e+37 }
  0xeb   :  { %v3144_v48 = vpop.eup %3143 }
  0xec   :  { %v3146_v49 = vpop.eup %3145  ;;  %v386_v50 = vmul.f32 %v3144_v48, %v384_v46  ;;  %vm391_vm2 = vweird.f32 %v3144_v48 }
  0xed   :  { %v444_v51 = vmul.f32 %v3146_v49, %v442_v47  ;;  %vm449_vm3 = vweird.f32 %v3146_v49  ;;  %vm392_vm4 = vmor %vm390_vm1, %vm391_vm2 }
  0xee   :  { %v387_v52 = vsub.f32 1.0, %v386_v50  ;;  %vm450_vm6 = vmor %vm448_vm5, %vm449_vm3 }
  0xef   :  { %v445_v53 = vsub.f32 1.0, %v444_v51 }
  0xf0   :  { %v388_v54 = vmul.f32 %v3144_v48, %v387_v52 }
  0xf1   :  { %v446_v55 = vmul.f32 %v3146_v49, %v445_v53 }
  0xf2   :  { %v389_v57 = vadd.f32 %v3144_v48, %v388_v54 }
  0xf3   :  { %v447_v59 = vadd.f32 %v3146_v49, %v446_v55 }
  0xf4   :  { %v393_v63 = vsel %vm392_vm4, %v3144_v48, %v389_v57 }
  0xf5   :  { %v451_v0 = vsel %vm450_vm6, %v3146_v49, %v447_v59  ;;  %v398_v3 = vsel %vm395_vm7, %v397_v62, %v393_v63 }
  0xf6   :  { %v456_v5 = vsel %vm453_vm8, %v455_v1, %v451_v0  ;;  %v401_v8 = vmul.f32 0.0, %v398_v3 }
  0xf7   :  { %v459_v20 = vmul.f32 0.0, %v456_v5 }
 0x153   :  { %v404_v2 = vpop.permute.xlu1 %403 }
 0x154   :  { %v462_v4 = vpop.permute.xlu0 %461  ;;  %v406_v6 = vmul.f32 %v404_v2, %v398_v3 }
 0x155   :  { %v464_v7 = vmul.f32 %v462_v4, %v456_v5 }
 0x156   :  { %408 = vrot.lane.b32.xlu2 %v406_v6, %s3688_s20 }
 0x157   :  { %466 = vrot.lane.b32.xlu0 %v464_v7, %s3688_s20 }
 0x158   :  { %v268_v41 = vpop.f32.mrf.mxu0 }
 0x159   :  { %v269_v42 = vadd.f32 %v268_v41, %v3889_v31 }
 0x1b0   :  { %v409_v13 = vpop.permute.xlu2 %408 }
 0x1b1   :  { %v3899_v18 = vadd.f32 %v409_v13, %v401_v8 }
 0x1b3   :  { %3147 = vtanh.f32 %v3899_v18 }
 0x1b9   :  { %v3148_v19 = vpop.eup %3147 }
 0x1ba   :  { %414 = vrot.lane.b32.xlu0 %v3148_v19, %s3687_s4 }
 0x1c9   :  { %v467_v28 = vpop.permute.xlu0 %466 }
 0x1ca   :  { %v3903_v30 = vadd.f32 %v467_v28, %v459_v20 }
 0x1cc   :  { %3149 = vtanh.f32 %v3903_v30 }
 0x1d2   :  { %v3150_v32 = vpop.eup %3149 }
 0x1d3   :  { %472 = vrot.lane.b32.xlu1 %v3150_v32, %s3687_s4 }
 0x22c   :  { %v415_v34 = vpop.permute.xlu0 %414 }
 0x22d   :  { %v417_v35 = vmul.f32 %v415_v34, %v398_v3 }
 0x22f   :  { %477 = vrot.lane.b32.xlu1 %v417_v35, %s3688_s20 }
 0x245   :  { %v473_v36 = vpop.permute.xlu1 %472 }
 0x246   :  { %v475_v37 = vmul.f32 %v473_v36, %v456_v5 }
 0x248   :  { %482 = vrot.lane.b32.xlu2 %v475_v37, %s3688_s20 }
 0x2a1   :  { %v478_v39 = vpop.permute.xlu1 %477 }
 0x2a2   :  { %v483_v40 = vpop.permute.xlu2 %482  ;;  %480 = vst.msk [vmem:[#allocation2] sm:$0xff] %vm223_vm0, %v478_v39  ;;  %3002 = vmatmul.msk.f32.vlgmr.msra.gmra.mxu2 %vm223_vm0, %v478_v39 }
 0x2a3   :  { %486 = vst.msk [vmem:[#allocation3 + $0x38] sm:$0xff] %vm223_vm0, %v483_v40  ;;  %3004 = vmatmul.msk.f32.vlgmr.msra.gmra.mxu3 %vm223_vm0, %v483_v40  ;;  %777 = vmatpush.msra.mxu2 %v3822_v10 }
 0x2a4   :  { %837 = vmatpush.msra.mxu3 %v3820_v9 }
 0x2a5   :  { %778 = vmatpush.msra.mxu2 %v3828_v12 }
 0x2a6   :  { %838 = vmatpush.msra.mxu3 %v3826_v11 }
 0x2a7   :  { %779 = vmatpush.msra.mxu2 %v3834_v15 }
 0x2a8   :  { %839 = vmatpush.msra.mxu3 %v3832_v14 }
 0x2a9   :  { %780 = vmatpush.msra.mxu2 %v3840_v17 }
 0x2aa   :  { %840 = vmatpush.msra.mxu3 %v3838_v16 }
 0x325   :  { %v510_v44 = vpop.f32.mrf.mxu2 }
 0x326   :  { %v513_v45 = vadd.f32 %v510_v44, %v269_v42  ;;  %v570_v46 = vpop.f32.mrf.mxu3 }
 0x327   :  { %v573_v47 = vadd.f32 %v570_v46, %v325_v43  ;;  %v203_v46 = vld [vmem:[#allocation7 + $0x10] sm:$0xff] }
 0x328   :  { %3151 = vtanh.f32 %v513_v45  ;;  %v3003_v54 = vmul.f32 -1.442695, %v513_v45  ;;  %2986 = vmatmul.msk.f32.gmra.mxu0 %vm223_vm0, %v203_v46  ;;  %2994 = vmatmul.msk.f32.gmra.mxu1 %vm223_vm0, %v203_v46 }
 0x329   :  { %3153 = vtanh.f32 %v573_v47  ;;  %v3005_v50 = vmul.f32 -1.442695, %v573_v47 }
 0x32b   :  { %3155 = vpow2.f32 %v3005_v50 }
 0x32e   :  { %v3152_v48 = vpop.eup %3151 }
 0x32f   :  { %v3154_v49 = vpop.eup %3153  ;;  %536 = vrot.lane.b32.xlu1 %v3152_v48, %s3687_s4  ;;  %v322_v48 = vadd.f32 %v3878_v25, %v3891_v33 }
 0x330   :  { %596 = vrot.lane.b32.xlu2 %v3154_v49, %s3687_s4 }
 0x331   :  { %v3156_v51 = vpop.eup %3155 }
 0x332   :  { %v577_v52 = vadd.f32 1.0, %v3156_v51 }
 0x334   :  { %3157 = vrcp.f32 %v577_v52  ;;  %v589_v60 = vand.u32 2147483648, %v577_v52  ;;  %vm583_vm10 = vweird.f32 %v577_v52  ;;  %v587_v61 = vand.u32 2147483647, %v577_v52 }
 0x335   :  { %3159 = vpow2.f32 %v3003_v54 }
 0x336   :  { %v590_v63 = vor.u32 1.1754944e-38, %v589_v60  ;;  %vm588_vm12 = vcmp.eq.f32.partialorder %v587_v61, 8.507059e+37 }
 0x33a   :  { %v3158_v53 = vpop.eup %3157 }
 0x33b   :  { %v579_v27 = vmul.f32 %v3158_v53, %v577_v52  ;;  %v3160_v56 = vpop.eup %3159  ;;  %vm584_vm9 = vweird.f32 %v3158_v53 }
 0x33c   :  { %v517_v58 = vadd.f32 1.0, %v3160_v56  ;;  %vm585_vm11 = vmor %vm583_vm10, %vm584_vm9 }
 0x33d   :  { %v580_v55 = vsub.f32 1.0, %v579_v27 }
 0x33e   :  { %3161 = vrcp.f32 %v517_v58  ;;  %v529_v8 = vand.u32 2147483648, %v517_v58  ;;  %vm523_vm14 = vweird.f32 %v517_v58  ;;  %v527_v13 = vand.u32 2147483647, %v517_v58 }
 0x33f   :  { %v581_v57 = vmul.f32 %v3158_v53, %v580_v55 }
 0x340   :  { %v530_v20 = vor.u32 1.1754944e-38, %v529_v8  ;;  %vm528_vm1 = vcmp.eq.f32.partialorder %v527_v13, 8.507059e+37 }
 0x341   :  { %v582_v59 = vadd.f32 %v3158_v53, %v581_v57 }
 0x343   :  { %v586_v62 = vsel %vm585_vm11, %v3158_v53, %v582_v59 }
 0x344   :  { %v591_v1 = vsel %vm588_vm12, %v590_v63, %v586_v62  ;;  %v3162_v2 = vpop.eup %3161 }
 0x345   :  { %v519_v4 = vmul.f32 %v3162_v2, %v517_v58  ;;  %vm524_vm13 = vweird.f32 %v3162_v2  ;;  %v594_v35 = vmul.f32 %v591_v1, %v3903_v30 }
 0x346   :  { %vm525_vm15 = vmor %vm523_vm14, %vm524_vm13 }
 0x347   :  { %v520_v5 = vsub.f32 1.0, %v519_v4 }
 0x349   :  { %v521_v6 = vmul.f32 %v3162_v2, %v520_v5 }
 0x34b   :  { %v522_v7 = vadd.f32 %v3162_v2, %v521_v6 }
 0x34d   :  { %v526_v19 = vsel %vm525_vm15, %v3162_v2, %v522_v7 }
 0x34e   :  { %v531_v32 = vsel %vm528_vm1, %v530_v20, %v526_v19 }
 0x34f   :  { %v534_v39 = vmul.f32 %v531_v32, %v3899_v18 }
 0x38a   :  { %v597_v0 = vpop.permute.xlu2 %596 }
 0x38b   :  { %v599_v3 = vmul.f32 %v597_v0, %v591_v1 }
 0x38d   :  { %601 = vrot.lane.b32.xlu0 %v599_v3, %s3688_s20 }
 0x3a1   :  { %v537_v28 = vpop.permute.xlu1 %536 }
 0x3a2   :  { %v539_v34 = vmul.f32 %v537_v28, %v531_v32 }
 0x3a4   :  { %541 = vrot.lane.b32.xlu0 %v539_v34, %s3688_s20 }
 0x3a5   :  { %v271_v52 = vpop.f32.mrf.mxu0 }
 0x3a6   :  { %v272_v53 = vadd.f32 %v271_v52, %v3889_v31  ;;  %v204_v52 = vld [vmem:[#allocation7 + $0x18] sm:$0xff] }
 0x3a7   :  { %2987 = vmatmul.msk.f32.gmra.mxu0 %vm223_vm0, %v204_v52  ;;  %2995 = vmatmul.msk.f32.gmra.mxu1 %vm223_vm0, %v204_v52 }
 0x3ff   :  { %v602_v36 = vpop.permute.xlu0 %601 }
 0x400   :  { %v3931_v37 = vadd.f32 %v602_v36, %v594_v35 }
 0x402   :  { %3163 = vtanh.f32 %v3931_v37 }
 0x408   :  { %v3164_v38 = vpop.eup %3163 }
 0x409   :  { %607 = vrot.lane.b32.xlu2 %v3164_v38, %s3687_s4 }
 0x416   :  { %v542_v40 = vpop.permute.xlu0 %541 }
 0x417   :  { %v3936_v41 = vadd.f32 %v542_v40, %v534_v39 }
 0x419   :  { %3165 = vtanh.f32 %v3936_v41 }
 0x41f   :  { %v3166_v42 = vpop.eup %3165 }
 0x420   :  { %547 = vrot.lane.b32.xlu2 %v3166_v42, %s3687_s4 }
 0x463   :  { %v608_v43 = vpop.permute.xlu2 %607 }
 0x464   :  { %v610_v30 = vmul.f32 %v608_v43, %v591_v1 }
 0x466   :  { %618 = vrot.lane.b32.xlu1 %v610_v30, %s3688_s20 }
 0x47a   :  { %v548_v44 = vpop.permute.xlu2 %547 }
 0x47b   :  { %v550_v45 = vmul.f32 %v548_v44, %v531_v32 }
 0x47d   :  { %612 = vrot.lane.b32.xlu0 %v550_v45, %s3688_s20 }
 0x4d8   :  { %v619_v18 = vpop.permute.xlu1 %618 }
 0x4d9   :  { %622 = vst.msk [vmem:[#allocation3 + $0x30] sm:$0xff] %vm223_vm0, %v619_v18  ;;  %3008 = vmatmul.msk.f32.vlgmr.msrb.gmra.mxu3 %vm223_vm0, %v619_v18 }
 0x4da   :  { %971 = vmatpush.msrb.mxu3 %v3820_v9 }
 0x4dc   :  { %972 = vmatpush.msrb.mxu3 %v3826_v11 }
 0x4de   :  { %973 = vmatpush.msrb.mxu3 %v3832_v14 }
 0x4e0   :  { %974 = vmatpush.msrb.mxu3 %v3838_v16 }
 0x4ef   :  { %v613_v47 = vpop.permute.xlu0 %612 }
 0x4f0   :  { %616 = vst.msk [vmem:[#allocation2 + $0x8] sm:$0xff] %vm223_vm0, %v613_v47  ;;  %3006 = vmatmul.msk.f32.vlgmr.msrb.gmra.mxu2 %vm223_vm0, %v613_v47 }
 0x4f1   :  { %911 = vmatpush.msrb.mxu2 %v3822_v10 }
 0x4f3   :  { %912 = vmatpush.msrb.mxu2 %v3828_v12 }
 0x4f5   :  { %913 = vmatpush.msrb.mxu2 %v3834_v15 }
 0x4f7   :  { %914 = vmatpush.msrb.mxu2 %v3840_v17 }
 0x55c   :  { %v706_v49 = vpop.f32.mrf.mxu3 }
 0x55d   :  { %v709_v50 = vadd.f32 %v706_v49, %v322_v48 }
 0x55f   :  { %3167 = vtanh.f32 %v709_v50  ;;  %v3009_v56 = vmul.f32 -1.442695, %v709_v50 }
 0x565   :  { %v3168_v51 = vpop.eup %3167 }
 0x566   :  { %732 = vrot.lane.b32.xlu1 %v3168_v51, %s3687_s4 }
 0x573   :  { %v646_v54 = vpop.f32.mrf.mxu2 }
 0x574   :  { %v649_v27 = vadd.f32 %v646_v54, %v272_v53  ;;  %v274_v54 = vpop.f32.mrf.mxu0 }
 0x576   :  { %3169 = vtanh.f32 %v649_v27  ;;  %v3007_v59 = vmul.f32 -1.442695, %v649_v27  ;;  %v275_v27 = vadd.f32 %v274_v54, %v3889_v31 }
 0x577   :  { %3171 = vpow2.f32 %v3009_v56 }
 0x57c   :  { %v3170_v55 = vpop.eup %3169 }
 0x57d   :  { %672 = vrot.lane.b32.xlu0 %v3170_v55, %s3687_s4  ;;  %v3172_v57 = vpop.eup %3171  ;;  %v319_v55 = vadd.f32 %v3874_v23, %v3891_v33 }
 0x57e   :  { %v713_v58 = vadd.f32 1.0, %v3172_v57 }
 0x580   :  { %3173 = vrcp.f32 %v713_v58  ;;  %v725_v2 = vand.u32 2147483648, %v713_v58  ;;  %vm719_vm3 = vweird.f32 %v713_v58  ;;  %v723_v3 = vand.u32 2147483647, %v713_v58 }
 0x581   :  { %3175 = vpow2.f32 %v3007_v59 }
 0x582   :  { %v726_v5 = vor.u32 1.1754944e-38, %v725_v2  ;;  %vm724_vm5 = vcmp.eq.f32.partialorder %v723_v3, 8.507059e+37 }
 0x586   :  { %v3174_v25 = vpop.eup %3173 }
 0x587   :  { %v715_v60 = vmul.f32 %v3174_v25, %v713_v58  ;;  %v3176_v62 = vpop.eup %3175  ;;  %vm720_vm2 = vweird.f32 %v3174_v25 }
 0x588   :  { %v653_v0 = vadd.f32 1.0, %v3176_v62  ;;  %vm721_vm4 = vmor %vm719_vm3, %vm720_vm2 }
 0x589   :  { %v716_v61 = vsub.f32 1.0, %v715_v60 }
 0x58a   :  { %3177 = vrcp.f32 %v653_v0  ;;  %v665_v34 = vand.u32 2147483648, %v653_v0  ;;  %vm659_vm7 = vweird.f32 %v653_v0  ;;  %v663_v35 = vand.u32 2147483647, %v653_v0 }
 0x58b   :  { %v717_v63 = vmul.f32 %v3174_v25, %v716_v61 }
 0x58c   :  { %v666_v38 = vor.u32 1.1754944e-38, %v665_v34  ;;  %vm664_vm9 = vcmp.eq.f32.partialorder %v663_v35, 8.507059e+37 }
 0x58d   :  { %v718_v1 = vadd.f32 %v3174_v25, %v717_v63 }
 0x58f   :  { %v722_v4 = vsel %vm721_vm4, %v3174_v25, %v718_v1 }
 0x590   :  { %v727_v7 = vsel %vm724_vm5, %v726_v5, %v722_v4  ;;  %v3178_v8 = vpop.eup %3177 }
 0x591   :  { %v655_v19 = vmul.f32 %v3178_v8, %v653_v0  ;;  %vm660_vm6 = vweird.f32 %v3178_v8  ;;  %v730_v43 = vmul.f32 %v727_v7, %v3931_v37 }
 0x592   :  { %vm661_vm8 = vmor %vm659_vm7, %vm660_vm6 }
 0x593   :  { %v656_v20 = vsub.f32 1.0, %v655_v19 }
 0x595   :  { %v657_v28 = vmul.f32 %v3178_v8, %v656_v20 }
 0x597   :  { %v658_v32 = vadd.f32 %v3178_v8, %v657_v28 }
 0x599   :  { %v662_v36 = vsel %vm661_vm8, %v3178_v8, %v658_v32 }
 0x59a   :  { %v667_v40 = vsel %vm664_vm9, %v666_v38, %v662_v36 }
 0x59b   :  { %v670_v46 = vmul.f32 %v667_v40, %v3936_v41 }
 0x5d8   :  { %v733_v6 = vpop.permute.xlu1 %732 }
 0x5d9   :  { %v735_v13 = vmul.f32 %v733_v6, %v727_v7 }
 0x5db   :  { %737 = vrot.lane.b32.xlu2 %v735_v13, %s3688_s20 }
 0x5ef   :  { %v673_v39 = vpop.permute.xlu0 %672 }
 0x5f0   :  { %v675_v42 = vmul.f32 %v673_v39, %v667_v40 }
 0x5f2   :  { %677 = vrot.lane.b32.xlu2 %v675_v42, %s3688_s20 }
 0x635   :  { %v738_v30 = vpop.permute.xlu2 %737 }
 0x636   :  { %v3964_v44 = vadd.f32 %v738_v30, %v730_v43 }
 0x638   :  { %3179 = vtanh.f32 %v3964_v44 }
 0x63e   :  { %v3180_v45 = vpop.eup %3179 }
 0x63f   :  { %743 = vrot.lane.b32.xlu1 %v3180_v45, %s3687_s4 }
 0x64c   :  { %v678_v18 = vpop.permute.xlu2 %677 }
 0x64d   :  { %v3969_v47 = vadd.f32 %v678_v18, %v670_v46 }
 0x64f   :  { %3181 = vtanh.f32 %v3969_v47 }
 0x655   :  { %v3182_v48 = vpop.eup %3181 }
 0x656   :  { %683 = vrot.lane.b32.xlu1 %v3182_v48, %s3687_s4 }
 0x6b1   :  { %v744_v49 = vpop.permute.xlu1 %743 }
 0x6b2   :  { %v746_v37 = vmul.f32 %v744_v49, %v727_v7 }
 0x6b4   :  { %754 = vrot.lane.b32.xlu0 %v746_v37, %s3688_s20 }
 0x6c8   :  { %v684_v50 = vpop.permute.xlu1 %683 }
 0x6c9   :  { %v686_v51 = vmul.f32 %v684_v50, %v667_v40 }
 0x6cb   :  { %748 = vrot.lane.b32.xlu2 %v686_v51, %s3688_s20 }
 0x725   :  { %v749_v41 = vpop.permute.xlu2 %748 }
 0x726   :  { %v755_v53 = vpop.permute.xlu0 %754  ;;  %752 = vst.msk [vmem:[#allocation2 + $0x10] sm:$0xff] %vm223_vm0, %v749_v41  ;;  %3010 = vmatmul.msk.f32.vlgmr.msra.gmra.mxu2 %vm223_vm0, %v749_v41 }
 0x727   :  { %758 = vst.msk [vmem:[#allocation3 + $0x28] sm:$0xff] %vm223_vm0, %v755_v53  ;;  %3012 = vmatmul.msk.f32.vlgmr.msra.gmra.mxu3 %vm223_vm0, %v755_v53  ;;  %1045 = vmatpush.msra.mxu2 %v3822_v10 }
 0x728   :  { %1105 = vmatpush.msra.mxu3 %v3820_v9 }
 0x729   :  { %1046 = vmatpush.msra.mxu2 %v3828_v12 }
 0x72a   :  { %1106 = vmatpush.msra.mxu3 %v3826_v11 }
 0x72b   :  { %1047 = vmatpush.msra.mxu2 %v3834_v15 }
 0x72c   :  { %1107 = vmatpush.msra.mxu3 %v3832_v14 }
 0x72d   :  { %1048 = vmatpush.msra.mxu2 %v3840_v17 }
 0x72e   :  { %1108 = vmatpush.msra.mxu3 %v3838_v16 }
 0x7a9   :  { %v782_v56 = vpop.f32.mrf.mxu2 }
 0x7aa   :  { %v785_v57 = vadd.f32 %v782_v56, %v275_v27  ;;  %v842_v58 = vpop.f32.mrf.mxu3 }
 0x7ab   :  { %v845_v25 = vadd.f32 %v842_v58, %v319_v55 }
 0x7ac   :  { %3183 = vtanh.f32 %v785_v57  ;;  %v3011_v62 = vmul.f32 -1.442695, %v785_v57 }
 0x7ad   :  { %3185 = vtanh.f32 %v845_v25  ;;  %v3013_v61 = vmul.f32 -1.442695, %v845_v25 }
 0x7af   :  { %3187 = vpow2.f32 %v3013_v61 }
 0x7b0   :  { %3189 = vpow2.f32 %v3011_v62 }
 0x7b2   :  { %v3184_v59 = vpop.eup %3183 }
 0x7b3   :  { %v3186_v60 = vpop.eup %3185  ;;  %808 = vrot.lane.b32.xlu2 %v3184_v59, %s3687_s4 }
 0x7b4   :  { %868 = vrot.lane.b32.xlu0 %v3186_v60, %s3687_s4 }
 0x7b5   :  { %v3188_v63 = vpop.eup %3187 }
 0x7b6   :  { %v849_v0 = vadd.f32 1.0, %v3188_v63  ;;  %v3190_v23 = vpop.eup %3189 }
 0x7b7   :  { %v789_v1 = vadd.f32 1.0, %v3190_v23 }
 0x7b8   :  { %3191 = vrcp.f32 %v849_v0  ;;  %v861_v19 = vand.u32 2147483648, %v849_v0  ;;  %vm855_vm11 = vweird.f32 %v849_v0  ;;  %v859_v20 = vand.u32 2147483647, %v849_v0 }
 0x7b9   :  { %3193 = vrcp.f32 %v789_v1  ;;  %v801_v40 = vand.u32 2147483648, %v789_v1  ;;  %vm795_vm15 = vweird.f32 %v789_v1  ;;  %v799_v42 = vand.u32 2147483647, %v789_v1 }
 0x7ba   :  { %v862_v34 = vor.u32 1.1754944e-38, %v861_v19  ;;  %vm860_vm13 = vcmp.eq.f32.partialorder %v859_v20, 8.507059e+37 }
 0x7bb   :  { %v802_v45 = vor.u32 1.1754944e-38, %v801_v40  ;;  %vm800_vm2 = vcmp.eq.f32.partialorder %v799_v42, 8.507059e+37 }
 0x7be   :  { %v3192_v2 = vpop.eup %3191 }
 0x7bf   :  { %v851_v3 = vmul.f32 %v3192_v2, %v849_v0  ;;  %v3194_v5 = vpop.eup %3193  ;;  %vm856_vm10 = vweird.f32 %v3192_v2 }
 0x7c0   :  { %v791_v6 = vmul.f32 %v3194_v5, %v789_v1  ;;  %vm857_vm12 = vmor %vm855_vm11, %vm856_vm10  ;;  %vm796_vm14 = vweird.f32 %v3194_v5 }
 0x7c1   :  { %v852_v4 = vsub.f32 1.0, %v851_v3  ;;  %vm797_vm1 = vmor %vm795_vm15, %vm796_vm14 }
 0x7c2   :  { %v792_v8 = vsub.f32 1.0, %v791_v6 }
 0x7c3   :  { %v853_v7 = vmul.f32 %v3192_v2, %v852_v4 }
 0x7c4   :  { %v793_v28 = vmul.f32 %v3194_v5, %v792_v8 }
 0x7c5   :  { %v854_v13 = vadd.f32 %v3192_v2, %v853_v7 }
 0x7c6   :  { %v794_v38 = vadd.f32 %v3194_v5, %v793_v28 }
 0x7c7   :  { %v858_v32 = vsel %vm857_vm12, %v3192_v2, %v854_v13 }
 0x7c8   :  { %v863_v36 = vsel %vm860_vm13, %v862_v34, %v858_v32  ;;  %v798_v43 = vsel %vm797_vm1, %v3194_v5, %v794_v38 }
 0x7c9   :  { %v803_v46 = vsel %vm800_vm2, %v802_v45, %v798_v43  ;;  %v866_v48 = vmul.f32 %v863_v36, %v3964_v44 }
 0x7ca   :  { %v806_v50 = vmul.f32 %v803_v46, %v3969_v47 }
 0x80d   :  { %v809_v30 = vpop.permute.xlu2 %808 }
 0x80e   :  { %v811_v18 = vmul.f32 %v809_v30, %v803_v46 }
 0x826   :  { %v869_v35 = vpop.permute.xlu0 %868 }
 0x827   :  { %v871_v39 = vmul.f32 %v869_v35, %v863_v36 }
 0x829   :  { %873 = vrot.lane.b32.xlu1 %v871_v39, %s3688_s20 }
 0x831   :  { %813 = vrot.lane.b32.xlu1 %v811_v18, %s3688_s20 }
 0x89b   :  { %v874_v49 = vpop.permute.xlu1 %873 }
 0x89c   :  { %v3997_v37 = vadd.f32 %v874_v49, %v866_v48 }
 0x89e   :  { %3195 = vtanh.f32 %v3997_v37 }
 0x8a3   :  { %v814_v51 = vpop.permute.xlu1 %813 }
 0x8a4   :  { %v3196_v52 = vpop.eup %3195  ;;  %v4001_v41 = vadd.f32 %v814_v51, %v806_v50 }
 0x8a5   :  { %879 = vrot.lane.b32.xlu0 %v3196_v52, %s3687_s4 }
 0x8a6   :  { %3197 = vtanh.f32 %v4001_v41 }
 0x8ac   :  { %v3198_v53 = vpop.eup %3197 }
 0x8ad   :  { %819 = vrot.lane.b32.xlu0 %v3198_v53, %s3687_s4 }
 0x917   :  { %v880_v54 = vpop.permute.xlu0 %879 }
 0x918   :  { %v882_v44 = vmul.f32 %v880_v54, %v863_v36 }
 0x91a   :  { %890 = vrot.lane.b32.xlu2 %v882_v44, %s3688_s20 }
 0x91f   :  { %v820_v27 = vpop.permute.xlu0 %819 }
 0x920   :  { %v822_v55 = vmul.f32 %v820_v27, %v803_v46 }
 0x922   :  { %884 = vrot.lane.b32.xlu1 %v822_v55, %s3688_s20 }
 0x974   :  { %v891_v47 = vpop.permute.xlu2 %890 }
 0x975   :  { %894 = vst.msk [vmem:[#allocation3 + $0x20] sm:$0xff] %vm223_vm0, %v891_v47  ;;  %3016 = vmatmul.msk.f32.vlgmr.msrb.gmra.mxu3 %vm223_vm0, %v891_v47 }
 0x976   :  { %1239 = vmatpush.msrb.mxu3 %v3820_v9  ;;  %v4020_v9 = vpop.f32.mrf.mxu1 }
 0x978   :  { %1240 = vmatpush.msrb.mxu3 %v3826_v11 }
 0x97a   :  { %1241 = vmatpush.msrb.mxu3 %v3832_v14 }
 0x97c   :  { %1242 = vmatpush.msrb.mxu3 %v3838_v16 }
 0x97e   :  { %v4022_v57 = vpop.f32.mrf.mxu1 }
 0x986   :  { %v4024_v58 = vpop.f32.mrf.mxu1 }
 0x98e   :  { %v315_v25 = vpop.f32.mrf.mxu1 }
 0x98f   :  { %v316_v59 = vadd.f32 %v315_v25, %v3891_v33 }
 0x994   :  { %v885_v56 = vpop.permute.xlu1 %884 }
 0x995   :  { %888 = vst.msk [vmem:[#allocation2 + $0x18] sm:$0xff] %vm223_vm0, %v885_v56  ;;  %3014 = vmatmul.msk.f32.vlgmr.msrb.gmra.mxu2 %vm223_vm0, %v885_v56 }
 0x996   :  { %1179 = vmatpush.msrb.mxu2 %v3822_v10  ;;  %v278_v10 = vadd.f32 %v3872_v22, %v3889_v31 }
 0x998   :  { %1180 = vmatpush.msrb.mxu2 %v3828_v12 }
 0x99a   :  { %1181 = vmatpush.msrb.mxu2 %v3834_v15 }
 0x99c   :  { %1182 = vmatpush.msrb.mxu2 %v3840_v17 }
 0x9f8   :  { %v976_v60 = vpop.f32.mrf.mxu3 }
 0x9f9   :  { %v979_v61 = vadd.f32 %v976_v60, %v316_v59 }
 0x9fb   :  { %3199 = vtanh.f32 %v979_v61  ;;  %v3017_v23 = vmul.f32 -1.442695, %v979_v61 }
 0xa01   :  { %v3200_v62 = vpop.eup %3199 }
 0xa02   :  { %1002 = vrot.lane.b32.xlu2 %v3200_v62, %s3687_s4  ;;  %v3392_v62 = vld [vmem:[#allocation12 + $0x18] sm:$0xff] }
 0xa18   :  { %v916_v12 = vpop.f32.mrf.mxu2 }
 0xa19   :  { %v919_v63 = vadd.f32 %v916_v12, %v278_v10  ;;  %v3393_v10 = vld [vmem:[#allocation12 + $0x10] sm:$0xff] }
 0xa1b   :  { %3201 = vtanh.f32 %v919_v63  ;;  %v3015_v34 = vmul.f32 -1.442695, %v919_v63  ;;  %v281_v63 = vadd.f32 %v3876_v24, %v3889_v31 }
 0xa1c   :  { %3203 = vpow2.f32 %v3017_v23 }
 0xa21   :  { %v3202_v0 = vpop.eup %3201 }
 0xa22   :  { %942 = vrot.lane.b32.xlu1 %v3202_v0, %s3687_s4  ;;  %v3204_v1 = vpop.eup %3203 }
 0xa23   :  { %v983_v2 = vadd.f32 1.0, %v3204_v1 }
 0xa25   :  { %3205 = vrcp.f32 %v983_v2  ;;  %v995_v8 = vand.u32 2147483648, %v983_v2  ;;  %vm989_vm4 = vweird.f32 %v983_v2  ;;  %v993_v22 = vand.u32 2147483647, %v983_v2 }
 0xa26   :  { %3207 = vpow2.f32 %v3015_v34 }
 0xa27   :  { %v996_v19 = vor.u32 1.1754944e-38, %v995_v8  ;;  %vm994_vm6 = vcmp.eq.f32.partialorder %v993_v22, 8.507059e+37 }
 0xa2b   :  { %v3206_v3 = vpop.eup %3205 }
 0xa2c   :  { %v985_v4 = vmul.f32 %v3206_v3, %v983_v2  ;;  %vm990_vm3 = vweird.f32 %v3206_v3  ;;  %v3208_v35 = vpop.eup %3207 }
 0xa2d   :  { %vm991_vm5 = vmor %vm989_vm4, %vm990_vm3  ;;  %v923_v36 = vadd.f32 1.0, %v3208_v35 }
 0xa2e   :  { %v986_v5 = vsub.f32 1.0, %v985_v4 }
 0xa2f   :  { %3209 = vrcp.f32 %v923_v36  ;;  %v935_v30 = vand.u32 2147483648, %v923_v36  ;;  %vm929_vm8 = vweird.f32 %v923_v36  ;;  %v933_v45 = vand.u32 2147483647, %v923_v36 }
 0xa30   :  { %v987_v6 = vmul.f32 %v3206_v3, %v986_v5 }
 0xa31   :  { %v936_v18 = vor.u32 1.1754944e-38, %v935_v30  ;;  %vm934_vm10 = vcmp.eq.f32.partialorder %v933_v45, 8.507059e+37 }
 0xa32   :  { %v988_v7 = vadd.f32 %v3206_v3, %v987_v6 }
 0xa34   :  { %v992_v13 = vsel %vm991_vm5, %v3206_v3, %v988_v7 }
 0xa35   :  { %v997_v28 = vsel %vm994_vm6, %v996_v19, %v992_v13  ;;  %v3210_v38 = vpop.eup %3209 }
 0xa36   :  { %v925_v39 = vmul.f32 %v3210_v38, %v923_v36  ;;  %vm930_vm7 = vweird.f32 %v3210_v38  ;;  %v1000_v51 = vmul.f32 %v997_v28, %v3997_v37 }
 0xa37   :  { %vm931_vm9 = vmor %vm929_vm8, %vm930_vm7 }
 0xa38   :  { %v926_v40 = vsub.f32 1.0, %v925_v39 }
 0xa3a   :  { %v927_v42 = vmul.f32 %v3210_v38, %v926_v40 }
 0xa3c   :  { %v928_v43 = vadd.f32 %v3210_v38, %v927_v42 }
 0xa3e   :  { %v932_v46 = vsel %vm931_vm9, %v3210_v38, %v928_v43 }
 0xa3f   :  { %v937_v49 = vsel %vm934_vm10, %v936_v18, %v932_v46 }
 0xa40   :  { %v940_v44 = vmul.f32 %v937_v49, %v4001_v41  ;;  %v3391_v41 = vld [vmem:[#allocation13 + $0x18] sm:$0xff] }
 0xa5c   :  { %v1003_v20 = vpop.permute.xlu2 %1002 }
 0xa5d   :  { %v1005_v32 = vmul.f32 %v1003_v20, %v997_v28 }
 0xa5f   :  { %1007 = vrot.lane.b32.xlu0 %v1005_v32, %s3688_s20 }
 0xa94   :  { %v943_v48 = vpop.permute.xlu1 %942 }
 0xa95   :  { %v945_v50 = vmul.f32 %v943_v48, %v937_v49 }
 0xa97   :  { %947 = vrot.lane.b32.xlu0 %v945_v50, %s3688_s20 }
 0xad1   :  { %v1008_v52 = vpop.permute.xlu0 %1007 }
 0xad2   :  { %v4034_v53 = vadd.f32 %v1008_v52, %v1000_v51 }
 0xad4   :  { %3211 = vtanh.f32 %v4034_v53 }
 0xada   :  { %v3212_v54 = vpop.eup %3211 }
 0xadb   :  { %1013 = vrot.lane.b32.xlu2 %v3212_v54, %s3687_s4 }
 0xb09   :  { %v948_v27 = vpop.permute.xlu0 %947 }
 0xb0a   :  { %v4039_v55 = vadd.f32 %v948_v27, %v940_v44 }
 0xb0c   :  { %3213 = vtanh.f32 %v4039_v55 }
 0xb12   :  { %v3214_v47 = vpop.eup %3213 }
 0xb13   :  { %953 = vrot.lane.b32.xlu2 %v3214_v47, %s3687_s4 }
 0xb35   :  { %v1014_v56 = vpop.permute.xlu2 %1013 }
 0xb36   :  { %v1016_v37 = vmul.f32 %v1014_v56, %v997_v28 }
 0xb38   :  { %1024 = vrot.lane.b32.xlu1 %v1016_v37, %s3688_s20 }
 0xb6d   :  { %v954_v25 = vpop.permute.xlu2 %953 }
 0xb6e   :  { %v956_v59 = vmul.f32 %v954_v25, %v937_v49 }
 0xb70   :  { %1018 = vrot.lane.b32.xlu0 %v956_v59, %s3688_s20 }
 0xbaa   :  { %v1025_v60 = vpop.permute.xlu1 %1024 }
 0xbab   :  { %1028 = vst.msk [vmem:[#allocation3 + $0x18] sm:$0xff] %vm223_vm0, %v1025_v60  ;;  %3020 = vmatmul.msk.f32.vlgmr.msra.gmra.mxu3 %vm223_vm0, %v1025_v60  ;;  %v310_v60 = vadd.f32 %v4022_v57, %v3891_v33 }
 0xbac   :  { %1373 = vmatpush.msra.mxu3 %v3391_v41 }
 0xbae   :  { %1374 = vmatpush.msra.mxu3 %v3826_v11  ;;  %v313_v11 = vadd.f32 %v4024_v58, %v3891_v33 }
 0xbb0   :  { %1375 = vmatpush.msra.mxu3 %v3832_v14 }
 0xbb2   :  { %1376 = vmatpush.msra.mxu3 %v3838_v16 }
 0xbe2   :  { %v1019_v61 = vpop.permute.xlu0 %1018 }
 0xbe3   :  { %1022 = vst.msk [vmem:[#allocation2 + $0x20] sm:$0xff] %vm223_vm0, %v1019_v61  ;;  %3018 = vmatmul.msk.f32.vlgmr.msra.gmra.mxu2 %vm223_vm0, %v1019_v61 }
 0xbe4   :  { %1313 = vmatpush.msra.mxu2 %v3392_v62 }
 0xbe6   :  { %1314 = vmatpush.msra.mxu2 %v3393_v10  ;;  %v284_v10 = vadd.f32 %v3880_v26, %v3889_v31 }
 0xbe8   :  { %1315 = vmatpush.msra.mxu2 %v3834_v15 }
 0xbea   :  { %1316 = vmatpush.msra.mxu2 %v3840_v17 }
 0xc2e   :  { %v1110_v12 = vpop.f32.mrf.mxu3 }
 0xc2f   :  { %v1113_v14 = vadd.f32 %v1110_v12, %v313_v11 }
 0xc31   :  { %3215 = vtanh.f32 %v1113_v14  ;;  %v3021_v15 = vmul.f32 -1.442695, %v1113_v14 }
 0xc37   :  { %v3216_v16 = vpop.eup %3215 }
 0xc38   :  { %1136 = vrot.lane.b32.xlu1 %v3216_v16, %s3687_s4 }
 0xc66   :  { %v1050_v0 = vpop.f32.mrf.mxu2 }
 0xc67   :  { %v1053_v23 = vadd.f32 %v1050_v0, %v281_v63 }
 0xc69   :  { %3217 = vtanh.f32 %v1053_v23  ;;  %v3019_v28 = vmul.f32 -1.442695, %v1053_v23 }
 0xc6a   :  { %3219 = vpow2.f32 %v3021_v15 }
 0xc6f   :  { %v3218_v1 = vpop.eup %3217 }
 0xc70   :  { %1076 = vrot.lane.b32.xlu0 %v3218_v1, %s3687_s4  ;;  %v3220_v17 = vpop.eup %3219 }
 0xc71   :  { %v1117_v2 = vadd.f32 1.0, %v3220_v17 }
 0xc73   :  { %3221 = vrcp.f32 %v1117_v2  ;;  %v1129_v7 = vand.u32 2147483648, %v1117_v2  ;;  %vm1123_vm12 = vweird.f32 %v1117_v2  ;;  %v1127_v24 = vand.u32 2147483647, %v1117_v2 }
 0xc74   :  { %3223 = vpow2.f32 %v3019_v28 }
 0xc75   :  { %v1130_v22 = vor.u32 1.1754944e-38, %v1129_v7  ;;  %vm1128_vm14 = vcmp.eq.f32.partialorder %v1127_v24, 8.507059e+37 }
 0xc79   :  { %v3222_v58 = vpop.eup %3221 }
 0xc7a   :  { %v1119_v3 = vmul.f32 %v3222_v58, %v1117_v2  ;;  %vm1124_vm11 = vweird.f32 %v3222_v58  ;;  %v3224_v32 = vpop.eup %3223 }
 0xc7b   :  { %vm1125_vm13 = vmor %vm1123_vm12, %vm1124_vm11  ;;  %v1057_v34 = vadd.f32 1.0, %v3224_v32 }
 0xc7c   :  { %v1120_v4 = vsub.f32 1.0, %v1119_v3 }
 0xc7d   :  { %3225 = vrcp.f32 %v1057_v34  ;;  %v1069_v42 = vand.u32 2147483648, %v1057_v34  ;;  %vm1063_vm1 = vweird.f32 %v1057_v34  ;;  %v1067_v43 = vand.u32 2147483647, %v1057_v34 }
 0xc7e   :  { %v1121_v5 = vmul.f32 %v3222_v58, %v1120_v4 }
 0xc7f   :  { %v1070_v45 = vor.u32 1.1754944e-38, %v1069_v42  ;;  %vm1068_vm3 = vcmp.eq.f32.partialorder %v1067_v43, 8.507059e+37 }
 0xc80   :  { %v1122_v6 = vadd.f32 %v3222_v58, %v1121_v5 }
 0xc82   :  { %v1126_v8 = vsel %vm1125_vm13, %v3222_v58, %v1122_v6 }
 0xc83   :  { %v1131_v19 = vsel %vm1128_vm14, %v1130_v22, %v1126_v8  ;;  %v3226_v35 = vpop.eup %3225 }
 0xc84   :  { %v1059_v36 = vmul.f32 %v3226_v35, %v1057_v34  ;;  %vm1064_vm15 = vweird.f32 %v3226_v35  ;;  %v1134_v49 = vmul.f32 %v1131_v19, %v4034_v53 }
 0xc85   :  { %vm1065_vm2 = vmor %vm1063_vm1, %vm1064_vm15 }
 0xc86   :  { %v1060_v38 = vsub.f32 1.0, %v1059_v36 }
 0xc88   :  { %v1061_v39 = vmul.f32 %v3226_v35, %v1060_v38 }
 0xc8a   :  { %v1062_v40 = vadd.f32 %v3226_v35, %v1061_v39 }
 0xc8c   :  { %v1066_v30 = vsel %vm1065_vm2, %v3226_v35, %v1062_v40 }
 0xc8d   :  { %v1071_v18 = vsel %vm1068_vm3, %v1070_v45, %v1066_v30 }
 0xc8e   :  { %v1074_v54 = vmul.f32 %v1071_v18, %v4039_v55 }
 0xcaa   :  { %v1137_v13 = vpop.permute.xlu1 %1136 }
 0xcab   :  { %v1139_v20 = vmul.f32 %v1137_v13, %v1131_v19 }
 0xcad   :  { %1141 = vrot.lane.b32.xlu2 %v1139_v20, %s3688_s20 }
 0xce2   :  { %v1077_v46 = vpop.permute.xlu0 %1076 }
 0xce3   :  { %v1079_v48 = vmul.f32 %v1077_v46, %v1071_v18 }
 0xce5   :  { %1081 = vrot.lane.b32.xlu2 %v1079_v48, %s3688_s20 }
 0xd07   :  { %v1142_v50 = vpop.permute.xlu2 %1141 }
 0xd08   :  { %v4063_v51 = vadd.f32 %v1142_v50, %v1134_v49 }
 0xd0a   :  { %3227 = vtanh.f32 %v4063_v51 }
 0xd10   :  { %v3228_v52 = vpop.eup %3227 }
 0xd11   :  { %1147 = vrot.lane.b32.xlu1 %v3228_v52, %s3687_s4 }
 0xd3f   :  { %v1082_v44 = vpop.permute.xlu2 %1081 }
 0xd40   :  { %v4068_v27 = vadd.f32 %v1082_v44, %v1074_v54  ;;  %v1453_v44 = vld [vmem:[#allocation15 + $0x38] sm:$0xff] }
 0xd42   :  { %3229 = vtanh.f32 %v4068_v27 }
 0xd48   :  { %v3230_v47 = vpop.eup %3229 }
 0xd49   :  { %1087 = vrot.lane.b32.xlu1 %v3230_v47, %s3687_s4  ;;  %v1449_v47 = vld [vmem:[#allocation15 + $0x18] sm:$0xff] }
 0xd83   :  { %v1148_v56 = vpop.permute.xlu1 %1147 }
 0xd84   :  { %v1150_v53 = vmul.f32 %v1148_v56, %v1131_v19  ;;  %v1447_v56 = vld [vmem:[#allocation15 + $0x8] sm:$0xff] }
 0xd86   :  { %1158 = vrot.lane.b32.xlu0 %v1150_v53, %s3688_s20 }
 0xdbb   :  { %v1088_v37 = vpop.permute.xlu1 %1087 }
 0xdbc   :  { %v1090_v25 = vmul.f32 %v1088_v37, %v1071_v18  ;;  %v1452_v37 = vld [vmem:[#allocation15 + $0x30] sm:$0xff] }
 0xdbe   :  { %1152 = vrot.lane.b32.xlu2 %v1090_v25, %s3688_s20  ;;  %v1450_v25 = vld [vmem:[#allocation15 + $0x20] sm:$0xff] }
 0xdf8   :  { %v1159_v59 = vpop.permute.xlu0 %1158 }
 0xdf9   :  { %1162 = vst.msk [vmem:[#allocation3 + $0x10] sm:$0xff] %vm223_vm0, %v1159_v59  ;;  %3024 = vmatmul.msk.f32.vlgmr.msrb.gmra.mxu3 %vm223_vm0, %v1159_v59  ;;  %v1448_v59 = vld [vmem:[#allocation15 + $0x10] sm:$0xff] }
 0xdfa   :  { %1645 = vmatpush.msrb.mxu3 %v1453_v44 }
 0xe18   :  { %v1153_v55 = vpop.permute.xlu2 %1152 }
 0xe19   :  { %1156 = vst.msk [vmem:[#allocation2 + $0x28] sm:$0xff] %vm223_vm0, %v1153_v55  ;;  %3022 = vmatmul.msk.f32.vlgmr.msrb.gmra.mxu2 %vm223_vm0, %v1153_v55  ;;  %v1446_v55 = vld [vmem:[#allocation15] sm:$0xff] }
 0xe1a   :  { %1604 = vmatpush.msrb.mxu2 %v1452_v37  ;;  %v1457_v37 = vld [vmem:[#allocation16 + $0x18] sm:$0xff] }
 0xe1c   :  { %1605 = vmatpush.msrb.mxu2 %v1450_v25 }
 0xe1e   :  { %1606 = vmatpush.msrb.mxu2 %v1448_v59 }
 0xe20   :  { %1607 = vmatpush.msrb.mxu2 %v1446_v55  ;;  %v1455_v55 = vld [vmem:[#allocation16 + $0x8] sm:$0xff] }
 0xe7c   :  { %v1244_v41 = vpop.f32.mrf.mxu3 }
 0xe7d   :  { %v1247_v61 = vadd.f32 %v1244_v41, %v310_v60  ;;  %v1430_v60 = vld [vmem:[#allocation2] sm:$0xff]  ;;  %v1431_v41 = vld [vmem:[#allocation2 + $0x8] sm:$0xff] }
 0xe7f   :  { %3231 = vtanh.f32 %v1247_v61  ;;  %v3025_v16 = vmul.f32 -1.442695, %v1247_v61  ;;  %v1432_v61 = vld [vmem:[#allocation2 + $0x10] sm:$0xff] }
 0xe85   :  { %v3232_v62 = vpop.eup %3231 }
 0xe86   :  { %1270 = vrot.lane.b32.xlu0 %v3232_v62, %s3687_s4 }
 0xe9c   :  { %v1184_v11 = vpop.f32.mrf.mxu2 }
 0xe9d   :  { %v1187_v12 = vadd.f32 %v1184_v11, %v284_v10  ;;  %v1433_v10 = vld [vmem:[#allocation2 + $0x18] sm:$0xff]  ;;  %v1434_v11 = vld [vmem:[#allocation2 + $0x20] sm:$0xff] }
 0xe9f   :  { %3233 = vtanh.f32 %v1187_v12  ;;  %v3023_v63 = vmul.f32 -1.442695, %v1187_v12  ;;  %v1435_v12 = vld [vmem:[#allocation2 + $0x28] sm:$0xff] }
 0xea0   :  { %3235 = vpow2.f32 %v3025_v16  ;;  %v307_v16 = vadd.f32 %v4020_v9, %v3891_v33 }
 0xea1   :  { %3237 = vpow2.f32 %v3023_v63 }
 0xea5   :  { %v3234_v14 = vpop.eup %3233 }
 0xea6   :  { %1210 = vrot.lane.b32.xlu2 %v3234_v14, %s3687_s4  ;;  %v3236_v0 = vpop.eup %3235 }
 0xea7   :  { %v1251_v57 = vadd.f32 1.0, %v3236_v0  ;;  %v3238_v23 = vpop.eup %3237 }
 0xea8   :  { %v1191_v1 = vadd.f32 1.0, %v3238_v23  ;;  %v287_v23 = vadd.f32 %v3887_v29, %v3889_v31 }
 0xea9   :  { %3239 = vrcp.f32 %v1251_v57  ;;  %v1263_v6 = vand.u32 2147483648, %v1251_v57  ;;  %vm1257_vm5 = vweird.f32 %v1251_v57  ;;  %v1261_v7 = vand.u32 2147483647, %v1251_v57 }
 0xeaa   :  { %3241 = vrcp.f32 %v1191_v1  ;;  %v1203_v32 = vand.u32 2147483648, %v1191_v1  ;;  %vm1197_vm9 = vweird.f32 %v1191_v1  ;;  %v1201_v34 = vand.u32 2147483647, %v1191_v1 }
 0xeab   :  { %v1264_v22 = vor.u32 1.1754944e-38, %v1263_v6  ;;  %vm1262_vm7 = vcmp.eq.f32.partialorder %v1261_v7, 8.507059e+37 }
 0xeac   :  { %v1204_v36 = vor.u32 1.1754944e-38, %v1203_v32  ;;  %vm1202_vm11 = vcmp.eq.f32.partialorder %v1201_v34, 8.507059e+37 }
 0xeaf   :  { %v3240_v15 = vpop.eup %3239 }
 0xeb0   :  { %v1253_v17 = vmul.f32 %v3240_v15, %v1251_v57  ;;  %v3242_v26 = vpop.eup %3241  ;;  %vm1258_vm4 = vweird.f32 %v3240_v15 }
 0xeb1   :  { %v1193_v3 = vmul.f32 %v3242_v26, %v1191_v1  ;;  %vm1259_vm6 = vmor %vm1257_vm5, %vm1258_vm4  ;;  %vm1198_vm8 = vweird.f32 %v3242_v26 }
 0xeb2   :  { %v1254_v2 = vsub.f32 1.0, %v1253_v17  ;;  %vm1199_vm10 = vmor %vm1197_vm9, %vm1198_vm8 }
 0xeb3   :  { %v1194_v5 = vsub.f32 1.0, %v1193_v3 }
 0xeb4   :  { %v1255_v58 = vmul.f32 %v3240_v15, %v1254_v2 }
 0xeb5   :  { %v1195_v8 = vmul.f32 %v3242_v26, %v1194_v5 }
 0xeb6   :  { %v1256_v4 = vadd.f32 %v3240_v15, %v1255_v58 }
 0xeb7   :  { %v1196_v28 = vadd.f32 %v3242_v26, %v1195_v8 }
 0xeb8   :  { %v1260_v24 = vsel %vm1259_vm6, %v3240_v15, %v1256_v4 }
 0xeb9   :  { %v1265_v19 = vsel %vm1262_vm7, %v1264_v22, %v1260_v24  ;;  %v1200_v35 = vsel %vm1199_vm10, %v3242_v26, %v1196_v28 }
 0xeba   :  { %v1205_v39 = vsel %vm1202_vm11, %v1204_v36, %v1200_v35  ;;  %v1268_v42 = vmul.f32 %v1265_v19, %v4063_v51 }
 0xebb   :  { %v1208_v45 = vmul.f32 %v1205_v39, %v4068_v27  ;;  %v1451_v27 = vld [vmem:[#allocation15 + $0x28] sm:$0xff] }
 0xebc   :  { %1646 = vmatpush.msrb.mxu3 %v1451_v27 }
 0xebe   :  { %1647 = vmatpush.msrb.mxu3 %v1449_v47 }
 0xec0   :  { %1648 = vmatpush.msrb.mxu3 %v1447_v56 }
 0xef8   :  { %v1271_v13 = vpop.permute.xlu0 %1270 }
 0xef9   :  { %v1273_v20 = vmul.f32 %v1271_v13, %v1265_v19 }
 0xefb   :  { %1275 = vrot.lane.b32.xlu1 %v1273_v20, %s3688_s20 }
 0xf00   :  { %v1211_v38 = vpop.permute.xlu2 %1210 }
 0xf01   :  { %v1213_v40 = vmul.f32 %v1211_v38, %v1205_v39 }
 0xf03   :  { %1215 = vrot.lane.b32.xlu1 %v1213_v40, %s3688_s20 }
 0xf6d   :  { %v1276_v43 = vpop.permute.xlu1 %1275 }
 0xf6e   :  { %v4087_v30 = vadd.f32 %v1276_v43, %v1268_v42 }
 0xf70   :  { %3243 = vtanh.f32 %v4087_v30 }
 0xf75   :  { %v1216_v46 = vpop.permute.xlu1 %1215 }
 0xf76   :  { %v3244_v18 = vpop.eup %3243  ;;  %v4091_v48 = vadd.f32 %v1216_v46, %v1208_v45 }
 0xf77   :  { %1281 = vrot.lane.b32.xlu0 %v3244_v18, %s3687_s4 }
 0xf78   :  { %3245 = vtanh.f32 %v4091_v48 }
 0xf7e   :  { %v3246_v49 = vpop.eup %3245 }
 0xf7f   :  { %1221 = vrot.lane.b32.xlu0 %v3246_v49, %s3687_s4 }
 0xfe9   :  { %v1282_v50 = vpop.permute.xlu0 %1281 }
 0xfea   :  { %v1284_v51 = vmul.f32 %v1282_v50, %v1265_v19 }
 0xfec   :  { %1292 = vrot.lane.b32.xlu2 %v1284_v51, %s3688_s20 }
 0xff1   :  { %v1222_v52 = vpop.permute.xlu0 %1221 }
 0xff2   :  { %v1224_v54 = vmul.f32 %v1222_v52, %v1205_v39 }
 0xff4   :  { %1286 = vrot.lane.b32.xlu1 %v1224_v54, %s3688_s20 }
0x1046   :  { %v1293_v53 = vpop.permute.xlu2 %1292 }
0x1047   :  { %1296 = vst.msk [vmem:[#allocation3 + $0x8] sm:$0xff] %vm223_vm0, %v1293_v53  ;;  %3028 = vmatmul.msk.f32.vlgmr.msra.gmra.mxu3 %vm223_vm0, %v1293_v53  ;;  %v1461_v53 = vld [vmem:[#allocation16 + $0x38] sm:$0xff] }
0x1048   :  { %1539 = vmatpush.msrb.mxu1 %v1461_v53 }
0x104f   :  { %3054 = vmatmul.msk.f32.vlgmr.msrb.gmra.mxu3 %vm223_vm0, %v1430_v60 }
0x1057   :  { %3055 = vmatmul.msk.f32.gmra.mxu3 %vm223_vm0, %v1431_v41 }
0x105f   :  { %3056 = vmatmul.msk.f32.gmra.mxu3 %vm223_vm0, %v1432_v61 }
0x1066   :  { %v1287_v62 = vpop.permute.xlu1 %1286 }
0x1067   :  { %1290 = vst.msk [vmem:[#allocation2 + $0x30] sm:$0xff] %vm223_vm0, %v1287_v62  ;;  %3026 = vmatmul.msk.f32.vlgmr.msra.gmra.mxu2 %vm223_vm0, %v1287_v62  ;;  %3057 = vmatmul.msk.f32.gmra.mxu3 %vm223_vm0, %v1433_v10  ;;  %v4130_v62 = vld [vmem:[#allocation19 + $0x18] sm:$0xff] }
0x1068   :  { %1925 = vmatpush.msra.mxu3 %v4130_v62 }
0x106e   :  { %v1436_v14 = vld [vmem:[#allocation2 + $0x30] sm:$0xff] }
0x106f   :  { %3046 = vmatmul.msk.f32.vlgmr.msrb.gmra.mxu2 %vm223_vm0, %v1430_v60  ;;  %3058 = vmatmul.msk.f32.gmra.mxu3 %vm223_vm0, %v1434_v11  ;;  %v1458_v60 = vld [vmem:[#allocation16 + $0x20] sm:$0xff] }
0x1077   :  { %3047 = vmatmul.msk.f32.gmra.mxu2 %vm223_vm0, %v1431_v41  ;;  %3059 = vmatmul.msk.f32.gmra.mxu3 %vm223_vm0, %v1435_v12  ;;  %v1456_v41 = vld [vmem:[#allocation16 + $0x10] sm:$0xff] }
0x107f   :  { %3048 = vmatmul.msk.f32.gmra.mxu2 %vm223_vm0, %v1432_v61  ;;  %3060 = vmatmul.msk.f32.gmra.mxu3 %vm223_vm0, %v1436_v14  ;;  %v1454_v61 = vld [vmem:[#allocation16] sm:$0xff] }
0x1087   :  { %3049 = vmatmul.msk.f32.gmra.mxu2 %vm223_vm0, %v1433_v10  ;;  %v4134_v10 = vld [vmem:[#allocation19 + $0x10] sm:$0xff] }
0x1088   :  { %1926 = vmatpush.msra.mxu3 %v4134_v10 }
0x108f   :  { %3050 = vmatmul.msk.f32.gmra.mxu2 %vm223_vm0, %v1434_v11 }
0x1097   :  { %3051 = vmatmul.msk.f32.gmra.mxu2 %vm223_vm0, %v1435_v12 }
0x109f   :  { %3052 = vmatmul.msk.f32.gmra.mxu2 %vm223_vm0, %v1436_v14  ;;  %v4141_v14 = vld [vmem:[#allocation19 + $0x8] sm:$0xff] }
0x10a0   :  { %1927 = vmatpush.msra.mxu3 %v4141_v14 }
0x10ca   :  { %v1378_v63 = vpop.f32.mrf.mxu3 }
0x10cb   :  { %v1381_v0 = vadd.f32 %v1378_v63, %v307_v16  ;;  %v1439_v16 = vld [vmem:[#allocation3 + $0x8] sm:$0xff]  ;;  %v1440_v63 = vld [vmem:[#allocation3 + $0x10] sm:$0xff] }
0x10cd   :  { %3247 = vtanh.f32 %v1381_v0  ;;  %v3029_v2 = vmul.f32 -1.442695, %v1381_v0  ;;  %v4149_v0 = vld [vmem:[#allocation19] sm:$0xff] }
0x10ce   :  { %1928 = vmatpush.msra.mxu3 %v4149_v0 }
0x10d0   :  { %2193 = vmatpush.msrb.mxu3 %v4130_v62 }
0x10d2   :  { %2194 = vmatpush.msrb.mxu3 %v4134_v10 }
0x10d3   :  { %v3248_v57 = vpop.eup %3247 }
0x10d4   :  { %1404 = vrot.lane.b32.xlu2 %v3248_v57, %s3687_s4  ;;  %2195 = vmatpush.msrb.mxu3 %v4141_v14  ;;  %v1441_v57 = vld [vmem:[#allocation3 + $0x18] sm:$0xff] }
0x10d6   :  { %2196 = vmatpush.msrb.mxu3 %v4149_v0 }
0x10ea   :  { %v1318_v1 = vpop.f32.mrf.mxu2 }
0x10eb   :  { %v1321_v15 = vadd.f32 %v1318_v1, %v287_v23  ;;  %v4161_v23 = vld [vmem:[#allocation18 + $0x18] sm:$0xff]  ;;  %v4163_v1 = vld [vmem:[#allocation18 + $0x10] sm:$0xff] }
0x10ec   :  { %1865 = vmatpush.msra.mxu2 %v4161_v23 }
0x10ed   :  { %3249 = vtanh.f32 %v1321_v15  ;;  %v3027_v13 = vmul.f32 -1.442695, %v1321_v15  ;;  %v4169_v15 = vld [vmem:[#allocation18 + $0x8] sm:$0xff] }
0x10ee   :  { %3251 = vpow2.f32 %v3029_v2  ;;  %1866 = vmatpush.msra.mxu2 %v4163_v1  ;;  %v1442_v2 = vld [vmem:[#allocation3 + $0x20] sm:$0xff] }
0x10f0   :  { %1867 = vmatpush.msra.mxu2 %v4169_v15 }
0x10f3   :  { %v3250_v17 = vpop.eup %3249 }
0x10f4   :  { %1344 = vrot.lane.b32.xlu1 %v3250_v17, %s3687_s4  ;;  %v3252_v26 = vpop.eup %3251  ;;  %v4174_v17 = vld [vmem:[#allocation18] sm:$0xff] }
0x10f5   :  { %v1385_v58 = vadd.f32 1.0, %v3252_v26  ;;  %1868 = vmatpush.msra.mxu2 %v4174_v17  ;;  %v1443_v26 = vld [vmem:[#allocation3 + $0x28] sm:$0xff] }
0x10f7   :  { %3253 = vrcp.f32 %v1385_v58  ;;  %v1397_v6 = vand.u32 2147483648, %v1385_v58  ;;  %vm1391_vm13 = vweird.f32 %v1385_v58  ;;  %v1395_v29 = vand.u32 2147483647, %v1385_v58  ;;  %2133 = vmatpush.msrb.mxu2 %v4161_v23 }
0x10f8   :  { %3255 = vpow2.f32 %v3027_v13 }
0x10f9   :  { %v1398_v7 = vor.u32 1.1754944e-38, %v1397_v6  ;;  %vm1396_vm15 = vcmp.eq.f32.partialorder %v1395_v29, 8.507059e+37  ;;  %2134 = vmatpush.msrb.mxu2 %v4163_v1 }
0x10fb   :  { %2135 = vmatpush.msrb.mxu2 %v4169_v15 }
0x10fd   :  { %v3254_v33 = vpop.eup %3253  ;;  %2136 = vmatpush.msrb.mxu2 %v4174_v17 }
0x10fe   :  { %v1387_v9 = vmul.f32 %v3254_v33, %v1385_v58  ;;  %vm1392_vm12 = vweird.f32 %v3254_v33  ;;  %v3256_v19 = vpop.eup %3255 }
0x10ff   :  { %vm1393_vm14 = vmor %vm1391_vm13, %vm1392_vm12  ;;  %v1325_v20 = vadd.f32 1.0, %v3256_v19 }
0x1100   :  { %v1388_v3 = vsub.f32 1.0, %v1387_v9  ;;  %v1445_v9 = vld [vmem:[#allocation3 + $0x38] sm:$0xff] }
0x1101   :  { %3257 = vrcp.f32 %v1325_v20  ;;  %v1337_v38 = vand.u32 2147483648, %v1325_v20  ;;  %vm1331_vm2 = vweird.f32 %v1325_v20  ;;  %v1335_v39 = vand.u32 2147483647, %v1325_v20 }
0x1102   :  { %v1389_v4 = vmul.f32 %v3254_v33, %v1388_v3 }
0x1103   :  { %v1338_v42 = vor.u32 1.1754944e-38, %v1337_v38  ;;  %vm1336_vm4 = vcmp.eq.f32.partialorder %v1335_v39, 8.507059e+37 }
0x1104   :  { %v1390_v5 = vadd.f32 %v3254_v33, %v1389_v4  ;;  %v1650_v4 = vpop.f32.mrf.mxu3 }
0x1106   :  { %v1394_v31 = vsel %vm1393_vm14, %v3254_v33, %v1390_v5  ;;  %v1444_v33 = vld [vmem:[#allocation3 + $0x30] sm:$0xff]  ;;  %v1609_v5 = vpop.f32.mrf.mxu2 }
0x1107   :  { %v1399_v8 = vsel %vm1396_vm15, %v1398_v7, %v1394_v31  ;;  %v3258_v28 = vpop.eup %3257 }
0x1108   :  { %v1327_v32 = vmul.f32 %v3258_v28, %v1325_v20  ;;  %vm1332_vm1 = vweird.f32 %v3258_v28  ;;  %v1402_v18 = vmul.f32 %v1399_v8, %v4087_v30  ;;  %v1459_v30 = vld [vmem:[#allocation16 + $0x28] sm:$0xff] }
0x1109   :  { %vm1333_vm3 = vmor %vm1331_vm2, %vm1332_vm1  ;;  %1540 = vmatpush.msrb.mxu1 %v1459_v30 }
0x110a   :  { %v1328_v34 = vsub.f32 1.0, %v1327_v32 }
0x110b   :  { %1541 = vmatpush.msrb.mxu1 %v1457_v37 }
0x110c   :  { %v1329_v35 = vmul.f32 %v3258_v28, %v1328_v34  ;;  %v1653_v6 = vpop.f32.mrf.mxu3 }
0x110d   :  { %1542 = vmatpush.msrb.mxu1 %v1455_v55 }
0x110e   :  { %v1330_v36 = vadd.f32 %v3258_v28, %v1329_v35  ;;  %v1612_v29 = vpop.f32.mrf.mxu2 }
0x110f   :  { %1792 = vmatpush.msra.mxu1 %v4130_v62 }
0x1110   :  { %v1334_v40 = vsel %vm1333_vm3, %v3258_v28, %v1330_v36 }
0x1111   :  { %v1339_v45 = vsel %vm1336_vm4, %v1338_v42, %v1334_v40  ;;  %1793 = vmatpush.msra.mxu1 %v4134_v10 }
0x1112   :  { %v1342_v52 = vmul.f32 %v1339_v45, %v4091_v48  ;;  %v1460_v48 = vld [vmem:[#allocation16 + $0x30] sm:$0xff] }
0x1113   :  { %1498 = vmatpush.msrb.mxu0 %v1460_v48  ;;  %1794 = vmatpush.msra.mxu1 %v4141_v14 }
0x1114   :  { %v1656_v13 = vpop.f32.mrf.mxu3 }
0x1115   :  { %1499 = vmatpush.msrb.mxu0 %v1458_v60  ;;  %1795 = vmatpush.msra.mxu1 %v4149_v0 }
0x1116   :  { %v1615_v19 = vpop.f32.mrf.mxu2 }
0x1117   :  { %1500 = vmatpush.msrb.mxu0 %v1456_v41 }
0x1119   :  { %1501 = vmatpush.msrb.mxu0 %v1454_v61 }
0x111b   :  { %1734 = vmatpush.msra.mxu0 %v4161_v23 }
0x111c   :  { %v1659_v42 = vpop.f32.mrf.mxu3 }
0x111d   :  { %1735 = vmatpush.msra.mxu0 %v4163_v1 }
0x111f   :  { %1736 = vmatpush.msra.mxu0 %v4169_v15 }
0x1121   :  { %1737 = vmatpush.msra.mxu0 %v4174_v17 }
0x112e   :  { %v1405_v24 = vpop.permute.xlu2 %1404 }
0x112f   :  { %v1407_v22 = vmul.f32 %v1405_v24, %v1399_v8 }
0x1131   :  { %1409 = vrot.lane.b32.xlu0 %v1407_v22, %s3688_s20 }
0x1166   :  { %v1345_v43 = vpop.permute.xlu1 %1344 }
0x1167   :  { %v1347_v46 = vmul.f32 %v1345_v43, %v1339_v45  ;;  %v1618_v43 = vpop.f32.mrf.mxu2 }
0x1169   :  { %1349 = vrot.lane.b32.xlu0 %v1347_v46, %s3688_s20 }
0x11a3   :  { %v1410_v49 = vpop.permute.xlu0 %1409 }
0x11a4   :  { %v1412_v50 = vadd.f32 %v1410_v49, %v1402_v18 }
0x11a6   :  { %3259 = vtanh.f32 %v1412_v50 }
0x11ac   :  { %v3260_v51 = vpop.eup %3259 }
0x11ad   :  { %1415 = vrot.lane.b32.xlu2 %v3260_v51, %s3687_s4 }
0x11db   :  { %v1350_v54 = vpop.permute.xlu0 %1349 }
0x11dc   :  { %v1352_v44 = vadd.f32 %v1350_v54, %v1342_v52 }
0x11de   :  { %3261 = vtanh.f32 %v1352_v44  ;;  %v1662_v44 = vpop.f32.mrf.mxu3 }
0x11e4   :  { %v3262_v27 = vpop.eup %3261 }
0x11e5   :  { %1355 = vrot.lane.b32.xlu2 %v3262_v27, %s3687_s4  ;;  %v1621_v27 = vpop.f32.mrf.mxu2 }
0x11e6   :  { %v1665_v55 = vpop.f32.mrf.mxu3 }
0x11ed   :  { %v1624_v60 = vpop.f32.mrf.mxu2 }
0x1207   :  { %v1416_v47 = vpop.permute.xlu2 %1415 }
0x1208   :  { %v1418_v56 = vmul.f32 %v1416_v47, %v1399_v8 }
0x120a   :  { %1426 = vrot.lane.b32.xlu1 %v1418_v56, %s3688_s20 }
0x123f   :  { %v1356_v25 = vpop.permute.xlu2 %1355 }
0x1240   :  { %v1358_v59 = vmul.f32 %v1356_v25, %v1339_v45 }
0x1242   :  { %1420 = vrot.lane.b32.xlu0 %v1358_v59, %s3688_s20 }
0x127c   :  { %v1427_v11 = vpop.permute.xlu1 %1426 }
0x127d   :  { %1429 = vst.msk [vmem:[#allocation3] sm:$0xff] %vm223_vm0, %v1427_v11 }
0x1284   :  { %v1438_v12 = vld [vmem:[#allocation3] sm:$0xff] }
0x1285   :  { %3030 = vmatmul.msk.f32.vlgmr.msrb.gmra.mxu0 %vm223_vm0, %v1438_v12  ;;  %3038 = vmatmul.msk.f32.vlgmr.msrb.gmra.mxu1 %vm223_vm0, %v1438_v12 }
0x1286   :  { %2059 = vmatpush.msrb.mxu1 %v4130_v62  ;;  %1999 = vmatpush.msrb.mxu0 %v4161_v23 }
0x1288   :  { %2060 = vmatpush.msrb.mxu1 %v4134_v10  ;;  %2000 = vmatpush.msrb.mxu0 %v4163_v1 }
0x128a   :  { %2061 = vmatpush.msrb.mxu1 %v4141_v14  ;;  %2001 = vmatpush.msrb.mxu0 %v4169_v15 }
0x128c   :  { %2062 = vmatpush.msrb.mxu1 %v4149_v0  ;;  %2002 = vmatpush.msrb.mxu0 %v4174_v17 }
0x128d   :  { %3031 = vmatmul.msk.f32.gmra.mxu0 %vm223_vm0, %v1439_v16  ;;  %3039 = vmatmul.msk.f32.gmra.mxu1 %vm223_vm0, %v1439_v16 }
0x1295   :  { %3032 = vmatmul.msk.f32.gmra.mxu0 %vm223_vm0, %v1440_v63  ;;  %3040 = vmatmul.msk.f32.gmra.mxu1 %vm223_vm0, %v1440_v63 }
0x129d   :  { %3033 = vmatmul.msk.f32.gmra.mxu0 %vm223_vm0, %v1441_v57  ;;  %3041 = vmatmul.msk.f32.gmra.mxu1 %vm223_vm0, %v1441_v57  ;;  %v1668_v57 = vpop.f32.mrf.mxu3 }
0x12a5   :  { %3034 = vmatmul.msk.f32.gmra.mxu0 %vm223_vm0, %v1442_v2  ;;  %3042 = vmatmul.msk.f32.gmra.mxu1 %vm223_vm0, %v1442_v2  ;;  %v1627_v2 = vpop.f32.mrf.mxu2 }
0x12ad   :  { %3035 = vmatmul.msk.f32.gmra.mxu0 %vm223_vm0, %v1443_v26  ;;  %3043 = vmatmul.msk.f32.gmra.mxu1 %vm223_vm0, %v1443_v26 }
0x12b4   :  { %v1421_v58 = vpop.permute.xlu0 %1420 }
0x12b5   :  { %1424 = vst.msk [vmem:[#allocation2 + $0x38] sm:$0xff] %vm223_vm0, %v1421_v58  ;;  %3036 = vmatmul.msk.f32.gmra.mxu0 %vm223_vm0, %v1444_v33  ;;  %3044 = vmatmul.msk.f32.gmra.mxu1 %vm223_vm0, %v1444_v33 }
0x12bc   :  { %v1437_v3 = vld [vmem:[#allocation2 + $0x38] sm:$0xff] }
0x12bd   :  { %3037 = vmatmul.msk.f32.gmra.mxu0 %vm223_vm0, %v1445_v9  ;;  %3045 = vmatmul.msk.f32.gmra.mxu1 %vm223_vm0, %v1445_v9 }
0x12be   :  { %3053 = vmatmul.msk.f32.gmra.mxu2 %vm223_vm0, %v1437_v3  ;;  %3061 = vmatmul.msk.f32.gmra.mxu3 %vm223_vm0, %v1437_v3 }
0x12c5   :  { %1738 = vmatmul.f32.vlgmr.msra.gmra.mxu0 %v3686_v21  ;;  %1796 = vmatmul.f32.vlgmr.msra.gmra.mxu1 %v3686_v21  ;;  %v1674_v21 = vld [vmem:[%s4471_s9] sm:$0x3] }
0x12c6   :  { %2327 = vmatpush.msra.mxu1 %v4130_v62  ;;  %2267 = vmatpush.msra.mxu0 %v4161_v23  ;;  %v4211_v31 = vperm.slane %v1674_v21, 1  ;;  %v1676_v35 = vperm.slane %v1674_v21, 0 }
0x12c8   :  { %2328 = vmatpush.msra.mxu1 %v4134_v10  ;;  %2268 = vmatpush.msra.mxu0 %v4163_v1 }
0x12ca   :  { %2329 = vmatpush.msra.mxu1 %v4141_v14  ;;  %2269 = vmatpush.msra.mxu0 %v4169_v15 }
0x12cc   :  { %2330 = vmatpush.msra.mxu1 %v4149_v0  ;;  %2270 = vmatpush.msra.mxu0 %v4174_v17 }
0x1302   :  { %v1503_v7 = vpop.f32.mrf.mxu0  ;;  %v1544_v24 = vpop.f32.mrf.mxu1 }
0x1303   :  { %v1651_v8 = vadd.f32 %v1650_v4, %v1544_v24 }
0x1305   :  { %v4214_v22 = vadd.f32 %v4211_v31, %v1651_v8 }
0x130a   :  { %v1506_v20 = vpop.f32.mrf.mxu0  ;;  %v1547_v28 = vpop.f32.mrf.mxu1 }
0x130b   :  { %v1613_v32 = vadd.f32 %v1612_v29, %v1506_v20  ;;  %v1654_v34 = vadd.f32 %v1653_v6, %v1547_v28  ;;  %v1610_v29 = vadd.f32 %v1609_v5, %v1503_v7 }
0x130d   :  { %v4216_v36 = vadd.f32 %v1676_v35, %v1613_v32  ;;  %v4219_v38 = vadd.f32 %v4211_v31, %v1654_v34 }
0x1312   :  { %v1509_v39 = vpop.f32.mrf.mxu0  ;;  %v1550_v40 = vpop.f32.mrf.mxu1 }
0x1313   :  { %v1616_v45 = vadd.f32 %v1615_v19, %v1509_v39  ;;  %v1657_v46 = vadd.f32 %v1656_v13, %v1550_v40  ;;  %v1680_v13 = vadd.f32 %v1676_v35, %v1610_v29 }
0x1315   :  { %v4221_v18 = vadd.f32 %v1676_v35, %v1616_v45  ;;  %v4224_v49 = vadd.f32 %v4211_v31, %v1657_v46 }
0x131a   :  { %v1512_v50 = vpop.f32.mrf.mxu0  ;;  %v1553_v51 = vpop.f32.mrf.mxu1 }
0x131b   :  { %v1619_v52 = vadd.f32 %v1618_v43, %v1512_v50  ;;  %v1660_v54 = vadd.f32 %v1659_v42, %v1553_v51 }
0x131d   :  { %v4226_v47 = vadd.f32 %v1676_v35, %v1619_v52  ;;  %v4229_v56 = vadd.f32 %v4211_v31, %v1660_v54 }
0x1322   :  { %v1515_v53 = vpop.f32.mrf.mxu0  ;;  %v1556_v30 = vpop.f32.mrf.mxu1 }
0x1323   :  { %v1622_v37 = vadd.f32 %v1621_v27, %v1515_v53  ;;  %v1663_v25 = vadd.f32 %v1662_v44, %v1556_v30 }
0x1325   :  { %v4232_v59 = vadd.f32 %v4211_v31, %v1663_v25  ;;  %v4234_v48 = vadd.f32 %v1676_v35, %v1622_v37 }
0x132a   :  { %v1518_v41 = vpop.f32.mrf.mxu0  ;;  %v1559_v61 = vpop.f32.mrf.mxu1 }
0x132b   :  { %v1625_v11 = vadd.f32 %v1624_v60, %v1518_v41  ;;  %v1666_v12 = vadd.f32 %v1665_v55, %v1559_v61 }
0x132d   :  { %v4237_v16 = vadd.f32 %v4211_v31, %v1666_v12  ;;  %v4239_v63 = vadd.f32 %v1676_v35, %v1625_v11 }
0x1332   :  { %v1521_v26 = vpop.f32.mrf.mxu0  ;;  %v1562_v58 = vpop.f32.mrf.mxu1 }
0x1333   :  { %v1628_v33 = vadd.f32 %v1627_v2, %v1521_v26  ;;  %v1669_v9 = vadd.f32 %v1668_v57, %v1562_v58 }
0x1335   :  { %v4242_v3 = vadd.f32 %v4211_v31, %v1669_v9  ;;  %v4244_v4 = vadd.f32 %v1676_v35, %v1628_v33 }
0x133a   :  { %v1524_v21 = vpop.f32.mrf.mxu0  ;;  %v1565_v6 = vpop.f32.mrf.mxu1 }
0x1341   :  { %v1630_v24 = vpop.f32.mrf.mxu2  ;;  %v1671_v8 = vpop.f32.mrf.mxu3 }
0x1342   :  { %v1631_v19 = vadd.f32 %v1630_v24, %v1524_v21  ;;  %v1672_v20 = vadd.f32 %v1671_v8, %v1565_v6  ;;  %v1739_v28 = vpop.f32.mrf.mxu0  ;;  %v1797_v34 = vpop.f32.mrf.mxu1 }
0x1343   :  { %v1742_v32 = vadd.f32 %v1739_v28, %v1680_v13 }
0x1344   :  { %v1695_v39 = vadd.f32 %v4211_v31, %v1672_v20  ;;  %v4247_v40 = vadd.f32 %v1676_v35, %v1631_v19 }
0x1345   :  { %3263 = vtanh.f32 %v1742_v32  ;;  %v3062_v7 = vmul.f32 -1.442695, %v1742_v32 }
0x1346   :  { %v1800_v42 = vadd.f32 %v1797_v34, %v1695_v39 }
0x1348   :  { %3265 = vtanh.f32 %v1800_v42  ;;  %v3063_v5 = vmul.f32 -1.442695, %v1800_v42 }
0x134a   :  { %3267 = vpow2.f32 %v3063_v5 }
0x134b   :  { %v3264_v43 = vpop.eup %3263  ;;  %3269 = vpow2.f32 %v3062_v7 }
0x134c   :  { %1765 = vrot.lane.b32.xlu0 %v3264_v43, %s3687_s4 }
0x134e   :  { %v3266_v45 = vpop.eup %3265 }
0x134f   :  { %1823 = vrot.lane.b32.xlu1 %v3266_v45, %s3687_s4 }
0x1350   :  { %v3268_v46 = vpop.eup %3267 }
0x1351   :  { %v1804_v50 = vadd.f32 1.0, %v3268_v46  ;;  %v3270_v51 = vpop.eup %3269 }
0x1352   :  { %v1746_v31 = vadd.f32 1.0, %v3270_v51 }
0x1353   :  { %3271 = vrcp.f32 %v1804_v50  ;;  %v1816_v25 = vand.u32 2147483648, %v1804_v50  ;;  %vm1810_vm6 = vweird.f32 %v1804_v50  ;;  %v1814_v55 = vand.u32 2147483647, %v1804_v50 }
0x1354   :  { %3273 = vrcp.f32 %v1746_v31  ;;  %v1758_v26 = vand.u32 2147483648, %v1746_v31  ;;  %vm1752_vm10 = vweird.f32 %v1746_v31  ;;  %v1756_v58 = vand.u32 2147483647, %v1746_v31 }
0x1355   :  { %v1817_v61 = vor.u32 1.1754944e-38, %v1816_v25  ;;  %vm1815_vm8 = vcmp.eq.f32.partialorder %v1814_v55, 8.507059e+37 }
0x1356   :  { %v1759_v9 = vor.u32 1.1754944e-38, %v1758_v26  ;;  %vm1757_vm12 = vcmp.eq.f32.partialorder %v1756_v58, 8.507059e+37 }
0x1359   :  { %v3272_v35 = vpop.eup %3271 }
0x135a   :  { %v1806_v52 = vmul.f32 %v3272_v35, %v1804_v50  ;;  %v3274_v44 = vpop.eup %3273  ;;  %vm1811_vm5 = vweird.f32 %v3272_v35 }
0x135b   :  { %v1748_v27 = vmul.f32 %v3274_v44, %v1746_v31  ;;  %vm1812_vm7 = vmor %vm1810_vm6, %vm1811_vm5  ;;  %vm1753_vm9 = vweird.f32 %v3274_v44 }
0x135c   :  { %v1807_v54 = vsub.f32 1.0, %v1806_v52  ;;  %vm1754_vm11 = vmor %vm1752_vm10, %vm1753_vm9 }
0x135d   :  { %v1749_v30 = vsub.f32 1.0, %v1748_v27 }
0x135e   :  { %v1808_v53 = vmul.f32 %v3272_v35, %v1807_v54 }
0x135f   :  { %v1750_v60 = vmul.f32 %v3274_v44, %v1749_v30 }
0x1360   :  { %v1809_v37 = vadd.f32 %v3272_v35, %v1808_v53 }
0x1361   :  { %v1751_v57 = vadd.f32 %v3274_v44, %v1750_v60 }
0x1362   :  { %v1813_v41 = vsel %vm1812_vm7, %v3272_v35, %v1809_v37 }
0x1363   :  { %v1818_v12 = vsel %vm1815_vm8, %v1817_v61, %v1813_v41  ;;  %v1755_v33 = vsel %vm1754_vm11, %v3274_v44, %v1751_v57 }
0x1364   :  { %v1760_v6 = vsel %vm1757_vm12, %v1759_v9, %v1755_v33  ;;  %v1821_v24 = vmul.f32 0.0, %v1818_v12 }
0x1365   :  { %v1763_v19 = vmul.f32 0.0, %v1760_v6 }
0x13be   :  { %v1766_v21 = vpop.permute.xlu0 %1765 }
0x13bf   :  { %v1768_v29 = vmul.f32 %v1766_v21, %v1760_v6 }
0x13c1   :  { %v1824_v11 = vpop.permute.xlu1 %1823 }
0x13c2   :  { %v1826_v2 = vmul.f32 %v1824_v11, %v1818_v12 }
0x13c4   :  { %1828 = vrot.lane.b32.xlu2 %v1826_v2, %s3688_s20 }
0x13cc   :  { %1770 = vrot.lane.b32.xlu2 %v1768_v29, %s3688_s20 }
0x141e   :  { %v1829_v8 = vpop.permute.xlu2 %1828 }
0x141f   :  { %v4253_v13 = vadd.f32 %v1829_v8, %v1821_v24 }
0x1421   :  { %3275 = vtanh.f32 %v4253_v13 }
0x1426   :  { %v1771_v20 = vpop.permute.xlu2 %1770 }
0x1427   :  { %v3276_v28 = vpop.eup %3275  ;;  %v4256_v32 = vadd.f32 %v1771_v20, %v1763_v19 }
0x1428   :  { %1834 = vrot.lane.b32.xlu1 %v3276_v28, %s3687_s4 }
0x1429   :  { %3277 = vtanh.f32 %v4256_v32 }
0x142f   :  { %v3278_v34 = vpop.eup %3277 }
0x1430   :  { %1776 = vrot.lane.b32.xlu1 %v3278_v34, %s3687_s4 }
0x149a   :  { %v1835_v39 = vpop.permute.xlu1 %1834 }
0x149b   :  { %v1837_v42 = vmul.f32 %v1835_v39, %v1818_v12 }
0x149d   :  { %1844 = vrot.lane.b32.xlu0 %v1837_v42, %s3688_s20 }
0x14a2   :  { %v1777_v43 = vpop.permute.xlu1 %1776 }
0x14a3   :  { %v1779_v45 = vmul.f32 %v1777_v43, %v1760_v6 }
0x14a5   :  { %1839 = vrot.lane.b32.xlu2 %v1779_v45, %s3688_s20 }
0x14ff   :  { %v1840_v5 = vpop.permute.xlu2 %1839 }
0x1500   :  { %1842 = vst.msk [vmem:[#allocation4] sm:$0xff] %vm223_vm0, %v1840_v5  ;;  %3064 = vmatmul.msk.f32.vlgmr.msra.gmra.mxu2 %vm223_vm0, %v1840_v5 }
0x1501   :  { %2401 = vmatpush.msra.mxu2 %v4161_v23 }
0x1503   :  { %2402 = vmatpush.msra.mxu2 %v4163_v1 }
0x1505   :  { %2403 = vmatpush.msra.mxu2 %v4169_v15 }
0x1507   :  { %2404 = vmatpush.msra.mxu2 %v4174_v17 }
0x150f   :  { %v1845_v7 = vpop.permute.xlu0 %1844 }
0x1510   :  { %1848 = vst.msk [vmem:[#allocation5 + $0x38] sm:$0xff] %vm223_vm0, %v1845_v7  ;;  %3066 = vmatmul.msk.f32.vlgmr.msra.gmra.mxu3 %vm223_vm0, %v1845_v7 }
0x1511   :  { %2461 = vmatpush.msra.mxu3 %v4130_v62 }
0x1513   :  { %2462 = vmatpush.msra.mxu3 %v4134_v10 }
0x1515   :  { %2463 = vmatpush.msra.mxu3 %v4141_v14 }
0x1517   :  { %2464 = vmatpush.msra.mxu3 %v4149_v0 }
0x1583   :  { %v1870_v46 = vpop.f32.mrf.mxu2 }
0x1584   :  { %v1873_v50 = vadd.f32 %v1870_v46, %v4216_v36 }
0x1586   :  { %3279 = vtanh.f32 %v1873_v50  ;;  %v3065_v44 = vmul.f32 -1.442695, %v1873_v50 }
0x158c   :  { %v3280_v51 = vpop.eup %3279 }
0x158d   :  { %1896 = vrot.lane.b32.xlu2 %v3280_v51, %s3687_s4 }
0x1593   :  { %v1930_v31 = vpop.f32.mrf.mxu3 }
0x1594   :  { %v1933_v35 = vadd.f32 %v1930_v31, %v4242_v3 }
0x1596   :  { %3281 = vtanh.f32 %v1933_v35  ;;  %v3067_v54 = vmul.f32 -1.442695, %v1933_v35 }
0x1598   :  { %3283 = vpow2.f32 %v3067_v54 }
0x1599   :  { %3285 = vpow2.f32 %v3065_v44 }
0x159c   :  { %v3282_v52 = vpop.eup %3281 }
0x159d   :  { %1956 = vrot.lane.b32.xlu0 %v3282_v52, %s3687_s4 }
0x159e   :  { %v3284_v27 = vpop.eup %3283 }
0x159f   :  { %v1937_v53 = vadd.f32 1.0, %v3284_v27  ;;  %v3286_v30 = vpop.eup %3285 }
0x15a0   :  { %v1877_v36 = vadd.f32 1.0, %v3286_v30 }
0x15a1   :  { %3287 = vrcp.f32 %v1937_v53  ;;  %v1949_v12 = vand.u32 2147483648, %v1937_v53  ;;  %vm1943_vm14 = vweird.f32 %v1937_v53  ;;  %v1947_v57 = vand.u32 2147483647, %v1937_v53 }
0x15a2   :  { %3289 = vrcp.f32 %v1877_v36  ;;  %v1889_v29 = vand.u32 2147483648, %v1877_v36  ;;  %vm1883_vm3 = vweird.f32 %v1877_v36  ;;  %v1887_v24 = vand.u32 2147483647, %v1877_v36 }
0x15a3   :  { %v1950_v58 = vor.u32 1.1754944e-38, %v1949_v12  ;;  %vm1948_vm1 = vcmp.eq.f32.partialorder %v1947_v57, 8.507059e+37 }
0x15a4   :  { %v1890_v20 = vor.u32 1.1754944e-38, %v1889_v29  ;;  %vm1888_vm5 = vcmp.eq.f32.partialorder %v1887_v24, 8.507059e+37 }
0x15a7   :  { %v3288_v37 = vpop.eup %3287 }
0x15a8   :  { %v1939_v25 = vmul.f32 %v3288_v37, %v1937_v53  ;;  %v3290_v60 = vpop.eup %3289  ;;  %vm1944_vm13 = vweird.f32 %v3288_v37 }
0x15a9   :  { %v1879_v41 = vmul.f32 %v3290_v60, %v1877_v36  ;;  %vm1945_vm15 = vmor %vm1943_vm14, %vm1944_vm13  ;;  %vm1884_vm2 = vweird.f32 %v3290_v60 }
0x15aa   :  { %v1940_v55 = vsub.f32 1.0, %v1939_v25  ;;  %vm1885_vm4 = vmor %vm1883_vm3, %vm1884_vm2 }
0x15ab   :  { %v1880_v61 = vsub.f32 1.0, %v1879_v41 }
0x15ac   :  { %v1941_v3 = vmul.f32 %v3288_v37, %v1940_v55 }
0x15ad   :  { %v1881_v2 = vmul.f32 %v3290_v60, %v1880_v61 }
0x15ae   :  { %v1942_v11 = vadd.f32 %v3288_v37, %v1941_v3 }
0x15af   :  { %v1882_v21 = vadd.f32 %v3290_v60, %v1881_v2 }
0x15b0   :  { %v1946_v26 = vsel %vm1945_vm15, %v3288_v37, %v1942_v11 }
0x15b1   :  { %v1951_v9 = vsel %vm1948_vm1, %v1950_v58, %v1946_v26  ;;  %v1886_v8 = vsel %vm1885_vm4, %v3290_v60, %v1882_v21 }
0x15b2   :  { %v1891_v28 = vsel %vm1888_vm5, %v1890_v20, %v1886_v8  ;;  %v1954_v39 = vmul.f32 %v1951_v9, %v4253_v13 }
0x15b3   :  { %v1894_v45 = vmul.f32 %v1891_v28, %v4256_v32 }
0x15e7   :  { %v1897_v19 = vpop.permute.xlu2 %1896 }
0x15e8   :  { %v1899_v34 = vmul.f32 %v1897_v19, %v1891_v28 }
0x160f   :  { %v1957_v33 = vpop.permute.xlu0 %1956 }
0x1610   :  { %v1959_v6 = vmul.f32 %v1957_v33, %v1951_v9 }
0x1612   :  { %1961 = vrot.lane.b32.xlu1 %v1959_v6, %s3688_s20 }
0x161a   :  { %1901 = vrot.lane.b32.xlu1 %v1899_v34, %s3688_s20 }
0x1684   :  { %v1962_v42 = vpop.permute.xlu1 %1961 }
0x1685   :  { %v4282_v43 = vadd.f32 %v1962_v42, %v1954_v39 }
0x1687   :  { %3291 = vtanh.f32 %v4282_v43 }
0x168c   :  { %v1902_v5 = vpop.permute.xlu1 %1901 }
0x168d   :  { %v3292_v7 = vpop.eup %3291  ;;  %v4286_v46 = vadd.f32 %v1902_v5, %v1894_v45 }
0x168e   :  { %1967 = vrot.lane.b32.xlu0 %v3292_v7, %s3687_s4 }
0x168f   :  { %3293 = vtanh.f32 %v4286_v46 }
0x1695   :  { %v3294_v50 = vpop.eup %3293 }
0x1696   :  { %1907 = vrot.lane.b32.xlu0 %v3294_v50, %s3687_s4 }
0x1700   :  { %v1968_v51 = vpop.permute.xlu0 %1967 }
0x1701   :  { %v1970_v13 = vmul.f32 %v1968_v51, %v1951_v9 }
0x1703   :  { %1978 = vrot.lane.b32.xlu2 %v1970_v13, %s3688_s20 }
0x1708   :  { %v1908_v31 = vpop.permute.xlu0 %1907 }
0x1709   :  { %v1910_v35 = vmul.f32 %v1908_v31, %v1891_v28 }
0x170b   :  { %1972 = vrot.lane.b32.xlu1 %v1910_v35, %s3688_s20 }
0x175d   :  { %v1979_v32 = vpop.permute.xlu2 %1978 }
0x175e   :  { %1982 = vst.msk [vmem:[#allocation5 + $0x30] sm:$0xff] %vm223_vm0, %v1979_v32  ;;  %3070 = vmatmul.msk.f32.vlgmr.msrb.gmra.mxu1 %vm223_vm0, %v1979_v32 }
0x175f   :  { %2595 = vmatpush.msrb.mxu1 %v4130_v62 }
0x1761   :  { %2596 = vmatpush.msrb.mxu1 %v4134_v10 }
0x1763   :  { %2597 = vmatpush.msrb.mxu1 %v4141_v14 }
0x1765   :  { %2598 = vmatpush.msrb.mxu1 %v4149_v0 }
0x177d   :  { %v1973_v52 = vpop.permute.xlu1 %1972 }
0x177e   :  { %1976 = vst.msk [vmem:[#allocation4 + $0x8] sm:$0xff] %vm223_vm0, %v1973_v52  ;;  %3068 = vmatmul.msk.f32.vlgmr.msrb.gmra.mxu0 %vm223_vm0, %v1973_v52 }
0x177f   :  { %2535 = vmatpush.msrb.mxu0 %v4161_v23 }
0x1781   :  { %2536 = vmatpush.msrb.mxu0 %v4163_v1 }
0x1783   :  { %2537 = vmatpush.msrb.mxu0 %v4169_v15 }
0x1785   :  { %2538 = vmatpush.msrb.mxu0 %v4174_v17 }
0x17db   :  { %v2064_v54 = vpop.f32.mrf.mxu1 }
0x17dc   :  { %v2067_v44 = vadd.f32 %v2064_v54, %v4237_v16 }
0x17de   :  { %3295 = vtanh.f32 %v2067_v44  ;;  %v3071_v37 = vmul.f32 -1.442695, %v2067_v44 }
0x17e4   :  { %v3296_v27 = vpop.eup %3295 }
0x17e5   :  { %2090 = vrot.lane.b32.xlu2 %v3296_v27, %s3687_s4 }
0x17fb   :  { %v2004_v53 = vpop.f32.mrf.mxu0 }
0x17fc   :  { %v2007_v30 = vadd.f32 %v2004_v53, %v4221_v18 }
0x17fe   :  { %3297 = vtanh.f32 %v2007_v30  ;;  %v3069_v33 = vmul.f32 -1.442695, %v2007_v30 }
0x17ff   :  { %3299 = vpow2.f32 %v3071_v37 }
0x1804   :  { %v3298_v36 = vpop.eup %3297 }
0x1805   :  { %2030 = vrot.lane.b32.xlu1 %v3298_v36, %s3687_s4  ;;  %v3300_v25 = vpop.eup %3299 }
0x1806   :  { %v2071_v55 = vadd.f32 1.0, %v3300_v25 }
0x1808   :  { %3301 = vrcp.f32 %v2071_v55  ;;  %v2083_v11 = vand.u32 2147483648, %v2071_v55  ;;  %vm2077_vm7 = vweird.f32 %v2071_v55  ;;  %v2081_v12 = vand.u32 2147483647, %v2071_v55 }
0x1809   :  { %3303 = vpow2.f32 %v3069_v33 }
0x180a   :  { %v2084_v57 = vor.u32 1.1754944e-38, %v2083_v11  ;;  %vm2082_vm9 = vcmp.eq.f32.partialorder %v2081_v12, 8.507059e+37 }
0x180e   :  { %v3302_v60 = vpop.eup %3301 }
0x180f   :  { %v2073_v41 = vmul.f32 %v3302_v60, %v2071_v55  ;;  %vm2078_vm6 = vweird.f32 %v3302_v60  ;;  %v3304_v9 = vpop.eup %3303 }
0x1810   :  { %vm2079_vm8 = vmor %vm2077_vm7, %vm2078_vm6  ;;  %v2011_v21 = vadd.f32 1.0, %v3304_v9 }
0x1811   :  { %v2074_v3 = vsub.f32 1.0, %v2073_v41 }
0x1812   :  { %3305 = vrcp.f32 %v2011_v21  ;;  %v2023_v20 = vand.u32 2147483648, %v2011_v21  ;;  %vm2017_vm11 = vweird.f32 %v2011_v21  ;;  %v2021_v28 = vand.u32 2147483647, %v2011_v21 }
0x1813   :  { %v2075_v16 = vmul.f32 %v3302_v60, %v2074_v3 }
0x1814   :  { %v2024_v39 = vor.u32 1.1754944e-38, %v2023_v20  ;;  %vm2022_vm13 = vcmp.eq.f32.partialorder %v2021_v28, 8.507059e+37 }
0x1815   :  { %v2076_v61 = vadd.f32 %v3302_v60, %v2075_v16 }
0x1817   :  { %v2080_v18 = vsel %vm2079_vm8, %v3302_v60, %v2076_v61 }
0x1818   :  { %v2085_v26 = vsel %vm2082_vm9, %v2084_v57, %v2080_v18  ;;  %v3306_v6 = vpop.eup %3305 }
0x1819   :  { %v2013_v29 = vmul.f32 %v3306_v6, %v2011_v21  ;;  %vm2018_vm10 = vweird.f32 %v3306_v6  ;;  %v2088_v7 = vmul.f32 %v2085_v26, %v4282_v43 }
0x181a   :  { %vm2019_vm12 = vmor %vm2017_vm11, %vm2018_vm10 }
0x181b   :  { %v2014_v24 = vsub.f32 1.0, %v2013_v29 }
0x181d   :  { %v2015_v8 = vmul.f32 %v3306_v6, %v2014_v24 }
0x181f   :  { %v2016_v19 = vadd.f32 %v3306_v6, %v2015_v8 }
0x1821   :  { %v2020_v34 = vsel %vm2019_vm12, %v3306_v6, %v2016_v19 }
0x1822   :  { %v2025_v45 = vsel %vm2022_vm13, %v2024_v39, %v2020_v34 }
0x1823   :  { %v2028_v31 = vmul.f32 %v2025_v45, %v4286_v46 }
0x183f   :  { %v2091_v2 = vpop.permute.xlu2 %2090 }
0x1840   :  { %v2093_v58 = vmul.f32 %v2091_v2, %v2085_v26 }
0x1842   :  { %2095 = vrot.lane.b32.xlu0 %v2093_v58, %s3688_s20 }
0x1877   :  { %v2031_v42 = vpop.permute.xlu1 %2030 }
0x1878   :  { %v2033_v5 = vmul.f32 %v2031_v42, %v2025_v45 }
0x187a   :  { %2035 = vrot.lane.b32.xlu0 %v2033_v5, %s3688_s20 }
0x18b4   :  { %v2096_v50 = vpop.permute.xlu0 %2095 }
0x18b5   :  { %v4312_v51 = vadd.f32 %v2096_v50, %v2088_v7 }
0x18b7   :  { %3307 = vtanh.f32 %v4312_v51 }
0x18bd   :  { %v3308_v13 = vpop.eup %3307 }
0x18be   :  { %2101 = vrot.lane.b32.xlu2 %v3308_v13, %s3687_s4 }
0x18ec   :  { %v2036_v35 = vpop.permute.xlu0 %2035 }
0x18ed   :  { %v4317_v32 = vadd.f32 %v2036_v35, %v2028_v31 }
0x18ef   :  { %3309 = vtanh.f32 %v4317_v32 }
0x18f5   :  { %v3310_v52 = vpop.eup %3309 }
0x18f6   :  { %2041 = vrot.lane.b32.xlu2 %v3310_v52, %s3687_s4 }
0x1918   :  { %v2102_v54 = vpop.permute.xlu2 %2101 }
0x1919   :  { %v2104_v43 = vmul.f32 %v2102_v54, %v2085_v26 }
0x191b   :  { %2112 = vrot.lane.b32.xlu1 %v2104_v43, %s3688_s20 }
0x1950   :  { %v2042_v44 = vpop.permute.xlu2 %2041 }
0x1951   :  { %v2044_v27 = vmul.f32 %v2042_v44, %v2025_v45 }
0x1953   :  { %2106 = vrot.lane.b32.xlu0 %v2044_v27, %s3688_s20 }
0x198d   :  { %v2113_v53 = vpop.permute.xlu1 %2112 }
0x198e   :  { %2116 = vst.msk [vmem:[#allocation5 + $0x28] sm:$0xff] %vm223_vm0, %v2113_v53  ;;  %3074 = vmatmul.msk.f32.vlgmr.msrb.gmra.mxu3 %vm223_vm0, %v2113_v53 }
0x198f   :  { %2729 = vmatpush.msrb.mxu3 %v4130_v62 }
0x1991   :  { %2730 = vmatpush.msrb.mxu3 %v4134_v10 }
0x1993   :  { %2731 = vmatpush.msrb.mxu3 %v4141_v14 }
0x1995   :  { %2732 = vmatpush.msrb.mxu3 %v4149_v0 }
0x19c5   :  { %v2107_v46 = vpop.permute.xlu0 %2106 }
0x19c6   :  { %2110 = vst.msk [vmem:[#allocation4 + $0x10] sm:$0xff] %vm223_vm0, %v2107_v46  ;;  %3072 = vmatmul.msk.f32.vlgmr.msrb.gmra.mxu2 %vm223_vm0, %v2107_v46 }
0x19c7   :  { %2669 = vmatpush.msrb.mxu2 %v4161_v23 }
0x19c9   :  { %2670 = vmatpush.msrb.mxu2 %v4163_v1 }
0x19cb   :  { %2671 = vmatpush.msrb.mxu2 %v4169_v15 }
0x19cd   :  { %2672 = vmatpush.msrb.mxu2 %v4174_v17 }
0x1a11   :  { %v2198_v62 = vpop.f32.mrf.mxu3 }
0x1a12   :  { %v2201_v10 = vadd.f32 %v2198_v62, %v4232_v59 }
0x1a14   :  { %3311 = vtanh.f32 %v2201_v10  ;;  %v3075_v23 = vmul.f32 -1.442695, %v2201_v10 }
0x1a1a   :  { %v3312_v14 = vpop.eup %3311 }
0x1a1b   :  { %2224 = vrot.lane.b32.xlu1 %v3312_v14, %s3687_s4 }
0x1a49   :  { %v2138_v0 = vpop.f32.mrf.mxu2 }
0x1a4a   :  { %v2141_v30 = vadd.f32 %v2138_v0, %v4226_v47 }
0x1a4c   :  { %3313 = vtanh.f32 %v2141_v30  ;;  %v3073_v12 = vmul.f32 -1.442695, %v2141_v30 }
0x1a4d   :  { %3315 = vpow2.f32 %v3075_v23 }
0x1a52   :  { %v3314_v36 = vpop.eup %3313 }
0x1a53   :  { %2164 = vrot.lane.b32.xlu0 %v3314_v36, %s3687_s4  ;;  %v3316_v1 = vpop.eup %3315 }
0x1a54   :  { %v2205_v15 = vadd.f32 1.0, %v3316_v1 }
0x1a56   :  { %3317 = vrcp.f32 %v2205_v15  ;;  %v2217_v60 = vand.u32 2147483648, %v2205_v15  ;;  %vm2211_vm15 = vweird.f32 %v2205_v15  ;;  %v2215_v41 = vand.u32 2147483647, %v2205_v15 }
0x1a57   :  { %3319 = vpow2.f32 %v3073_v12 }
0x1a58   :  { %v2218_v3 = vor.u32 1.1754944e-38, %v2217_v60  ;;  %vm2216_vm2 = vcmp.eq.f32.partialorder %v2215_v41, 8.507059e+37 }
0x1a5c   :  { %v3318_v17 = vpop.eup %3317 }
0x1a5d   :  { %v2207_v37 = vmul.f32 %v3318_v17, %v2205_v15  ;;  %vm2212_vm14 = vweird.f32 %v3318_v17  ;;  %v3320_v18 = vpop.eup %3319 }
0x1a5e   :  { %vm2213_vm1 = vmor %vm2211_vm15, %vm2212_vm14  ;;  %v2145_v57 = vadd.f32 1.0, %v3320_v18 }
0x1a5f   :  { %v2208_v25 = vsub.f32 1.0, %v2207_v37 }
0x1a60   :  { %3321 = vrcp.f32 %v2145_v57  ;;  %v2157_v21 = vand.u32 2147483648, %v2145_v57  ;;  %vm2151_vm4 = vweird.f32 %v2145_v57  ;;  %v2155_v6 = vand.u32 2147483647, %v2145_v57 }
0x1a61   :  { %v2209_v59 = vmul.f32 %v3318_v17, %v2208_v25 }
0x1a62   :  { %v2158_v24 = vor.u32 1.1754944e-38, %v2157_v21  ;;  %vm2156_vm6 = vcmp.eq.f32.partialorder %v2155_v6, 8.507059e+37 }
0x1a63   :  { %v2210_v55 = vadd.f32 %v3318_v17, %v2209_v59 }
0x1a65   :  { %v2214_v47 = vsel %vm2213_vm1, %v3318_v17, %v2210_v55 }
0x1a66   :  { %v2219_v61 = vsel %vm2216_vm2, %v2218_v3, %v2214_v47  ;;  %v3322_v2 = vpop.eup %3321 }
0x1a67   :  { %v2147_v26 = vmul.f32 %v3322_v2, %v2145_v57  ;;  %vm2152_vm3 = vweird.f32 %v3322_v2  ;;  %v2222_v28 = vmul.f32 %v2219_v61, %v4312_v51 }
0x1a68   :  { %vm2153_vm5 = vmor %vm2151_vm4, %vm2152_vm3 }
0x1a69   :  { %v2148_v58 = vsub.f32 1.0, %v2147_v26 }
0x1a6b   :  { %v2149_v33 = vmul.f32 %v3322_v2, %v2148_v58 }
0x1a6d   :  { %v2150_v9 = vadd.f32 %v3322_v2, %v2149_v33 }
0x1a6f   :  { %v2154_v29 = vsel %vm2153_vm5, %v3322_v2, %v2150_v9 }
0x1a70   :  { %v2159_v19 = vsel %vm2156_vm6, %v2158_v24, %v2154_v29 }
0x1a71   :  { %v2162_v45 = vmul.f32 %v2159_v19, %v4317_v32 }
0x1a8d   :  { %v2225_v16 = vpop.permute.xlu1 %2224 }
0x1a8e   :  { %v2227_v11 = vmul.f32 %v2225_v16, %v2219_v61 }
0x1a90   :  { %2229 = vrot.lane.b32.xlu2 %v2227_v11, %s3688_s20 }
0x1ac5   :  { %v2165_v8 = vpop.permute.xlu0 %2164 }
0x1ac6   :  { %v2167_v20 = vmul.f32 %v2165_v8, %v2159_v19 }
0x1ac8   :  { %2169 = vrot.lane.b32.xlu2 %v2167_v20, %s3688_s20 }
0x1aea   :  { %v2230_v34 = vpop.permute.xlu2 %2229 }
0x1aeb   :  { %v4342_v39 = vadd.f32 %v2230_v34, %v2222_v28 }
0x1aed   :  { %3323 = vtanh.f32 %v4342_v39 }
0x1af3   :  { %v3324_v42 = vpop.eup %3323 }
0x1af4   :  { %2235 = vrot.lane.b32.xlu1 %v3324_v42, %s3687_s4 }
0x1b22   :  { %v2170_v5 = vpop.permute.xlu2 %2169 }
0x1b23   :  { %v4347_v7 = vadd.f32 %v2170_v5, %v2162_v45 }
0x1b25   :  { %3325 = vtanh.f32 %v4347_v7 }
0x1b2b   :  { %v3326_v50 = vpop.eup %3325 }
0x1b2c   :  { %2175 = vrot.lane.b32.xlu1 %v3326_v50, %s3687_s4 }
0x1b66   :  { %v2236_v13 = vpop.permute.xlu1 %2235 }
0x1b67   :  { %v2238_v51 = vmul.f32 %v2236_v13, %v2219_v61 }
0x1b69   :  { %2246 = vrot.lane.b32.xlu0 %v2238_v51, %s3688_s20 }
0x1b9e   :  { %v2176_v31 = vpop.permute.xlu1 %2175 }
0x1b9f   :  { %v2178_v35 = vmul.f32 %v2176_v31, %v2159_v19 }
0x1ba1   :  { %2240 = vrot.lane.b32.xlu2 %v2178_v35, %s3688_s20 }
0x1bdb   :  { %v2247_v52 = vpop.permute.xlu0 %2246 }
0x1bdc   :  { %2250 = vst.msk [vmem:[#allocation5 + $0x20] sm:$0xff] %vm223_vm0, %v2247_v52  ;;  %3078 = vmatmul.msk.f32.vlgmr.msra.gmra.mxu1 %vm223_vm0, %v2247_v52 }
0x1bfb   :  { %v2241_v32 = vpop.permute.xlu2 %2240 }
0x1bfc   :  { %2244 = vst.msk [vmem:[#allocation4 + $0x18] sm:$0xff] %vm223_vm0, %v2241_v32  ;;  %3076 = vmatmul.msk.f32.vlgmr.msra.gmra.mxu0 %vm223_vm0, %v2241_v32 }
0x1c59   :  { %v2332_v54 = vpop.f32.mrf.mxu1 }
0x1c5a   :  { %v2335_v43 = vadd.f32 %v2332_v54, %v4229_v56 }
0x1c5c   :  { %3327 = vtanh.f32 %v2335_v43  ;;  %v3079_v62 = vmul.f32 -1.442695, %v2335_v43 }
0x1c62   :  { %v3328_v44 = vpop.eup %3327 }
0x1c63   :  { %2358 = vrot.lane.b32.xlu0 %v3328_v44, %s3687_s4 }
0x1c79   :  { %v2272_v27 = vpop.f32.mrf.mxu0 }
0x1c7a   :  { %v2275_v53 = vadd.f32 %v2272_v27, %v4234_v48 }
0x1c7c   :  { %3329 = vtanh.f32 %v2275_v53  ;;  %v3077_v10 = vmul.f32 -1.442695, %v2275_v53 }
0x1c7d   :  { %3331 = vpow2.f32 %v3079_v62 }
0x1c7e   :  { %3333 = vpow2.f32 %v3077_v10 }
0x1c82   :  { %v3330_v46 = vpop.eup %3329 }
0x1c83   :  { %2298 = vrot.lane.b32.xlu2 %v3330_v46, %s3687_s4  ;;  %v3332_v14 = vpop.eup %3331 }
0x1c84   :  { %v2339_v0 = vadd.f32 1.0, %v3332_v14  ;;  %v3334_v30 = vpop.eup %3333 }
0x1c85   :  { %v2279_v56 = vadd.f32 1.0, %v3334_v30 }
0x1c86   :  { %3335 = vrcp.f32 %v2339_v0  ;;  %v2351_v59 = vand.u32 2147483648, %v2339_v0  ;;  %vm2345_vm8 = vweird.f32 %v2339_v0  ;;  %v2349_v55 = vand.u32 2147483647, %v2339_v0 }
0x1c87   :  { %3337 = vrcp.f32 %v2279_v56  ;;  %v2291_v12 = vand.u32 2147483648, %v2279_v56  ;;  %vm2285_vm12 = vweird.f32 %v2279_v56  ;;  %v2289_v18 = vand.u32 2147483647, %v2279_v56 }
0x1c88   :  { %v2352_v47 = vor.u32 1.1754944e-38, %v2351_v59  ;;  %vm2350_vm10 = vcmp.eq.f32.partialorder %v2349_v55, 8.507059e+37 }
0x1c89   :  { %v2292_v2 = vor.u32 1.1754944e-38, %v2291_v12  ;;  %vm2290_vm14 = vcmp.eq.f32.partialorder %v2289_v18, 8.507059e+37 }
0x1c8c   :  { %v3336_v36 = vpop.eup %3335 }
0x1c8d   :  { %v2341_v23 = vmul.f32 %v3336_v36, %v2339_v0  ;;  %v3338_v15 = vpop.eup %3337  ;;  %vm2346_vm7 = vweird.f32 %v3336_v36 }
0x1c8e   :  { %v2281_v48 = vmul.f32 %v3338_v15, %v2279_v56  ;;  %vm2347_vm9 = vmor %vm2345_vm8, %vm2346_vm7  ;;  %vm2286_vm11 = vweird.f32 %v3338_v15 }
0x1c8f   :  { %v2342_v1 = vsub.f32 1.0, %v2341_v23  ;;  %vm2287_vm13 = vmor %vm2285_vm12, %vm2286_vm11 }
0x1c90   :  { %v2282_v25 = vsub.f32 1.0, %v2281_v48 }
0x1c91   :  { %v2343_v17 = vmul.f32 %v3336_v36, %v2342_v1 }
0x1c92   :  { %v2283_v41 = vmul.f32 %v3338_v15, %v2282_v25 }
0x1c93   :  { %v2344_v37 = vadd.f32 %v3336_v36, %v2343_v17 }
0x1c94   :  { %v2284_v11 = vadd.f32 %v3338_v15, %v2283_v41 }
0x1c95   :  { %v2348_v60 = vsel %vm2347_vm9, %v3336_v36, %v2344_v37 }
0x1c96   :  { %v2353_v16 = vsel %vm2350_vm10, %v2352_v47, %v2348_v60  ;;  %v2288_v57 = vsel %vm2287_vm13, %v3338_v15, %v2284_v11 }
0x1c97   :  { %v2293_v58 = vsel %vm2290_vm14, %v2292_v2, %v2288_v57  ;;  %v2356_v9 = vmul.f32 %v2353_v16, %v4342_v39 }
0x1c98   :  { %v2296_v29 = vmul.f32 %v2293_v58, %v4347_v7 }
0x1cd5   :  { %v2359_v3 = vpop.permute.xlu0 %2358 }
0x1cd6   :  { %v2361_v61 = vmul.f32 %v2359_v3, %v2353_v16 }
0x1cd8   :  { %2363 = vrot.lane.b32.xlu1 %v2361_v61, %s3688_s20 }
0x1cdd   :  { %v2299_v26 = vpop.permute.xlu2 %2298 }
0x1cde   :  { %v2301_v33 = vmul.f32 %v2299_v26, %v2293_v58 }
0x1ce0   :  { %2303 = vrot.lane.b32.xlu1 %v2301_v33, %s3688_s20 }
0x1d4a   :  { %v2364_v21 = vpop.permute.xlu1 %2363 }
0x1d4b   :  { %v4364_v6 = vadd.f32 %v2364_v21, %v2356_v9 }
0x1d4d   :  { %3339 = vtanh.f32 %v4364_v6 }
0x1d52   :  { %v2304_v24 = vpop.permute.xlu1 %2303 }
0x1d53   :  { %v3340_v8 = vpop.eup %3339  ;;  %v4368_v19 = vadd.f32 %v2304_v24, %v2296_v29  ;;  %v2796_v29 = vld [vmem:[#allocation21 + $0x10] sm:$0xff]  ;;  %v2795_v24 = vld [vmem:[#allocation21 + $0x8] sm:$0xff] }
0x1d54   :  { %2369 = vrot.lane.b32.xlu0 %v3340_v8, %s3687_s4  ;;  %v2794_v8 = vld [vmem:[#allocation21] sm:$0xff] }
0x1d55   :  { %3341 = vtanh.f32 %v4368_v19 }
0x1d5b   :  { %v3342_v20 = vpop.eup %3341 }
0x1d5c   :  { %2309 = vrot.lane.b32.xlu0 %v3342_v20, %s3687_s4  ;;  %v2786_v20 = vld [vmem:[#allocation4] sm:$0xff] }
0x1dc6   :  { %v2370_v28 = vpop.permute.xlu0 %2369 }
0x1dc7   :  { %v2372_v34 = vmul.f32 %v2370_v28, %v2353_v16  ;;  %v2787_v28 = vld [vmem:[#allocation4 + $0x8] sm:$0xff] }
0x1dc9   :  { %2380 = vrot.lane.b32.xlu2 %v2372_v34, %s3688_s20  ;;  %v2788_v34 = vld [vmem:[#allocation4 + $0x10] sm:$0xff] }
0x1dce   :  { %v2310_v39 = vpop.permute.xlu0 %2309 }
0x1dcf   :  { %v2312_v42 = vmul.f32 %v2310_v39, %v2293_v58  ;;  %v2789_v39 = vld [vmem:[#allocation4 + $0x18] sm:$0xff] }
0x1dd1   :  { %2374 = vrot.lane.b32.xlu1 %v2312_v42, %s3688_s20 }
0x1e23   :  { %v2381_v45 = vpop.permute.xlu2 %2380 }
0x1e24   :  { %2384 = vst.msk [vmem:[#allocation5 + $0x18] sm:$0xff] %vm223_vm0, %v2381_v45  ;;  %3082 = vmatmul.msk.f32.vlgmr.msra.gmra.mxu3 %vm223_vm0, %v2381_v45 }
0x1e43   :  { %v2375_v5 = vpop.permute.xlu1 %2374 }
0x1e44   :  { %2378 = vst.msk [vmem:[#allocation4 + $0x20] sm:$0xff] %vm223_vm0, %v2375_v5  ;;  %3080 = vmatmul.msk.f32.vlgmr.msra.gmra.mxu2 %vm223_vm0, %v2375_v5 }
0x1e4b   :  { %v2790_v42 = vld [vmem:[#allocation4 + $0x20] sm:$0xff] }
0x1ea7   :  { %v2466_v7 = vpop.f32.mrf.mxu3 }
0x1ea8   :  { %v2469_v50 = vadd.f32 %v2466_v7, %v4224_v49 }
0x1eaa   :  { %3343 = vtanh.f32 %v2469_v50  ;;  %v3083_v52 = vmul.f32 -1.442695, %v2469_v50 }
0x1eb0   :  { %v3344_v13 = vpop.eup %3343 }
0x1eb1   :  { %2492 = vrot.lane.b32.xlu2 %v3344_v13, %s3687_s4 }
0x1ec7   :  { %v2406_v51 = vpop.f32.mrf.mxu2 }
0x1ec8   :  { %v2409_v31 = vadd.f32 %v2406_v51, %v4239_v63 }
0x1eca   :  { %3345 = vtanh.f32 %v2409_v31  ;;  %v3081_v56 = vmul.f32 -1.442695, %v2409_v31 }
0x1ecb   :  { %3347 = vpow2.f32 %v3083_v52 }
0x1ed0   :  { %v3346_v35 = vpop.eup %3345 }
0x1ed1   :  { %2432 = vrot.lane.b32.xlu1 %v3346_v35, %s3687_s4  ;;  %v3348_v32 = vpop.eup %3347 }
0x1ed2   :  { %v2473_v54 = vadd.f32 1.0, %v3348_v32 }
0x1ed4   :  { %3349 = vrcp.f32 %v2473_v54  ;;  %v2485_v46 = vand.u32 2147483648, %v2473_v54  ;;  %vm2479_vm1 = vweird.f32 %v2473_v54  ;;  %v2483_v62 = vand.u32 2147483647, %v2473_v54 }
0x1ed5   :  { %3351 = vpow2.f32 %v3081_v56 }
0x1ed6   :  { %v2486_v10 = vor.u32 1.1754944e-38, %v2485_v46  ;;  %vm2484_vm3 = vcmp.eq.f32.partialorder %v2483_v62, 8.507059e+37 }
0x1eda   :  { %v3350_v43 = vpop.eup %3349 }
0x1edb   :  { %v2475_v44 = vmul.f32 %v3350_v43, %v2473_v54  ;;  %vm2480_vm15 = vweird.f32 %v3350_v43  ;;  %v3352_v36 = vpop.eup %3351 }
0x1edc   :  { %vm2481_vm2 = vmor %vm2479_vm1, %vm2480_vm15  ;;  %v2413_v23 = vadd.f32 1.0, %v3352_v36 }
0x1edd   :  { %v2476_v27 = vsub.f32 1.0, %v2475_v44 }
0x1ede   :  { %3353 = vrcp.f32 %v2413_v23  ;;  %v2425_v25 = vand.u32 2147483648, %v2413_v23  ;;  %vm2419_vm5 = vweird.f32 %v2413_v23  ;;  %v2423_v59 = vand.u32 2147483647, %v2413_v23 }
0x1edf   :  { %v2477_v49 = vmul.f32 %v3350_v43, %v2476_v27 }
0x1ee0   :  { %v2426_v60 = vor.u32 1.1754944e-38, %v2425_v25  ;;  %vm2424_vm7 = vcmp.eq.f32.partialorder %v2423_v59, 8.507059e+37 }
0x1ee1   :  { %v2478_v53 = vadd.f32 %v3350_v43, %v2477_v49 }
0x1ee3   :  { %v2482_v63 = vsel %vm2481_vm2, %v3350_v43, %v2478_v53 }
0x1ee4   :  { %v2487_v0 = vsel %vm2484_vm3, %v2486_v10, %v2482_v63  ;;  %v3354_v1 = vpop.eup %3353 }
0x1ee5   :  { %v2415_v15 = vmul.f32 %v3354_v1, %v2413_v23  ;;  %vm2420_vm4 = vweird.f32 %v3354_v1  ;;  %v2490_v16 = vmul.f32 %v2487_v0, %v4364_v6  ;;  %v2797_v6 = vld [vmem:[#allocation21 + $0x18] sm:$0xff] }
0x1ee6   :  { %vm2421_vm6 = vmor %vm2419_vm5, %vm2420_vm4  ;;  %2911 = vmatpush.msra.mxu1 %v2797_v6 }
0x1ee7   :  { %v2416_v17 = vsub.f32 1.0, %v2415_v15 }
0x1ee8   :  { %2912 = vmatpush.msra.mxu1 %v2796_v29 }
0x1ee9   :  { %v2417_v48 = vmul.f32 %v3354_v1, %v2416_v17 }
0x1eea   :  { %2913 = vmatpush.msra.mxu1 %v2795_v24 }
0x1eeb   :  { %v2418_v37 = vadd.f32 %v3354_v1, %v2417_v48 }
0x1eec   :  { %2914 = vmatpush.msra.mxu1 %v2794_v8 }
0x1eed   :  { %v2422_v55 = vsel %vm2421_vm6, %v3354_v1, %v2418_v37 }
0x1eee   :  { %v2427_v47 = vsel %vm2424_vm7, %v2426_v60, %v2422_v55 }
0x1eef   :  { %v2430_v18 = vmul.f32 %v2427_v47, %v4368_v19 }
0x1f0b   :  { %v2493_v14 = vpop.permute.xlu2 %2492 }
0x1f0c   :  { %v2495_v30 = vmul.f32 %v2493_v14, %v2487_v0 }
0x1f0e   :  { %2497 = vrot.lane.b32.xlu0 %v2495_v30, %s3688_s20 }
0x1f43   :  { %v2433_v41 = vpop.permute.xlu1 %2432 }
0x1f44   :  { %v2435_v3 = vmul.f32 %v2433_v41, %v2427_v47 }
0x1f46   :  { %2437 = vrot.lane.b32.xlu0 %v2435_v3, %s3688_s20 }
0x1f80   :  { %v2498_v61 = vpop.permute.xlu0 %2497 }
0x1f81   :  { %v4386_v11 = vadd.f32 %v2498_v61, %v2490_v16 }
0x1f83   :  { %3355 = vtanh.f32 %v4386_v11 }
0x1f89   :  { %v3356_v12 = vpop.eup %3355 }
0x1f8a   :  { %2503 = vrot.lane.b32.xlu2 %v3356_v12, %s3687_s4 }
0x1fb8   :  { %v2438_v57 = vpop.permute.xlu0 %2437 }
0x1fb9   :  { %v4391_v2 = vadd.f32 %v2438_v57, %v2430_v18 }
0x1fbb   :  { %3357 = vtanh.f32 %v4391_v2 }
0x1fc1   :  { %v3358_v26 = vpop.eup %3357 }
0x1fc2   :  { %2443 = vrot.lane.b32.xlu2 %v3358_v26, %s3687_s4 }
0x1fe4   :  { %v2504_v58 = vpop.permute.xlu2 %2503 }
0x1fe5   :  { %v2506_v33 = vmul.f32 %v2504_v58, %v2487_v0 }
0x1fe7   :  { %2514 = vrot.lane.b32.xlu1 %v2506_v33, %s3688_s20 }
0x201c   :  { %v2444_v9 = vpop.permute.xlu2 %2443 }
0x201d   :  { %v2446_v21 = vmul.f32 %v2444_v9, %v2427_v47 }
0x201f   :  { %2508 = vrot.lane.b32.xlu0 %v2446_v21, %s3688_s20 }
0x2059   :  { %v2515_v19 = vpop.permute.xlu1 %2514 }
0x205a   :  { %2518 = vst.msk [vmem:[#allocation5 + $0x10] sm:$0xff] %vm223_vm0, %v2515_v19  ;;  %3086 = vmatmul.msk.f32.vlgmr.msrb.gmra.mxu1 %vm223_vm0, %v2515_v19 }
0x2062   :  { %3100 = vmatmul.msk.f32.vlgmr.msra.gmra.mxu1 %vm223_vm0, %v2786_v20 }
0x206a   :  { %3101 = vmatmul.msk.f32.gmra.mxu1 %vm223_vm0, %v2787_v28 }
0x2072   :  { %3102 = vmatmul.msk.f32.gmra.mxu1 %vm223_vm0, %v2788_v34 }
0x207a   :  { %3103 = vmatmul.msk.f32.gmra.mxu1 %vm223_vm0, %v2789_v39 }
0x2082   :  { %3104 = vmatmul.msk.f32.gmra.mxu1 %vm223_vm0, %v2790_v42 }
0x2091   :  { %v2509_v45 = vpop.permute.xlu0 %2508 }
0x2092   :  { %2512 = vst.msk [vmem:[#allocation4 + $0x28] sm:$0xff] %vm223_vm0, %v2509_v45  ;;  %3084 = vmatmul.msk.f32.vlgmr.msrb.gmra.mxu0 %vm223_vm0, %v2509_v45 }
0x2099   :  { %v2791_v5 = vld [vmem:[#allocation4 + $0x28] sm:$0xff] }
0x209a   :  { %3105 = vmatmul.msk.f32.gmra.mxu1 %vm223_vm0, %v2791_v5 }
0x20d7   :  { %v2600_v7 = vpop.f32.mrf.mxu1 }
0x20d8   :  { %v2603_v50 = vadd.f32 %v2600_v7, %v4219_v38 }
0x20da   :  { %3359 = vtanh.f32 %v2603_v50  ;;  %v3087_v52 = vmul.f32 -1.442695, %v2603_v50 }
0x20e0   :  { %v3360_v13 = vpop.eup %3359 }
0x20e1   :  { %2626 = vrot.lane.b32.xlu1 %v3360_v13, %s3687_s4 }
0x210f   :  { %v2540_v51 = vpop.f32.mrf.mxu0 }
0x2110   :  { %v2543_v31 = vadd.f32 %v2540_v51, %v4244_v4 }
0x2112   :  { %3361 = vtanh.f32 %v2543_v31  ;;  %v3085_v0 = vmul.f32 -1.442695, %v2543_v31 }
0x2113   :  { %3363 = vpow2.f32 %v3087_v52 }
0x2118   :  { %v3362_v35 = vpop.eup %3361 }
0x2119   :  { %2566 = vrot.lane.b32.xlu0 %v3362_v35, %s3687_s4  ;;  %v3364_v32 = vpop.eup %3363 }
0x211a   :  { %v2607_v54 = vadd.f32 1.0, %v3364_v32 }
0x211c   :  { %3365 = vrcp.f32 %v2607_v54  ;;  %v2619_v53 = vand.u32 2147483648, %v2607_v54  ;;  %vm2613_vm9 = vweird.f32 %v2607_v54  ;;  %v2617_v46 = vand.u32 2147483647, %v2607_v54 }
0x211d   :  { %3367 = vpow2.f32 %v3085_v0 }
0x211e   :  { %v2620_v62 = vor.u32 1.1754944e-38, %v2619_v53  ;;  %vm2618_vm11 = vcmp.eq.f32.partialorder %v2617_v46, 8.507059e+37 }
0x2122   :  { %v3366_v43 = vpop.eup %3365 }
0x2123   :  { %v2609_v44 = vmul.f32 %v3366_v43, %v2607_v54  ;;  %vm2614_vm8 = vweird.f32 %v3366_v43  ;;  %v3368_v30 = vpop.eup %3367 }
0x2124   :  { %vm2615_vm10 = vmor %vm2613_vm9, %vm2614_vm8  ;;  %v2547_v56 = vadd.f32 1.0, %v3368_v30 }
0x2125   :  { %v2610_v27 = vsub.f32 1.0, %v2609_v44 }
0x2126   :  { %3369 = vrcp.f32 %v2547_v56  ;;  %v2559_v48 = vand.u32 2147483648, %v2547_v56  ;;  %vm2553_vm13 = vweird.f32 %v2547_v56  ;;  %v2557_v37 = vand.u32 2147483647, %v2547_v56 }
0x2127   :  { %v2611_v38 = vmul.f32 %v3366_v43, %v2610_v27 }
0x2128   :  { %v2560_v59 = vor.u32 1.1754944e-38, %v2559_v48  ;;  %vm2558_vm15 = vcmp.eq.f32.partialorder %v2557_v37, 8.507059e+37 }
0x2129   :  { %v2612_v49 = vadd.f32 %v3366_v43, %v2611_v38 }
0x212b   :  { %v2616_v4 = vsel %vm2615_vm10, %v3366_v43, %v2612_v49 }
0x212c   :  { %v2621_v10 = vsel %vm2618_vm11, %v2620_v62, %v2616_v4  ;;  %v3370_v36 = vpop.eup %3369 }
0x212d   :  { %v2549_v23 = vmul.f32 %v3370_v36, %v2547_v56  ;;  %vm2554_vm12 = vweird.f32 %v3370_v36  ;;  %v2624_v47 = vmul.f32 %v2621_v10, %v4386_v11 }
0x212e   :  { %vm2555_vm14 = vmor %vm2553_vm13, %vm2554_vm12 }
0x212f   :  { %v2550_v1 = vsub.f32 1.0, %v2549_v23 }
0x2131   :  { %v2551_v15 = vmul.f32 %v3370_v36, %v2550_v1 }
0x2133   :  { %v2552_v17 = vadd.f32 %v3370_v36, %v2551_v15 }
0x2135   :  { %v2556_v25 = vsel %vm2555_vm14, %v3370_v36, %v2552_v17 }
0x2136   :  { %v2561_v60 = vsel %vm2558_vm15, %v2560_v59, %v2556_v25 }
0x2137   :  { %v2564_v12 = vmul.f32 %v2561_v60, %v4391_v2 }
0x2153   :  { %v2627_v63 = vpop.permute.xlu1 %2626 }
0x2154   :  { %v2629_v14 = vmul.f32 %v2627_v63, %v2621_v10 }
0x2156   :  { %2631 = vrot.lane.b32.xlu2 %v2629_v14, %s3688_s20 }
0x218b   :  { %v2567_v55 = vpop.permute.xlu0 %2566 }
0x218c   :  { %v2569_v41 = vmul.f32 %v2567_v55, %v2561_v60 }
0x218e   :  { %2571 = vrot.lane.b32.xlu2 %v2569_v41, %s3688_s20  ;;  %v2809_v41 = vld [vmem:[#allocation22 + $0x18] sm:$0xff] }
0x218f   :  { %2846 = vmatpush.msra.mxu0 %v2809_v41 }
0x21b0   :  { %v2632_v3 = vpop.permute.xlu2 %2631 }
0x21b1   :  { %v4414_v16 = vadd.f32 %v2632_v3, %v2624_v47  ;;  %v2808_v47 = vld [vmem:[#allocation22 + $0x10] sm:$0xff]  ;;  %v2807_v3 = vld [vmem:[#allocation22 + $0x8] sm:$0xff] }
0x21b2   :  { %2847 = vmatpush.msra.mxu0 %v2808_v47 }
0x21b3   :  { %3371 = vtanh.f32 %v4414_v16 }
0x21b4   :  { %2848 = vmatpush.msra.mxu0 %v2807_v3 }
0x21b9   :  { %v3372_v61 = vpop.eup %3371 }
0x21ba   :  { %2637 = vrot.lane.b32.xlu1 %v3372_v61, %s3687_s4 }
0x21e8   :  { %v2572_v18 = vpop.permute.xlu2 %2571 }
0x21e9   :  { %v4419_v57 = vadd.f32 %v2572_v18, %v2564_v12 }
0x21eb   :  { %3373 = vtanh.f32 %v4419_v57 }
0x21f1   :  { %v3374_v26 = vpop.eup %3373 }
0x21f2   :  { %2577 = vrot.lane.b32.xlu1 %v3374_v26, %s3687_s4 }
0x222c   :  { %v2638_v58 = vpop.permute.xlu1 %2637 }
0x222d   :  { %v2640_v11 = vmul.f32 %v2638_v58, %v2621_v10  ;;  %v2801_v58 = vld [vmem:[#allocation5 + $0x18] sm:$0xff] }
0x222f   :  { %2648 = vrot.lane.b32.xlu0 %v2640_v11, %s3688_s20  ;;  %v2802_v11 = vld [vmem:[#allocation5 + $0x20] sm:$0xff] }
0x2264   :  { %v2578_v33 = vpop.permute.xlu1 %2577 }
0x2265   :  { %v2580_v9 = vmul.f32 %v2578_v33, %v2561_v60 }
0x2267   :  { %2642 = vrot.lane.b32.xlu2 %v2580_v9, %s3688_s20  ;;  %v2803_v9 = vld [vmem:[#allocation5 + $0x28] sm:$0xff] }
0x22a1   :  { %v2649_v21 = vpop.permute.xlu0 %2648 }
0x22a2   :  { %2652 = vst.msk [vmem:[#allocation5 + $0x8] sm:$0xff] %vm223_vm0, %v2649_v21  ;;  %3090 = vmatmul.msk.f32.vlgmr.msrb.gmra.mxu3 %vm223_vm0, %v2649_v21  ;;  %v2804_v21 = vld [vmem:[#allocation5 + $0x30] sm:$0xff] }
0x22a9   :  { %v2799_v18 = vld [vmem:[#allocation5 + $0x8] sm:$0xff] }
0x22c1   :  { %v2643_v2 = vpop.permute.xlu2 %2642 }
0x22c2   :  { %2646 = vst.msk [vmem:[#allocation4 + $0x30] sm:$0xff] %vm223_vm0, %v2643_v2  ;;  %3088 = vmatmul.msk.f32.vlgmr.msrb.gmra.mxu2 %vm223_vm0, %v2643_v2  ;;  %v2805_v2 = vld [vmem:[#allocation5 + $0x38] sm:$0xff] }
0x22c9   :  { %v2792_v6 = vld [vmem:[#allocation4 + $0x30] sm:$0xff] }
0x22ca   :  { %3106 = vmatmul.msk.f32.gmra.mxu1 %vm223_vm0, %v2792_v6  ;;  %v2916_v6 = vpop.f32.mrf.mxu1 }
0x2325   :  { %v2734_v29 = vpop.f32.mrf.mxu3 }
0x2326   :  { %v2737_v24 = vadd.f32 %v2734_v29, %v4214_v22  ;;  %v3134_v29 = vld [vmem:[%s4474_s12] ss:$0 sm:$0xff]  ;;  %s3689_s12 = smov [#allocation24]  }
0x2327   :  { %s2964_s24 = sshll.u32 %s3689_s12, 4  ;;  %s2965_s24 = int_to_ptr.vmem [resolvable:$true] %s2964_s24 }
0x2328   :  { %3375 = vtanh.f32 %v2737_v24  ;;  %v3091_v34 = vmul.f32 -1.442695, %v2737_v24 }
0x232e   :  { %v3376_v8 = vpop.eup %3375 }
0x232f   :  { %2760 = vrot.lane.b32.xlu0 %v3376_v8, %s3687_s4 }
0x2345   :  { %v2674_v19 = vpop.f32.mrf.mxu2 }
0x2346   :  { %v2677_v20 = vadd.f32 %v2674_v19, %v4247_v40  ;;  %v2919_v19 = vpop.f32.mrf.mxu1 }
0x2348   :  { %3377 = vtanh.f32 %v2677_v20  ;;  %v3089_v39 = vmul.f32 -1.442695, %v2677_v20 }
0x2349   :  { %3379 = vpow2.f32 %v3091_v34 }
0x234a   :  { %3381 = vpow2.f32 %v3089_v39 }
0x234e   :  { %v3378_v28 = vpop.eup %3377 }
0x234f   :  { %2700 = vrot.lane.b32.xlu2 %v3378_v28, %s3687_s4  ;;  %v3380_v42 = vpop.eup %3379 }
0x2350   :  { %v2741_v45 = vadd.f32 1.0, %v3380_v42  ;;  %v3382_v5 = vpop.eup %3381  ;;  %v2922_v42 = vpop.f32.mrf.mxu1 }
0x2351   :  { %v2681_v22 = vadd.f32 1.0, %v3382_v5 }
0x2352   :  { %3383 = vrcp.f32 %v2741_v45  ;;  %v2753_v32 = vand.u32 2147483648, %v2741_v45  ;;  %vm2747_vm2 = vweird.f32 %v2741_v45  ;;  %v2751_v54 = vand.u32 2147483647, %v2741_v45 }
0x2353   :  { %3385 = vrcp.f32 %v2681_v22  ;;  %v2693_v4 = vand.u32 2147483648, %v2681_v22  ;;  %vm2687_vm6 = vweird.f32 %v2681_v22  ;;  %v2691_v62 = vand.u32 2147483647, %v2681_v22 }
0x2354   :  { %v2754_v27 = vor.u32 1.1754944e-38, %v2753_v32  ;;  %vm2752_vm4 = vcmp.eq.f32.partialorder %v2751_v54, 8.507059e+37 }
0x2355   :  { %v2694_v10 = vor.u32 1.1754944e-38, %v2693_v4  ;;  %vm2692_vm8 = vcmp.eq.f32.partialorder %v2691_v62, 8.507059e+37 }
0x2358   :  { %v3384_v7 = vpop.eup %3383 }
0x2359   :  { %v2743_v50 = vmul.f32 %v3384_v7, %v2741_v45  ;;  %v3386_v51 = vpop.eup %3385  ;;  %vm2748_vm1 = vweird.f32 %v3384_v7 }
0x235a   :  { %v2683_v40 = vmul.f32 %v3386_v51, %v2681_v22  ;;  %vm2749_vm3 = vmor %vm2747_vm2, %vm2748_vm1  ;;  %vm2688_vm5 = vweird.f32 %v3386_v51 }
0x235b   :  { %v2744_v13 = vsub.f32 1.0, %v2743_v50  ;;  %vm2689_vm7 = vmor %vm2687_vm6, %vm2688_vm5 }
0x235c   :  { %v2684_v52 = vsub.f32 1.0, %v2683_v40 }
0x235d   :  { %v2745_v31 = vmul.f32 %v3384_v7, %v2744_v13 }
0x235e   :  { %v2685_v44 = vmul.f32 %v3386_v51, %v2684_v52 }
0x235f   :  { %v2746_v35 = vadd.f32 %v3384_v7, %v2745_v31 }
0x2360   :  { %v2686_v46 = vadd.f32 %v3386_v51, %v2685_v44 }
0x2361   :  { %v2750_v43 = vsel %vm2749_vm3, %v3384_v7, %v2746_v35  ;;  %v2925_v7 = vpop.f32.mrf.mxu1 }
0x2362   :  { %v2755_v49 = vsel %vm2752_vm4, %v2754_v27, %v2750_v43  ;;  %v2690_v63 = vsel %vm2689_vm7, %v3386_v51, %v2686_v46 }
0x2363   :  { %v2695_v0 = vsel %vm2692_vm8, %v2694_v10, %v2690_v63  ;;  %v2758_v56 = vmul.f32 %v2755_v49, %v4414_v16  ;;  %v2806_v16 = vld [vmem:[#allocation22] sm:$0xff] }
0x2364   :  { %v2698_v1 = vmul.f32 %v2695_v0, %v4419_v57  ;;  %2849 = vmatpush.msra.mxu0 %v2806_v16  ;;  %v2800_v57 = vld [vmem:[#allocation5 + $0x10] sm:$0xff] }
0x2369   :  { %v2928_v31 = vpop.f32.mrf.mxu1 }
0x2371   :  { %v2931_v32 = vpop.f32.mrf.mxu1 }
0x2379   :  { %v2934_v27 = vpop.f32.mrf.mxu1 }
0x23a1   :  { %v2761_v38 = vpop.permute.xlu0 %2760 }
0x23a2   :  { %v2763_v53 = vmul.f32 %v2761_v38, %v2755_v49 }
0x23a4   :  { %2765 = vrot.lane.b32.xlu1 %v2763_v53, %s3688_s20 }
0x23a9   :  { %v2701_v14 = vpop.permute.xlu2 %2700 }
0x23aa   :  { %v2703_v30 = vmul.f32 %v2701_v14, %v2695_v0 }
0x23ac   :  { %2705 = vrot.lane.b32.xlu1 %v2703_v30, %s3688_s20 }
0x2416   :  { %v2766_v36 = vpop.permute.xlu1 %2765 }
0x2417   :  { %v2768_v23 = vadd.f32 %v2766_v36, %v2758_v56 }
0x2419   :  { %3387 = vtanh.f32 %v2768_v23 }
0x241e   :  { %v2706_v15 = vpop.permute.xlu1 %2705 }
0x241f   :  { %v3388_v17 = vpop.eup %3387  ;;  %v2708_v48 = vadd.f32 %v2706_v15, %v2698_v1 }
0x2420   :  { %2771 = vrot.lane.b32.xlu0 %v3388_v17, %s3687_s4 }
0x2421   :  { %3389 = vtanh.f32 %v2708_v48 }
0x2427   :  { %v3390_v37 = vpop.eup %3389 }
0x2428   :  { %2711 = vrot.lane.b32.xlu0 %v3390_v37, %s3687_s4 }
0x2492   :  { %v2772_v25 = vpop.permute.xlu0 %2771 }
0x2493   :  { %v2774_v59 = vmul.f32 %v2772_v25, %v2755_v49 }
0x2495   :  { %2782 = vrot.lane.b32.xlu2 %v2774_v59, %s3688_s20 }
0x249a   :  { %v2712_v55 = vpop.permute.xlu0 %2711 }
0x249b   :  { %v2714_v60 = vmul.f32 %v2712_v55, %v2695_v0 }
0x249d   :  { %2776 = vrot.lane.b32.xlu1 %v2714_v60, %s3688_s20 }
0x24ef   :  { %v2783_v61 = vpop.permute.xlu2 %2782 }
0x24f0   :  { %2785 = vst.msk [vmem:[#allocation5] sm:$0xff] %vm223_vm0, %v2783_v61 }
0x24f7   :  { %v2798_v12 = vld [vmem:[#allocation5] sm:$0xff] }
0x24f8   :  { %3092 = vmatmul.msk.f32.vlgmr.msra.gmra.mxu0 %vm223_vm0, %v2798_v12 }
0x2500   :  { %3093 = vmatmul.msk.f32.gmra.mxu0 %vm223_vm0, %v2799_v18 }
0x2508   :  { %3094 = vmatmul.msk.f32.gmra.mxu0 %vm223_vm0, %v2800_v57 }
0x250f   :  { %v2777_v26 = vpop.permute.xlu1 %2776 }
0x2510   :  { %2780 = vst.msk [vmem:[#allocation4 + $0x38] sm:$0xff] %vm223_vm0, %v2777_v26  ;;  %3095 = vmatmul.msk.f32.gmra.mxu0 %vm223_vm0, %v2801_v58 }
0x2517   :  { %v2793_v33 = vld [vmem:[#allocation4 + $0x38] sm:$0xff] }
0x2518   :  { %3096 = vmatmul.msk.f32.gmra.mxu0 %vm223_vm0, %v2802_v11  ;;  %3107 = vmatmul.msk.f32.gmra.mxu1 %vm223_vm0, %v2793_v33 }
0x2520   :  { %3097 = vmatmul.msk.f32.gmra.mxu0 %vm223_vm0, %v2803_v9 }
0x2528   :  { %3098 = vmatmul.msk.f32.gmra.mxu0 %vm223_vm0, %v2804_v21 }
0x2530   :  { %3099 = vmatmul.msk.f32.gmra.mxu0 %vm223_vm0, %v2805_v2 }
0x2575   :  { %v2851_v24 = vpop.f32.mrf.mxu0 }
0x2576   :  { %v2917_v8 = vadd.f32 %v2916_v6, %v2851_v24 }
0x2578   :  { %v2944_v20 = vadd.f32 %v3134_v29, %v2917_v8 }
0x257a   :  { %2952 = vst [vmem:[#allocation24] sm:$0xff] %v2944_v20 }
0x257d   :  { %v2854_v28 = vpop.f32.mrf.mxu0 }
0x257e   :  { %v2920_v34 = vadd.f32 %v2919_v19, %v2854_v28 }
0x2580   :  { %v2945_v39 = vadd.f32 %v3134_v29, %v2920_v34 }
0x2582   :  { %2953 = vst [vmem:[#allocation24 + $0x8] sm:$0xff] %v2945_v39 }
0x2585   :  { %v2857_v45 = vpop.f32.mrf.mxu0 }
0x2586   :  { %v2923_v5 = vadd.f32 %v2922_v42, %v2857_v45 }
0x2588   :  { %v2946_v22 = vadd.f32 %v3134_v29, %v2923_v5 }
0x258a   :  { %2954 = vst [vmem:[#allocation24 + $0x10] sm:$0xff] %v2946_v22 }
0x258d   :  { %v2860_v50 = vpop.f32.mrf.mxu0 }
0x258e   :  { %v2926_v13 = vadd.f32 %v2925_v7, %v2860_v50 }
0x2590   :  { %v2947_v51 = vadd.f32 %v3134_v29, %v2926_v13 }
0x2592   :  { %2955 = vst [vmem:[#allocation24 + $0x18] sm:$0xff] %v2947_v51 }
0x2595   :  { %v2863_v40 = vpop.f32.mrf.mxu0  ;;  %v2937_v46 = vpop.f32.mrf.mxu1 }
0x2596   :  { %v2929_v35 = vadd.f32 %v2928_v31, %v2863_v40 }
0x2598   :  { %v2948_v52 = vadd.f32 %v3134_v29, %v2929_v35 }
0x259a   :  { %2956 = vst [vmem:[#allocation24 + $0x20] sm:$0xff] %v2948_v52 }
0x259d   :  { %v2866_v54 = vpop.f32.mrf.mxu0 }
0x259e   :  { %v2932_v43 = vadd.f32 %v2931_v32, %v2866_v54 }
0x25a0   :  { %v2949_v44 = vadd.f32 %v3134_v29, %v2932_v43 }
0x25a2   :  { %2957 = vst [vmem:[#allocation24 + $0x28] sm:$0xff] %v2949_v44 }
0x25a5   :  { %v2869_v38 = vpop.f32.mrf.mxu0 }
0x25a6   :  { %v2935_v49 = vadd.f32 %v2934_v27, %v2869_v38 }
0x25a8   :  { %v2950_v53 = vadd.f32 %v3134_v29, %v2935_v49 }
0x25aa   :  { %2958 = vst [vmem:[#allocation24 + $0x30] sm:$0xff] %v2950_v53 }
0x25ad   :  { %v2872_v4 = vpop.f32.mrf.mxu0 }
0x25ae   :  { %v2938_v62 = vadd.f32 %v2937_v46, %v2872_v4 }
0x25b0   :  { %v2951_v63 = vadd.f32 %v3134_v29, %v2938_v62 }
0x25b2   :  { %2959 = vst [vmem:[#allocation24 + $0x38] sm:$0xff] %v2951_v63 }
0x25b3   :  { %2972 = dma.vmem_to_hbm [thread:$0]  %s2965_s24, 1024, %s2967_s26, [#allocation9], %s3676_s22, %s3676_s22, %s3677_s23  }
0x25b4   :  { %3670 = dma.done.wait [#allocation9], 1024  }
0x25b5   :  { %3671 = vsyncadd [#allocation9], 4294966272 }
0x25b6   :  { %2977 = vsyncpa [#allocation8], 1 }
0x25b7   :  { %2978 = vsyncpa [#allocation11], 1 }
0x25b8   :  { %2979 = vsyncpa [#allocation14], 1 }
0x25b9   :  { %2980 = vsyncpa [#allocation17], 1 }
0x25ba   :  { %2981 = vsyncpa [#allocation20], 1 }
0x25bb   :  { %2982 = vsyncpa [#allocation23], 1 }
0x25bc   :  { %2983 = vsyncpa [#allocation9], 1 }

</bundles_post_ra>
